<compile_context>
chip_gen: v7x
topology: tpu7x:2x2x1
jax: 0.10.0
libtpu: 0.0.40
codegen_flags: <defaults>
</compile_context>

<pallas_src>
import numpy as np
import jax
import jax.numpy as jnp
from jax import lax
from jax.experimental import pallas as pl
from jax.experimental.pallas import tpu as pltpu


_LANES = 128
_PAD_COORD = 1.0e7      # K-padding coordinate: can never win a min vs real/2000-sentinel nodes
_INVALID_PEN = 1.0e12   # additive squared-distance penalty for invalid consistency nodes
_ACC_INIT = 1.0e30      # finite running-min init (always replaced by the first real chunk)


def _round_up(x, m):
    return ((x + m - 1) // m) * m


# ----------------------------------------------------------------------------
# Fused Pallas kernel: per-point offroad & consistency losses
# ----------------------------------------------------------------------------
def fused_central_pallas(traj, maps, *, CT, margin, dist_thr):
    """traj: (B, 2, CT) planes [x, y]; maps: (B, 8, K) planes
    [bnd_x, bnd_y, ctr_x, ctr_y, con_penalty, 0, 0, 0].
    Returns per-point (B, CT) offroad and consistency losses."""
    B = traj.shape[0]
    K = maps.shape[-1]

    # ---- K tiling: pad K up to a multiple of Kt (Kt a multiple of 128) -----
    Kt = min(_round_up(K, _LANES), 1024)
    Kpad = _round_up(K, Kt)
    if Kpad != K:
        pad_vals = jnp.array([_PAD_COORD] * 4 + [_INVALID_PEN] + [0.0] * 3,
                             jnp.float32)
        pad_blk = jnp.broadcast_to(pad_vals[None, :, None], (B, 8, Kpad - K))
        maps = jnp.concatenate([maps, pad_blk], axis=-1)
    nk = Kpad // Kt
    n_chunks = Kt // _LANES

    # ---- batch tiling: budget from real VMEM capacity ----------------------
    try:
        vmem_cap = int(pltpu.get_tpu_info().vmem_capacity_bytes)
    except Exception:
        vmem_cap = 64 * 1024 * 1024                       # conservative fallback
    vmem_limit = min(vmem_cap // 2, 64 * 1024 * 1024)     # 64 MiB v5e/v6e, 32 MiB v7x
    budget = vmem_limit // 2
    per_b = (CT * _LANES * 4 * 7        # 3 running-min scratches + ~4 live temporaries
             + 8 * Kt * 4 * 2           # double-buffered map slab block
             + 2 * CT * 4 * 2           # trajectory block
             + 2 * CT * 4 * 2)          # output blocks
    Bt = max(1, budget // per_b)
    Bt = max(8, (Bt // 8) * 8)          # sublane-dense outputs / no masked rows
    Bt = min(Bt, 64)
    # keep >= 2 batch grid steps when B allows, so v7x's two TCs both get work
    Bt = min(Bt, max(8, _round_up(pl.cdiv(B, 2), 8)))
    nb = pl.cdiv(B, Bt)
    Bpad = nb * Bt
    if Bpad != B:
        traj = jnp.pad(traj, ((0, Bpad - B), (0, 0), (0, 0)))
        maps = jnp.pad(maps, ((0, Bpad - B), (0, 0), (0, 0)))

    def kernel(traj_ref, maps_ref, off_ref, cons_ref, db_acc, dc_acc, dn_acc):
        k = pl.program_id(1)

        @pl.when(k == 0)
        def _():
            db_acc[...] = jnp.full_like(db_acc, _ACC_INIT)
            dc_acc[...] = jnp.full_like(dc_acc, _ACC_INIT)
            dn_acc[...] = jnp.full_like(dn_acc, _ACC_INIT)

        tr = traj_ref[...]                       # (Bt, 2, CT)
        px = tr[:, 0, :][:, :, None]             # (Bt, CT, 1)
        py = tr[:, 1, :][:, :, None]

        db = db_acc[...]                         # (Bt, CT, 128) running mins
        dc = dc_acc[...]
        dn = dn_acc[...]
        # 128-lane chunks: live temporaries stay (Bt, CT, 128) regardless of Kt.
        for c in range(n_chunks):                # static unroll, VALU-only inner loop
            lo = c * _LANES
            mp = maps_ref[:, :, lo:lo + _LANES]  # (Bt, 8, 128)
            bx = mp[:, 0:1, :]                   # (Bt, 1, 128)
            by = mp[:, 1:2, :]
            cx = mp[:, 2:3, :]
            cy = mp[:, 3:4, :]
            pen = mp[:, 4:5, :]
            db2 = (px - bx) ** 2 + (py - by) ** 2      # (Bt, CT, 128)
            dc2 = (px - cx) ** 2 + (py - cy) ** 2
            db = jnp.minimum(db, db2)
            dc = jnp.minimum(dc, dc2)
            dn = jnp.minimum(dn, dc2 + pen)            # consistency reuses dc2
        db_acc[...] = db
        dc_acc[...] = dc
        dn_acc[...] = dn

        @pl.when(k == pl.num_programs(1) - 1)
        def _():
            # single cross-lane reduce + sqrt + relu, only at the last K step
            d_b = jnp.sqrt(jnp.min(db_acc[...], axis=-1))   # (Bt, CT)
            d_c = jnp.sqrt(jnp.min(dc_acc[...], axis=-1))
            d_n = jnp.sqrt(jnp.min(dn_acc[...], axis=-1))
            off_ref[...] = jnp.maximum(d_c - d_b + margin, 0.0)
            cons_ref[...] = jnp.maximum(d_n - dist_thr, 0.0)

    # TODO(synk): if the kernel ever flips HBM-bound (it is compute-bound at
    # realistic CT), add pipeline_mode=pl.Buffered(3) on the map slab spec.
    off, cons = pl.pallas_call(
        kernel,
        out_shape=(jax.ShapeDtypeStruct((Bpad, CT), jnp.float32),
                   jax.ShapeDtypeStruct((Bpad, CT), jnp.float32)),
        grid=(nb, nk),
        in_specs=[pl.BlockSpec((Bt, 2, CT), lambda b, k: (b, 0, 0)),
                  pl.BlockSpec((Bt, 8, Kt), lambda b, k: (b, 0, k))],
        out_specs=(pl.BlockSpec((Bt, CT), lambda b, k: (b, 0)),
                   pl.BlockSpec((Bt, CT), lambda b, k: (b, 0))),
        scratch_shapes=[pltpu.VMEM((Bt, CT, _LANES), jnp.float32)] * 3,
        compiler_params=pltpu.CompilerParams(
            dimension_semantics=("parallel", "arbitrary"),
            vmem_limit_bytes=int(vmem_limit)),
    )(traj, maps)
    return off[:B], cons[:B]


# ----------------------------------------------------------------------------
# Mode-diversity: O(B*C^2*T) — plain JAX in the wrapper (moved out of kernel)
# ----------------------------------------------------------------------------
def _pairwise_mode_distance(pred, all_points):
    # pred: (B, C, T, 2)
    # TODO(synk): sqrt(0) on the diagonal gives NaN grads if a VJP is attached;
    #             forward-pass exact (diagonal is zero-weighted downstream).
    if all_points:
        diff = pred[:, :, None, :, :] - pred[:, None, :, :, :]      # (B,C,C,T,2)
        d = jnp.sqrt(jnp.sum(diff * diff, axis=-1))                  # (B,C,C,T)
        return d.mean(axis=-1)                                       # (B,C,C)
    last = pred[:, :, -1, :]                                         # (B,C,2)
    diff = last[:, :, None, :] - last[:, None, :, :]
    return jnp.sqrt(jnp.sum(diff * diff, axis=-1))                   # (B,C,C)


# ----------------------------------------------------------------------------
# CentralLoss forward (glue in plain JAX, hot paths in the fused kernel)
# ----------------------------------------------------------------------------
def central_loss_forward(pred_traj, inputs, config):
    """pred_traj: (B, C, T, 2) float32.  Implements the 'combination' path of
    CentralLoss.forward for an all-'waymo' batch (host-side dataset_name
    branching resolved in Python, as in the original)."""
    pred_traj = pred_traj[..., :2]
    B, C, T, _ = pred_traj.shape
    CT = C * T

    dataset_name = np.array(inputs["dataset_name"])
    waymo_mask = dataset_name == "waymo"
    assert np.all(waymo_mask), "this script exercises the all-waymo branch"
    # TODO(synk): OffroadLossPolygons (nuScenes drivable-polygon branch) and
    #             the node_feats consistency branch are not exercised; their
    #             sources are unavailable.

    map_lanes_full = inputs["map_polylines"]          # (B, P, N, D)
    map_mask = inputs["map_polylines_mask"]           # (B, P, N) bool
    P, N = map_lanes_full.shape[1], map_lanes_full.shape[2]
    K = P * N

    map_type = jnp.argmax(map_lanes_full[..., 0, -20:], axis=-1)     # (B, P)
    map_lanes = map_lanes_full[..., :2]                              # (B, P, N, 2)

    # fill_invalid_nodes (cummax of last-valid index + gather) -- glue JAX
    idx = jnp.arange(N, dtype=jnp.int32)[None, None, :]
    valid_idx = jnp.where(map_mask, idx, -1)
    last_valid = jnp.maximum(lax.cummax(valid_idx, axis=2), 0)
    gather_idx = jnp.broadcast_to(last_valid[..., None], map_lanes.shape)
    filled = jnp.take_along_axis(map_lanes, gather_idx, axis=2)
    filled = jnp.where(map_mask[..., None], map_lanes, filled)

    is_center = map_type == 2                                        # (B, P)
    is_boundary = map_type == 15
    centerlines = jnp.where(is_center[:, :, None, None], filled, 2000.0)
    road_boundary = jnp.where(is_boundary[:, :, None, None], filled, 2000.0)

    # valid centerline nodes for the consistency term (uses un-filled == valid coords)
    node_valid = map_mask & is_center[:, :, None]                    # (B, P, N)
    penalty = jnp.where(node_valid, 0.0, _INVALID_PEN)               # (B, P, N)

    # ---- pack kernel inputs (single 8-sublane map slab, lane-dense traj) ---
    px = pred_traj[..., 0].reshape(B, CT)
    py = pred_traj[..., 1].reshape(B, CT)
    traj = jnp.stack([px, py], axis=1).astype(jnp.float32)           # (B, 2, CT)

    zeros_k = jnp.zeros((B, K), jnp.float32)
    maps = jnp.stack([road_boundary[..., 0].reshape(B, K),
                      road_boundary[..., 1].reshape(B, K),
                      centerlines[..., 0].reshape(B, K),
                      centerlines[..., 1].reshape(B, K),
                      penalty.reshape(B, K),
                      zeros_k, zeros_k, zeros_k],
                     axis=1).astype(jnp.float32)                     # (B, 8, K)

    off_pts, cons_pts = fused_central_pallas(
        traj, maps, CT=CT,
        margin=float(config["offroad_margin"]),
        dist_thr=float(config["consistency_distance_threshold"]))

    offroad_pts = off_pts.reshape(B, C, T)
    cons_pts = cons_pts.reshape(B, C, T)

    # ---------------- offroad loss ----------------
    offroad_loss = offroad_pts.mean(axis=-1)                         # (B, C)
    no_map = jnp.logical_or(is_center.sum(axis=1) == 0,
                            is_boundary.sum(axis=1) == 0)            # (B,)
    offroad_loss = jnp.where(no_map[:, None], 0.0, offroad_loss)
    loss = offroad_loss.mean(axis=-1) * config["offroad_loss_weight"]    # (B,)

    # ---------------- consistency loss (waymo -> 'others' path) ----------------
    consistency_loss = cons_pts.mean(axis=-1)                        # (B, C)
    consistency_loss = jnp.where((is_center.sum(axis=1) == 0)[:, None],
                                 0.0, consistency_loss)
    # finite-sentinel counterpart of torch.isinf(...)=0: samples with zero
    # valid centerline nodes are exactly those that produced inf upstream.
    no_valid_nodes = node_valid.reshape(B, K).sum(axis=-1) == 0
    consistency_loss = jnp.where(no_valid_nodes[:, None], 0.0, consistency_loss)
    loss = loss + consistency_loss.mean(axis=-1) * config["consistency_loss_weight"]
    # TODO(synk): yaw-threshold term of ConsistencyMetric not implemented
    #             (submodule source unavailable).

    # ---------------- diversity loss (plain JAX) ----------------
    pair_d = _pairwise_mode_distance(pred_traj.astype(jnp.float32),
                                     bool(config["diversity_all_points"]))
    if config["diversity_remove_offroads"]:
        valid_mode = (offroad_loss <= config["diversity_offroad_threshold"]).astype(jnp.float32)
    else:
        valid_mode = jnp.ones((B, C), jnp.float32)
    pair_w = valid_mode[:, :, None] * valid_mode[:, None, :] * (1.0 - jnp.eye(C))[None]
    diversity_loss = (pair_d * pair_w).sum(axis=(1, 2)) / jnp.maximum(
        pair_w.sum(axis=(1, 2)), 1.0)                                # (B,)
    loss = loss - diversity_loss * config["diversity_loss_weight"]

    return loss.mean()


# ----------------------------------------------------------------------------
# Demo
# ----------------------------------------------------------------------------
if __name__ == "__main__":
    config = {
        "offroad_margin": 0.5,
        "consistency_distance_threshold": 2.0,
        "consistency_yaw_threshold": 0.5,
        "diversity_remove_offroads": True,
        "diversity_offroad_threshold": 0.5,
        "diversity_all_points": True,
        "aux_loss_type": "combination",
        "offroad_loss_weight": 1.0,
        "consistency_loss_weight": 1.0,
        "diversity_loss_weight": 0.1,
    }

    B, C, T = 2, 4, 8          # batch, modes, timesteps
    P, N = 8, 16               # polylines, points-per-polyline (K = 128)

    key = jax.random.PRNGKey(0)
    k1, k2, k3 = jax.random.split(key, 3)

    traj = jax.random.uniform(k1, (B, C, T, 2), jnp.float32, -8.0, 8.0)
    xy = jax.random.uniform(k2, (B, P, N, 2), jnp.float32, -10.0, 10.0)
    # polyline types: 2 = centerline, 15 = road boundary (one-hot in last 20 feats)
    types = jnp.array([[2, 15, 2, 15, 1, 2, 15, 3],
                       [2, 2, 15, 15, 6, 2, 15, 0]], dtype=jnp.int32)
    onehot = jax.nn.one_hot(types, 20, dtype=jnp.float32)            # (B, P, 20)
    onehot = jnp.broadcast_to(onehot[:, :, None, :], (B, P, N, 20))
    map_polylines = jnp.concatenate([xy, onehot], axis=-1)           # (B, P, N, 22)
    map_mask = jax.random.bernoulli(k3, 0.8, (B, P, N))

    inputs = {
        "dataset_name": ["waymo", "waymo"],
        "map_polylines": map_polylines,
        "map_polylines_mask": map_mask,
    }

    loss = central_loss_forward(traj, inputs, config)
    jax.block_until_ready(loss)
    assert np.isfinite(np.asarray(loss))
    print("KERNEL_OK")
</pallas_src>

<mosaic_0001>
module attributes {stable_mosaic.version = 11 : i64} {
  func.func @kernel(%arg0: i32, %arg1: i32, %arg2: memref<8x2x32xf32, #tpu.memory_space<vmem>>, %arg3: memref<8x8x128xf32, #tpu.memory_space<vmem>>, %arg4: memref<8x32xf32, #tpu.memory_space<vmem>>, %arg5: memref<8x32xf32, #tpu.memory_space<vmem>>, %arg6: memref<8x32x128xf32, #tpu.memory_space<vmem>>, %arg7: memref<8x32x128xf32, #tpu.memory_space<vmem>>, %arg8: memref<8x32x128xf32, #tpu.memory_space<vmem>>) attributes {dimension_semantics = [#tpu.dimension_semantics<parallel>, #tpu.dimension_semantics<arbitrary>], iteration_bounds = array<i64: 1, 1>, scalar_prefetch = 0 : i64, scratch_operands = 3 : i64, tpu.core_type = #tpu.core_type<tc>, window_params = [{transform_indices = @transform_0, window_bounds = array<i64: 8, 2, 32>}, {transform_indices = @transform_1, window_bounds = array<i64: 8, 8, 128>}, {transform_indices = @transform_2, window_bounds = array<i64: 8, 32>}, {transform_indices = @transform_3, window_bounds = array<i64: 8, 32>}]} {
    %c0_i32 = arith.constant 0 : i32
    %0 = arith.cmpi eq, %arg1, %c0_i32 : i32
    %1 = arith.extui %0 : i1 to i32
    %c0_i32_0 = arith.constant 0 : i32
    %2 = arith.cmpi ne, %1, %c0_i32_0 : i32
    scf.if %2 {
      %cst = arith.constant 1.000000e+30 : f32
      %48 = vector.broadcast %cst : f32 to vector<8x32x128xf32>
      %c0_26 = arith.constant 0 : index
      %c0_27 = arith.constant 0 : index
      %c0_28 = arith.constant 0 : index
      %49 = vector.load %arg6[%c0_26, %c0_27, %c0_28] : memref<8x32x128xf32, #tpu.memory_space<vmem>>, vector<8x32x128xf32>
      tpu.vector_store %arg6[%c0_26, %c0_27, %c0_28], %48 {strides = array<i32>} : memref<8x32x128xf32, #tpu.memory_space<vmem>>, vector<8x32x128xf32>,
      %cst_29 = arith.constant 1.000000e+30 : f32
      %50 = vector.broadcast %cst_29 : f32 to vector<8x32x128xf32>
      %c0_30 = arith.constant 0 : index
      %c0_31 = arith.constant 0 : index
      %c0_32 = arith.constant 0 : index
      %51 = vector.load %arg7[%c0_30, %c0_31, %c0_32] : memref<8x32x128xf32, #tpu.memory_space<vmem>>, vector<8x32x128xf32>
      tpu.vector_store %arg7[%c0_30, %c0_31, %c0_32], %50 {strides = array<i32>} : memref<8x32x128xf32, #tpu.memory_space<vmem>>, vector<8x32x128xf32>,
      %cst_33 = arith.constant 1.000000e+30 : f32
      %52 = vector.broadcast %cst_33 : f32 to vector<8x32x128xf32>
      %c0_34 = arith.constant 0 : index
      %c0_35 = arith.constant 0 : index
      %c0_36 = arith.constant 0 : index
      %53 = vector.load %arg8[%c0_34, %c0_35, %c0_36] : memref<8x32x128xf32, #tpu.memory_space<vmem>>, vector<8x32x128xf32>
      tpu.vector_store %arg8[%c0_34, %c0_35, %c0_36], %52 {strides = array<i32>} : memref<8x32x128xf32, #tpu.memory_space<vmem>>, vector<8x32x128xf32>,
    } else {
    }
    %c0 = arith.constant 0 : index
    %c0_1 = arith.constant 0 : index
    %c0_2 = arith.constant 0 : index
    %3 = vector.load %arg2[%c0, %c0_1, %c0_2] : memref<8x2x32xf32, #tpu.memory_space<vmem>>, vector<8x2x32xf32>
    %4 = vector.extract_strided_slice %3 {offsets = [0, 0, 0], sizes = [8, 1, 32], strides = [1, 1, 1]} : vector<8x2x32xf32> to vector<8x1x32xf32>
    %5 = vector.shape_cast %4 : vector<8x1x32xf32> to vector<8x32xf32>
    %6 = vector.shape_cast %5 : vector<8x32xf32> to vector<8x32x1xf32>
    %7 = vector.extract_strided_slice %3 {offsets = [0, 1, 0], sizes = [8, 1, 32], strides = [1, 1, 1]} : vector<8x2x32xf32> to vector<8x1x32xf32>
    %8 = vector.shape_cast %7 : vector<8x1x32xf32> to vector<8x32xf32>
    %9 = vector.shape_cast %8 : vector<8x32xf32> to vector<8x32x1xf32>
    %c0_3 = arith.constant 0 : index
    %c0_4 = arith.constant 0 : index
    %c0_5 = arith.constant 0 : index
    %10 = vector.load %arg6[%c0_3, %c0_4, %c0_5] : memref<8x32x128xf32, #tpu.memory_space<vmem>>, vector<8x32x128xf32>
    %c0_6 = arith.constant 0 : index
    %c0_7 = arith.constant 0 : index
    %c0_8 = arith.constant 0 : index
    %11 = vector.load %arg7[%c0_6, %c0_7, %c0_8] : memref<8x32x128xf32, #tpu.memory_space<vmem>>, vector<8x32x128xf32>
    %c0_9 = arith.constant 0 : index
    %c0_10 = arith.constant 0 : index
    %c0_11 = arith.constant 0 : index
    %12 = vector.load %arg8[%c0_9, %c0_10, %c0_11] : memref<8x32x128xf32, #tpu.memory_space<vmem>>, vector<8x32x128xf32>
    %c0_12 = arith.constant 0 : index
    %c0_13 = arith.constant 0 : index
    %c0_14 = arith.constant 0 : index
    %13 = vector.load %arg3[%c0_12, %c0_13, %c0_14] : memref<8x8x128xf32, #tpu.memory_space<vmem>>, vector<8x8x128xf32>
    %14 = vector.extract_strided_slice %13 {offsets = [0, 0, 0], sizes = [8, 1, 128], strides = [1, 1, 1]} : vector<8x8x128xf32> to vector<8x1x128xf32>
    %15 = vector.extract_strided_slice %13 {offsets = [0, 1, 0], sizes = [8, 1, 128], strides = [1, 1, 1]} : vector<8x8x128xf32> to vector<8x1x128xf32>
    %16 = vector.extract_strided_slice %13 {offsets = [0, 2, 0], sizes = [8, 1, 128], strides = [1, 1, 1]} : vector<8x8x128xf32> to vector<8x1x128xf32>
    %17 = vector.extract_strided_slice %13 {offsets = [0, 3, 0], sizes = [8, 1, 128], strides = [1, 1, 1]} : vector<8x8x128xf32> to vector<8x1x128xf32>
    %18 = vector.extract_strided_slice %13 {offsets = [0, 4, 0], sizes = [8, 1, 128], strides = [1, 1, 1]} : vector<8x8x128xf32> to vector<8x1x128xf32>
    %19 = vector.broadcast %6 : vector<8x32x1xf32> to vector<8x32x128xf32>
    %20 = vector.broadcast %14 : vector<8x1x128xf32> to vector<8x32x128xf32>
    %21 = arith.subf %19, %20 : vector<8x32x128xf32>
    %22 = arith.mulf %21, %21 : vector<8x32x128xf32>
    %23 = vector.broadcast %9 : vector<8x32x1xf32> to vector<8x32x128xf32>
    %24 = vector.broadcast %15 : vector<8x1x128xf32> to vector<8x32x128xf32>
    %25 = arith.subf %23, %24 : vector<8x32x128xf32>
    %26 = arith.mulf %25, %25 : vector<8x32x128xf32>
    %27 = arith.addf %22, %26 : vector<8x32x128xf32>
    %28 = vector.broadcast %6 : vector<8x32x1xf32> to vector<8x32x128xf32>
    %29 = vector.broadcast %16 : vector<8x1x128xf32> to vector<8x32x128xf32>
    %30 = arith.subf %28, %29 : vector<8x32x128xf32>
    %31 = arith.mulf %30, %30 : vector<8x32x128xf32>
    %32 = vector.broadcast %9 : vector<8x32x1xf32> to vector<8x32x128xf32>
    %33 = vector.broadcast %17 : vector<8x1x128xf32> to vector<8x32x128xf32>
    %34 = arith.subf %32, %33 : vector<8x32x128xf32>
    %35 = arith.mulf %34, %34 : vector<8x32x128xf32>
    %36 = arith.addf %31, %35 : vector<8x32x128xf32>
    %37 = arith.minimumf %10, %27 : vector<8x32x128xf32>
    %38 = arith.minimumf %11, %36 : vector<8x32x128xf32>
    %39 = vector.broadcast %18 : vector<8x1x128xf32> to vector<8x32x128xf32>
    %40 = arith.addf %36, %39 : vector<8x32x128xf32>
    %41 = arith.minimumf %12, %40 : vector<8x32x128xf32>
    %c0_15 = arith.constant 0 : index
    %c0_16 = arith.constant 0 : index
    %c0_17 = arith.constant 0 : index
    %42 = vector.load %arg6[%c0_15, %c0_16, %c0_17] : memref<8x32x128xf32, #tpu.memory_space<vmem>>, vector<8x32x128xf32>
    tpu.vector_store %arg6[%c0_15, %c0_16, %c0_17], %37 {strides = array<i32>} : memref<8x32x128xf32, #tpu.memory_space<vmem>>, vector<8x32x128xf32>,
    %c0_18 = arith.constant 0 : index
    %c0_19 = arith.constant 0 : index
    %c0_20 = arith.constant 0 : index
    %43 = vector.load %arg7[%c0_18, %c0_19, %c0_20] : memref<8x32x128xf32, #tpu.memory_space<vmem>>, vector<8x32x128xf32>
    tpu.vector_store %arg7[%c0_18, %c0_19, %c0_20], %38 {strides = array<i32>} : memref<8x32x128xf32, #tpu.memory_space<vmem>>, vector<8x32x128xf32>,
    %c0_21 = arith.constant 0 : index
    %c0_22 = arith.constant 0 : index
    %c0_23 = arith.constant 0 : index
    %44 = vector.load %arg8[%c0_21, %c0_22, %c0_23] : memref<8x32x128xf32, #tpu.memory_space<vmem>>, vector<8x32x128xf32>
    tpu.vector_store %arg8[%c0_21, %c0_22, %c0_23], %41 {strides = array<i32>} : memref<8x32x128xf32, #tpu.memory_space<vmem>>, vector<8x32x128xf32>,
    %c0_i32_24 = arith.constant 0 : i32
    %45 = arith.cmpi eq, %arg1, %c0_i32_24 : i32
    %46 = arith.extui %45 : i1 to i32
    %c0_i32_25 = arith.constant 0 : i32
    %47 = arith.cmpi ne, %46, %c0_i32_25 : i32
    scf.if %47 {
      %c0_26 = arith.constant 0 : index
      %c0_27 = arith.constant 0 : index
      %c0_28 = arith.constant 0 : index
      %48 = vector.load %arg6[%c0_26, %c0_27, %c0_28] : memref<8x32x128xf32, #tpu.memory_space<vmem>>, vector<8x32x128xf32>
      %cst = arith.constant dense<0x7F800000> : vector<8x32xf32>
      %49 = vector.multi_reduction <minimumf>, %48, %cst [2] : vector<8x32x128xf32> to vector<8x32xf32>
      %50 = math.sqrt %49 : vector<8x32xf32>
      %c0_29 = arith.constant 0 : index
      %c0_30 = arith.constant 0 : index
      %c0_31 = arith.constant 0 : index
      %51 = vector.load %arg7[%c0_29, %c0_30, %c0_31] : memref<8x32x128xf32, #tpu.memory_space<vmem>>, vector<8x32x128xf32>
      %cst_32 = arith.constant dense<0x7F800000> : vector<8x32xf32>
      %52 = vector.multi_reduction <minimumf>, %51, %cst_32 [2] : vector<8x32x128xf32> to vector<8x32xf32>
      %53 = math.sqrt %52 : vector<8x32xf32>
      %c0_33 = arith.constant 0 : index
      %c0_34 = arith.constant 0 : index
      %c0_35 = arith.constant 0 : index
      %54 = vector.load %arg8[%c0_33, %c0_34, %c0_35] : memref<8x32x128xf32, #tpu.memory_space<vmem>>, vector<8x32x128xf32>
      %cst_36 = arith.constant dense<0x7F800000> : vector<8x32xf32>
      %55 = vector.multi_reduction <minimumf>, %54, %cst_36 [2] : vector<8x32x128xf32> to vector<8x32xf32>
      %56 = math.sqrt %55 : vector<8x32xf32>
      %57 = arith.subf %53, %50 : vector<8x32xf32>
      %cst_37 = arith.constant 5.000000e-01 : f32
      %58 = vector.broadcast %cst_37 : f32 to vector<8x32xf32>
      %59 = arith.addf %57, %58 : vector<8x32xf32>
      %cst_38 = arith.constant 0.000000e+00 : f32
      %60 = vector.broadcast %cst_38 : f32 to vector<8x32xf32>
      %61 = arith.maximumf %59, %60 : vector<8x32xf32>
      %c0_39 = arith.constant 0 : index
      %c0_40 = arith.constant 0 : index
      %62 = vector.load %arg4[%c0_39, %c0_40] : memref<8x32xf32, #tpu.memory_space<vmem>>, vector<8x32xf32>
      tpu.vector_store %arg4[%c0_39, %c0_40], %61 {strides = array<i32>} : memref<8x32xf32, #tpu.memory_space<vmem>>, vector<8x32xf32>,
      %cst_41 = arith.constant 2.000000e+00 : f32
      %63 = vector.broadcast %cst_41 : f32 to vector<8x32xf32>
      %64 = arith.subf %56, %63 : vector<8x32xf32>
      %cst_42 = arith.constant 0.000000e+00 : f32
      %65 = vector.broadcast %cst_42 : f32 to vector<8x32xf32>
      %66 = arith.maximumf %64, %65 : vector<8x32xf32>
      %c0_43 = arith.constant 0 : index
      %c0_44 = arith.constant 0 : index
      %67 = vector.load %arg5[%c0_43, %c0_44] : memref<8x32xf32, #tpu.memory_space<vmem>>, vector<8x32xf32>
      tpu.vector_store %arg5[%c0_43, %c0_44], %66 {strides = array<i32>} : memref<8x32xf32, #tpu.memory_space<vmem>>, vector<8x32xf32>,
    } else {
    }
    return
  }
  func.func @transform_0(%arg0: i32, %arg1: i32) -> (i32, i32, i32) {
    %c0_i32 = arith.constant 0 : i32
    %c0_i32_0 = arith.constant 0 : i32
    %c0_i32_1 = arith.constant 0 : i32
    return %arg0, %c0_i32, %c0_i32_0 : i32, i32, i32
  }
  func.func @transform_1(%arg0: i32, %arg1: i32) -> (i32, i32, i32) {
    %c0_i32 = arith.constant 0 : i32
    %c0_i32_0 = arith.constant 0 : i32
    return %arg0, %c0_i32, %arg1 : i32, i32, i32
  }
  func.func @transform_2(%arg0: i32, %arg1: i32) -> (i32, i32) {
    %c0_i32 = arith.constant 0 : i32
    %c0_i32_0 = arith.constant 0 : i32
    return %arg0, %c0_i32 : i32, i32
  }
  func.func @transform_3(%arg0: i32, %arg1: i32) -> (i32, i32) {
    %c0_i32 = arith.constant 0 : i32
    %c0_i32_0 = arith.constant 0 : i32
    return %arg0, %c0_i32 : i32, i32
  }
}

</mosaic_0001>

<bundles_post_ra>
// kernel: tpu_custom_call.1
= control target key start
LH: loop header
LB: loop body
LE: loop exit
PB: predicated region body
PF: predicated region fallthrough
CT: control target
= control target key end

     0   :  { %9 = vsyncpa [#allocation6], 0  ;;  %s5610_s0 = inlined_call_operand.hbm [shape: f32[8,2,32], index: 0, kind: input, shape index: {}]   ;;  %s5611_s1 = inlined_call_operand.hbm [shape: f32[8,8,128], index: 1, kind: input, shape index: {}]   ;;  %s5612_s2 = inlined_call_operand.hbm [shape: f32[8,32], index: 2, kind: output, shape index: {0}]   ;;  %s5613_s3 = inlined_call_operand.hbm [shape: f32[8,32], index: 3, kind: output, shape index: {1}]  }
   0x1   :  { %10 = vsyncpa [#allocation9], 0 }
   0x2   :  { %11 = vsyncpa [#allocation7], 0 }
   0x3   :  { %12 = vsyncpa [#allocation12], 0  ;;  %s3150_s12 = smov [#allocation5]   ;;  %s3054_s16 = scalar_lea.hbm %s5610_s0, 256 }
   0x4   :  { %s18_s13 = sshll.u32 %s3150_s12, 4  ;;  %p3055_p0 = scmp.ne.s32.totalorder %s5610_s0, %s3054_s16  ;;  %s19_s13 = int_to_ptr.vmem [resolvable:$true] %s18_s13 }
   0x5   :  { %p3058_p1 = scmp.lt.u32.totalorder %s3054_s16, %s5610_s0 }
   0x7   :  { %p3060_p2 = pnand %p3058_p1, %p3055_p0 }
   0x9   :  { %3063 = shalt.err (!%p3060_p2)
}
   0xa   :  { %s3064_s21 = scalar_lea.vmem %s19_s13, 256  ;;  %p3069_p4 = scmp.lt.s32.totalorder %s19_s13, %s19_s13 }
   0xb   :  { %p3065_p3 = scmp.ne.s32.totalorder %s19_s13, %s3064_s21  ;;  %p3070_p5 = scmp.lt.s32.totalorder %s3064_s21, %s3064_s21 }
   0xd   :  { %p3071_p6 = por %p3070_p5, %p3069_p4 }
   0xf   :  { %p3072_p7 = pnand %p3071_p6, %p3065_p3 }
  0x11   :  { %3075 = shalt.err (!%p3072_p7)
}
  0x12   :  { %s3151_s22 = smov 32   ;;  %s3152_s23 = smov 2  }
  0x13   :  { %24 = dma.hbm_to_vmem [thread:$0]  %s5610_s0, 256, %s19_s13, [#allocation6], %s3151_s22, %s3151_s22, %s3152_s23  }
  0x14   :  { %s3153_s26 = smov [#allocation8]   ;;  %s3076_s30 = scalar_lea.hbm %s5611_s1, 1024 }
  0x15   :  { %s30_s27 = sshll.u32 %s3153_s26, 4  ;;  %p3077_p8 = scmp.ne.s32.totalorder %s5611_s1, %s3076_s30  ;;  %s31_s27 = int_to_ptr.vmem [resolvable:$true] %s30_s27 }
  0x16   :  { %p3080_p9 = scmp.lt.u32.totalorder %s3076_s30, %s5611_s1 }
  0x18   :  { %p3082_p10 = pnand %p3080_p9, %p3077_p8 }
  0x1a   :  { %3085 = shalt.err (!%p3082_p10)
}
  0x1b   :  { %s3086_s8 = scalar_lea.vmem %s31_s27, 1024  ;;  %p3091_p12 = scmp.lt.s32.totalorder %s31_s27, %s31_s27 }
  0x1c   :  { %p3087_p11 = scmp.ne.s32.totalorder %s31_s27, %s3086_s8  ;;  %p3092_p13 = scmp.lt.s32.totalorder %s3086_s8, %s3086_s8 }
  0x1e   :  { %p3093_p0 = por %p3092_p13, %p3091_p12 }
  0x20   :  { %p3094_p1 = pnand %p3093_p0, %p3087_p11 }
  0x22   :  { %3097 = shalt.err (!%p3094_p1)
}
  0x23   :  { %s3154_s0 = smov 128   ;;  %s3155_s9 = smov 8  }
  0x24   :  { %36 = dma.hbm_to_vmem [thread:$0]  %s5611_s1, 1024, %s31_s27, [#allocation9], %s3154_s0, %s3154_s0, %s3155_s9  }
  0x25   :  { %3142 = dma.done.wait [#allocation6], 256  }
  0x26   :  { %3143 = vsyncadd [#allocation6], 4294967040 }
  0x27   :  { %3144 = dma.done.wait [#allocation9], 1024  }
  0x28   :  { %3145 = vsyncadd [#allocation9], 4294966272  ;;  %v5614_v0 = vlaneseq  ;;  %v143_v3 = vld [vmem:[#allocation5] sm:$0x3]  ;;  %v144_v5 = vld [vmem:[#allocation5 + $0x2] sm:$0x3] }
  0x29   :  { %v145_v7 = vld [vmem:[#allocation5 + $0x4] sm:$0x3]  ;;  %v146_v9 = vld [vmem:[#allocation5 + $0x6] sm:$0x3]  ;;  %v147_v11 = vld [vmem:[#allocation5 + $0x8] sm:$0x3] }
  0x2a   :  { %v3203_v1 = vshrl.u32 %v5614_v0, 7  ;;  %v148_v13 = vld [vmem:[#allocation5 + $0xa] sm:$0x3]  ;;  %v149_v15 = vld [vmem:[#allocation5 + $0xc] sm:$0x3]  ;;  %v3287_v58 = vld [vmem:[#allocation8] sm:$0xff] }
  0x2b   :  { %v150_v17 = vld [vmem:[#allocation5 + $0xe] sm:$0x3]  ;;  %5697 = vst [vmem:[#allocation37_spill] sm:$0xff] %v3287_v58  ;;  %v3298_v63 = vld [vmem:[#allocation8 + $0x8] sm:$0xff]  ;;  %s3156_s1 = smov [#allocation10]  }
  0x2c   :  { %5677 = vst [vmem:[#allocation17_spill] sm:$0xff] %v3203_v1  ;;  %v3206_v2 = vsub.s32 0, %v3203_v1  ;;  %v3217_v19 = vsub.s32 1, %v3203_v1  ;;  %v3292_v60 = vsub.s32 2, %v3203_v1  ;;  %5701 = vst [vmem:[#allocation41_spill] sm:$0xff] %v3298_v63  ;;  %s2794_s12 = sshll.u32 %s3156_s1, 4  ;;  %s2795_s12 = int_to_ptr.vmem [resolvable:$true] %s2794_s12 }
  0x2d   :  { %s3098_s13 = scalar_lea.vmem %s2795_s12, 128  ;;  %p3103_p3 = scmp.lt.s32.totalorder %s2795_s12, %s2795_s12 }
  0x2e   :  { %v154_v4 = vrot.slane %v143_v3, %v3206_v2  ;;  %v173_v6 = vrot.slane %v144_v5, %v3206_v2  ;;  %v192_v8 = vrot.slane %v145_v7, %v3206_v2  ;;  %v211_v10 = vrot.slane %v146_v9, %v3206_v2  ;;  %5698 = vst [vmem:[#allocation38_spill] sm:$0xff] %v3292_v60  ;;  %p3099_p2 = scmp.ne.s32.totalorder %s2795_s12, %s3098_s13  ;;  %p3104_p4 = scmp.lt.s32.totalorder %s3098_s13, %s3098_s13 }
  0x2f   :  { %v230_v12 = vrot.slane %v147_v11, %v3206_v2  ;;  %v249_v14 = vrot.slane %v148_v13, %v3206_v2  ;;  %v268_v16 = vrot.slane %v149_v15, %v3206_v2  ;;  %v287_v18 = vrot.slane %v150_v17, %v3206_v2 }
  0x30   :  { %164 = vbcast.lane.b32.xlu1 %v154_v4, 272  ;;  %156 = vbcast.lane.b32.xlu0 %v154_v4, 256  ;;  %v306_v20 = vrot.slane %v143_v3, %v3217_v19  ;;  %v325_v21 = vrot.slane %v144_v5, %v3217_v19  ;;  %v344_v22 = vrot.slane %v145_v7, %v3217_v19  ;;  %v3304_v5 = vld [vmem:[#allocation8 + $0x18] sm:$0xff]  ;;  %v3308_v7 = vld [vmem:[#allocation8 + $0x28] sm:$0xff]  ;;  %p3105_p5 = por %p3104_p4, %p3103_p3 }
  0x31   :  { %v363_v23 = vrot.slane %v146_v9, %v3217_v19  ;;  %v382_v24 = vrot.slane %v147_v11, %v3217_v19  ;;  %v401_v25 = vrot.slane %v148_v13, %v3217_v19  ;;  %v420_v26 = vrot.slane %v149_v15, %v3217_v19  ;;  %5703 = vst [vmem:[#allocation43_spill] sm:$0xff] %v3304_v5 }
  0x32   :  { %v439_v29 = vrot.slane %v150_v17, %v3217_v19  ;;  %v562_v59 = vrot.slane %v3287_v58, %v3206_v2  ;;  %v658_v3 = vrot.slane %v3287_v58, %v3217_v19  ;;  %5705 = vst [vmem:[#allocation45_spill] sm:$0xff] %v3308_v7  ;;  %v3318_v11 = vrot.slane %v3298_v63, %v3206_v2  ;;  %p3106_p6 = pnand %p3105_p5, %p3099_p2 }
  0x34   :  { %168 = vbcast.lane.b32.xlu1 %v154_v4, 280  ;;  %160 = vbcast.lane.b32.xlu0 %v154_v4, 264  ;;  %v3302_v4 = vld [vmem:[#allocation8 + $0x10] sm:$0xff] }
  0x35   :  { %5702 = vst [vmem:[#allocation42_spill] sm:$0xff] %v3302_v4  ;;  %v3330_v15 = vrot.slane %v3302_v4, %v3206_v2 }
  0x38   :  { %179 = vbcast.lane.b32.xlu1 %v173_v6, 264  ;;  %175 = vbcast.lane.b32.xlu0 %v173_v6, 256 }
  0x3c   :  { %187 = vbcast.lane.b32.xlu1 %v173_v6, 280  ;;  %183 = vbcast.lane.b32.xlu0 %v173_v6, 272  ;;  %v3306_v6 = vld [vmem:[#allocation8 + $0x20] sm:$0xff] }
  0x3d   :  { %5704 = vst [vmem:[#allocation44_spill] sm:$0xff] %v3306_v6 }
  0x40   :  { %198 = vbcast.lane.b32.xlu1 %v192_v8, 264  ;;  %194 = vbcast.lane.b32.xlu0 %v192_v8, 256 }
  0x44   :  { %206 = vbcast.lane.b32.xlu1 %v192_v8, 280  ;;  %202 = vbcast.lane.b32.xlu0 %v192_v8, 272  ;;  %v3312_v8 = vrot.slane %v3287_v58, %v3292_v60 }
  0x48   :  { %217 = vbcast.lane.b32.xlu1 %v211_v10, 264  ;;  %213 = vbcast.lane.b32.xlu0 %v211_v10, 256 }
  0x4c   :  { %225 = vbcast.lane.b32.xlu1 %v211_v10, 280  ;;  %221 = vbcast.lane.b32.xlu0 %v211_v10, 272 }
  0x50   :  { %236 = vbcast.lane.b32.xlu1 %v230_v12, 264  ;;  %232 = vbcast.lane.b32.xlu0 %v230_v12, 256 }
  0x54   :  { %244 = vbcast.lane.b32.xlu1 %v230_v12, 280  ;;  %240 = vbcast.lane.b32.xlu0 %v230_v12, 272 }
  0x58   :  { %255 = vbcast.lane.b32.xlu1 %v249_v14, 264  ;;  %251 = vbcast.lane.b32.xlu0 %v249_v14, 256 }
  0x5c   :  { %263 = vbcast.lane.b32.xlu1 %v249_v14, 280  ;;  %259 = vbcast.lane.b32.xlu0 %v249_v14, 272  ;;  %v3326_v14 = vrot.slane %v3298_v63, %v3292_v60 }
  0x60   :  { %274 = vbcast.lane.b32.xlu1 %v268_v16, 264  ;;  %270 = vbcast.lane.b32.xlu0 %v268_v16, 256 }
  0x64   :  { %282 = vbcast.lane.b32.xlu1 %v268_v16, 280  ;;  %278 = vbcast.lane.b32.xlu0 %v268_v16, 272  ;;  %v3332_v16 = vld [vmem:[#allocation8 + $0x30] sm:$0xff] }
  0x68   :  { %293 = vbcast.lane.b32.xlu1 %v287_v18, 264  ;;  %289 = vbcast.lane.b32.xlu0 %v287_v18, 256 }
  0x6c   :  { %301 = vbcast.lane.b32.xlu1 %v287_v18, 280  ;;  %297 = vbcast.lane.b32.xlu0 %v287_v18, 272 }
  0x70   :  { %312 = vbcast.lane.b32.xlu1 %v306_v20, 264  ;;  %308 = vbcast.lane.b32.xlu0 %v306_v20, 256 }
  0x74   :  { %320 = vbcast.lane.b32.xlu1 %v306_v20, 280  ;;  %316 = vbcast.lane.b32.xlu0 %v306_v20, 272  ;;  %v3338_v20 = vrot.slane %v3302_v4, %v3292_v60 }
  0x76   :  { %5708 = vst [vmem:[#allocation48_spill] sm:$0xff] %v3338_v20  ;;  %v3360_v20 = vrot.slane %v3332_v16, %v3206_v2 }
  0x78   :  { %331 = vbcast.lane.b32.xlu1 %v325_v21, 264  ;;  %327 = vbcast.lane.b32.xlu0 %v325_v21, 256  ;;  %5710 = vst [vmem:[#allocation50_spill] sm:$0xff] %v3360_v20 }
  0x7c   :  { %339 = vbcast.lane.b32.xlu1 %v325_v21, 280  ;;  %335 = vbcast.lane.b32.xlu0 %v325_v21, 272  ;;  %v3342_v21 = vrot.slane %v3304_v5, %v3206_v2 }
  0x80   :  { %350 = vbcast.lane.b32.xlu1 %v344_v22, 264  ;;  %346 = vbcast.lane.b32.xlu0 %v344_v22, 256 }
  0x84   :  { %358 = vbcast.lane.b32.xlu1 %v344_v22, 280  ;;  %354 = vbcast.lane.b32.xlu0 %v344_v22, 272  ;;  %v3346_v22 = vrot.slane %v3306_v6, %v3206_v2 }
  0x88   :  { %369 = vbcast.lane.b32.xlu1 %v363_v23, 264  ;;  %365 = vbcast.lane.b32.xlu0 %v363_v23, 256 }
  0x8c   :  { %377 = vbcast.lane.b32.xlu1 %v363_v23, 280  ;;  %373 = vbcast.lane.b32.xlu0 %v363_v23, 272  ;;  %v3350_v23 = vrot.slane %v3308_v7, %v3206_v2 }
  0x90   :  { %388 = vbcast.lane.b32.xlu1 %v382_v24, 264  ;;  %384 = vbcast.lane.b32.xlu0 %v382_v24, 256 }
  0x94   :  { %396 = vbcast.lane.b32.xlu1 %v382_v24, 280  ;;  %392 = vbcast.lane.b32.xlu0 %v382_v24, 272  ;;  %v3352_v24 = vld [vmem:[#allocation8 + $0x38] sm:$0xff] }
  0x98   :  { %407 = vbcast.lane.b32.xlu1 %v401_v25, 264  ;;  %403 = vbcast.lane.b32.xlu0 %v401_v25, 256 }
  0x9c   :  { %415 = vbcast.lane.b32.xlu1 %v401_v25, 280  ;;  %411 = vbcast.lane.b32.xlu0 %v401_v25, 272 }
  0xa0   :  { %426 = vbcast.lane.b32.xlu1 %v420_v26, 264  ;;  %422 = vbcast.lane.b32.xlu0 %v420_v26, 256 }
  0xa2   :  { %v3226_v27 = vpop.permute.xlu1 %164  ;;  %v3228_v28 = vpop.permute.xlu0 %156 }
  0xa3   :  { %v591_v9 = vsub.f32 %v3228_v28, %v562_v59  ;;  %v593_v25 = vsub.f32 %v3226_v27, %v562_v59 }
  0xa4   :  { %434 = vbcast.lane.b32.xlu1 %v420_v26, 280  ;;  %430 = vbcast.lane.b32.xlu0 %v420_v26, 272  ;;  %v3356_v26 = vsub.s32 3, %v3203_v1  ;;  %v3372_v1 = vrot.slane %v3352_v24, %v3206_v2 }
  0xa6   :  { %v3231_v30 = vpop.permute.xlu1 %168  ;;  %v3233_v31 = vpop.permute.xlu0 %160  ;;  %5709 = vst [vmem:[#allocation49_spill] sm:$0xff] %v3356_v26  ;;  %5713 = vst [vmem:[#allocation53_spill] sm:$0xff] %v3372_v1  ;;  %v3389_v2 = vrot.slane %v3298_v63, %v3356_v26 }
  0xa7   :  { %v592_v10 = vsub.f32 %v3233_v31, %v562_v59 }
  0xa8   :  { %445 = vbcast.lane.b32.xlu1 %v439_v29, 264  ;;  %441 = vbcast.lane.b32.xlu0 %v439_v29, 256 }
  0xaa   :  { %v3235_v32 = vpop.permute.xlu1 %179  ;;  %v3237_v33 = vpop.permute.xlu0 %175 }
  0xab   :  { %5678 = vst [vmem:[#allocation18_spill] sm:$0xff] %v3235_v32 }
  0xac   :  { %453 = vbcast.lane.b32.xlu1 %v439_v29, 280  ;;  %449 = vbcast.lane.b32.xlu0 %v439_v29, 272 }
  0xae   :  { %v3239_v34 = vpop.permute.xlu1 %187  ;;  %v3241_v35 = vpop.permute.xlu0 %183 }
  0xaf   :  { %5679 = vst [vmem:[#allocation19_spill] sm:$0xff] %v3239_v34  ;;  %5680 = vst [vmem:[#allocation20_spill] sm:$0xff] %v3241_v35 }
  0xb2   :  { %v3243_v36 = vpop.permute.xlu1 %198  ;;  %v3245_v37 = vpop.permute.xlu0 %194 }
  0xb3   :  { %5681 = vst [vmem:[#allocation21_spill] sm:$0xff] %v3243_v36  ;;  %5682 = vst [vmem:[#allocation22_spill] sm:$0xff] %v3245_v37 }
  0xb6   :  { %v3247_v38 = vpop.permute.xlu1 %206  ;;  %v3249_v39 = vpop.permute.xlu0 %202 }
  0xba   :  { %v3251_v40 = vpop.permute.xlu1 %217  ;;  %v3253_v41 = vpop.permute.xlu0 %213 }
  0xbe   :  { %v3255_v42 = vpop.permute.xlu1 %225  ;;  %v3257_v43 = vpop.permute.xlu0 %221 }
  0xbf   :  { %5683 = vst [vmem:[#allocation23_spill] sm:$0xff] %v3255_v42  ;;  %5684 = vst [vmem:[#allocation24_spill] sm:$0xff] %v3257_v43 }
  0xc2   :  { %v3259_v44 = vpop.permute.xlu1 %236  ;;  %v3261_v45 = vpop.permute.xlu0 %232 }
  0xc3   :  { %5685 = vst [vmem:[#allocation25_spill] sm:$0xff] %v3259_v44  ;;  %5686 = vst [vmem:[#allocation26_spill] sm:$0xff] %v3261_v45 }
  0xc6   :  { %v3263_v46 = vpop.permute.xlu1 %244  ;;  %v3265_v47 = vpop.permute.xlu0 %240 }
  0xc7   :  { %5687 = vst [vmem:[#allocation27_spill] sm:$0xff] %v3263_v46  ;;  %5688 = vst [vmem:[#allocation28_spill] sm:$0xff] %v3265_v47 }
  0xca   :  { %v3267_v48 = vpop.permute.xlu1 %255  ;;  %v3269_v49 = vpop.permute.xlu0 %251 }
  0xcb   :  { %5689 = vst [vmem:[#allocation29_spill] sm:$0xff] %v3267_v48  ;;  %5690 = vst [vmem:[#allocation30_spill] sm:$0xff] %v3269_v49 }
  0xce   :  { %v3271_v50 = vpop.permute.xlu1 %263  ;;  %v3273_v51 = vpop.permute.xlu0 %259 }
  0xcf   :  { %5691 = vst [vmem:[#allocation31_spill] sm:$0xff] %v3271_v50  ;;  %5692 = vst [vmem:[#allocation32_spill] sm:$0xff] %v3273_v51 }
  0xd2   :  { %v3275_v52 = vpop.permute.xlu1 %274  ;;  %v3277_v53 = vpop.permute.xlu0 %270 }
  0xd6   :  { %v3279_v54 = vpop.permute.xlu1 %282  ;;  %v3281_v55 = vpop.permute.xlu0 %278 }
  0xd7   :  { %5693 = vst [vmem:[#allocation33_spill] sm:$0xff] %v3279_v54  ;;  %5694 = vst [vmem:[#allocation34_spill] sm:$0xff] %v3281_v55  ;;  %v594_v54 = vsub.f32 %v3231_v30, %v562_v59  ;;  %v3381_v55 = vrot.slane %v3352_v24, %v3292_v60 }
  0xda   :  { %v3283_v56 = vpop.permute.xlu1 %293  ;;  %v3285_v57 = vpop.permute.xlu0 %289 }
  0xdb   :  { %5695 = vst [vmem:[#allocation35_spill] sm:$0xff] %v3283_v56  ;;  %5696 = vst [vmem:[#allocation36_spill] sm:$0xff] %v3285_v57  ;;  %v623_v57 = vmul.f32 %v591_v9, %v591_v9  ;;  %v662_v56 = vrot.slane %v3298_v63, %v3217_v19  ;;  %v3385_v9 = vrot.slane %v3287_v58, %v3356_v26 }
  0xdc   :  { %v666_v63 = vrot.slane %v3302_v4, %v3217_v19 }
  0xde   :  { %v3294_v61 = vpop.permute.xlu1 %301  ;;  %v3296_v62 = vpop.permute.xlu0 %297 }
  0xdf   :  { %5699 = vst [vmem:[#allocation39_spill] sm:$0xff] %v3294_v61  ;;  %5700 = vst [vmem:[#allocation40_spill] sm:$0xff] %v3296_v62  ;;  %v624_v61 = vmul.f32 %v592_v10, %v592_v10 }
  0xe2   :  { %v3320_v12 = vpop.permute.xlu1 %312  ;;  %v3322_v13 = vpop.permute.xlu0 %308 }
  0xe3   :  { %5706 = vst [vmem:[#allocation46_spill] sm:$0xff] %v3320_v12  ;;  %5707 = vst [vmem:[#allocation47_spill] sm:$0xff] %v3322_v13  ;;  %v688_v17 = vsub.f32 %v3320_v12, %v658_v3  ;;  %v687_v18 = vsub.f32 %v3322_v13, %v658_v3  ;;  %v3364_v13 = vrot.slane %v3332_v16, %v3292_v60 }
  0xe5   :  { %v720_v29 = vmul.f32 %v688_v17, %v688_v17  ;;  %v719_v0 = vmul.f32 %v687_v18, %v687_v18 }
  0xe6   :  { %v3366_v12 = vpop.permute.xlu1 %320  ;;  %v3368_v62 = vpop.permute.xlu0 %316 }
  0xe7   :  { %5711 = vst [vmem:[#allocation51_spill] sm:$0xff] %v3366_v12  ;;  %5712 = vst [vmem:[#allocation52_spill] sm:$0xff] %v3368_v62  ;;  %v690_v17 = vsub.f32 %v3366_v12, %v658_v3  ;;  %v689_v18 = vsub.f32 %v3368_v62, %v658_v3  ;;  %v752_v20 = vadd.f32 %v720_v29, %v624_v61 }
  0xe8   :  { %v751_v10 = vadd.f32 %v719_v0, %v623_v57  ;;  %v625_v3 = vmul.f32 %v593_v25, %v593_v25  ;;  %v595_v62 = vsub.f32 %v3237_v33, %v3318_v11  ;;  %v3403_v25 = vrot.slane %v3302_v4, %v3356_v26 }
  0xe9   :  { %v721_v12 = vmul.f32 %v689_v18, %v689_v18  ;;  %v1008_v60 = vmin.f32 %v752_v20, 1e+30  ;;  %v722_v0 = vmul.f32 %v690_v17, %v690_v17  ;;  %v596_v18 = vsub.f32 %v3235_v32, %v3318_v11 }
  0xea   :  { %v3393_v59 = vpop.permute.xlu1 %331  ;;  %v3395_v1 = vpop.permute.xlu0 %327  ;;  %v1007_v61 = vmin.f32 %v751_v10, 1e+30  ;;  %5716 = vst [vmem:[#allocation56_spill] sm:$0xff] %v3403_v25  ;;  %v626_v20 = vmul.f32 %v594_v54, %v594_v54  ;;  %v597_v17 = vsub.f32 %v3241_v35, %v3318_v11  ;;  %v598_v35 = vsub.f32 %v3239_v34, %v3318_v11 }
  0xeb   :  { %5714 = vst [vmem:[#allocation54_spill] sm:$0xff] %v3393_v59  ;;  %5715 = vst [vmem:[#allocation55_spill] sm:$0xff] %v3395_v1  ;;  %v692_v57 = vsub.f32 %v3393_v59, %v662_v56  ;;  %v691_v29 = vsub.f32 %v3395_v1, %v662_v56  ;;  %1300 = vmin.xlane.f32.xlu1 %v1008_v60  ;;  %v753_v58 = vadd.f32 %v721_v12, %v625_v3 }
  0xec   :  { %1298 = vmin.xlane.f32.xlu0 %v1007_v61  ;;  %v3411_v59 = vrot.slane %v3304_v5, %v3217_v19  ;;  %v3415_v1 = vrot.slane %v3306_v6, %v3217_v19  ;;  %v754_v61 = vadd.f32 %v722_v0, %v626_v20  ;;  %v627_v12 = vmul.f32 %v595_v62, %v595_v62 }
  0xed   :  { %v723_v10 = vmul.f32 %v691_v29, %v691_v29  ;;  %v1009_v60 = vmin.f32 %v753_v58, 1e+30  ;;  %v724_v54 = vmul.f32 %v692_v57, %v692_v57  ;;  %v3425_v5 = vrot.slane %v3308_v7, %v3217_v19 }
  0xee   :  { %v3417_v4 = vpop.permute.xlu1 %339  ;;  %v3419_v25 = vpop.permute.xlu0 %335  ;;  %v3429_v6 = vrot.slane %v3332_v16, %v3217_v19  ;;  %v628_v0 = vmul.f32 %v596_v18, %v596_v18  ;;  %v3435_v62 = vrot.slane %v3332_v16, %v3356_v26  ;;  %v629_v57 = vmul.f32 %v597_v17, %v597_v17 }
  0xef   :  { %5717 = vst [vmem:[#allocation57_spill] sm:$0xff] %v3417_v4  ;;  %v694_v3 = vsub.f32 %v3417_v4, %v662_v56  ;;  %v693_v29 = vsub.f32 %v3419_v25, %v662_v56  ;;  %v755_v58 = vadd.f32 %v723_v10, %v627_v12  ;;  %v599_v56 = vsub.f32 %v3245_v37, %v3330_v15 }
  0xf0   :  { %1302 = vmin.xlane.f32.xlu0 %v1009_v60  ;;  %v3441_v7 = vrot.slane %v3352_v24, %v3217_v19  ;;  %v1010_v11 = vmin.f32 %v754_v61, 1e+30  ;;  %v756_v18 = vadd.f32 %v724_v54, %v628_v0  ;;  %v817_v16 = vsub.f32 %v3226_v27, %v3312_v8 }
  0xf1   :  { %v725_v20 = vmul.f32 %v693_v29, %v693_v29  ;;  %v1011_v10 = vmin.f32 %v755_v58, 1e+30  ;;  %v726_v60 = vmul.f32 %v694_v3, %v694_v3  ;;  %v3453_v29 = vrot.slane %v3352_v24, %v3356_v26 }
  0xf2   :  { %v3443_v4 = vpop.permute.xlu1 %350  ;;  %v3445_v32 = vpop.permute.xlu0 %346  ;;  %v600_v19 = vsub.f32 %v3243_v36, %v3330_v15  ;;  %v630_v58 = vmul.f32 %v598_v35, %v598_v35  ;;  %v815_v54 = vsub.f32 %v3228_v28, %v3312_v8  ;;  %v601_v27 = vsub.f32 %v3249_v39, %v3330_v15 }
  0xf3   :  { %5718 = vst [vmem:[#allocation58_spill] sm:$0xff] %v3443_v4  ;;  %v696_v12 = vsub.f32 %v3443_v4, %v666_v63  ;;  %v695_v17 = vsub.f32 %v3445_v32, %v666_v63  ;;  %1306 = vmin.xlane.f32.xlu1 %v1011_v10  ;;  %v757_v61 = vadd.f32 %v725_v20, %v629_v57  ;;  %v1012_v24 = vmin.f32 %v756_v18, 1e+30 }
  0xf4   :  { %1304 = vmin.xlane.f32.xlu0 %v1010_v11  ;;  %v631_v3 = vmul.f32 %v599_v56, %v599_v56  ;;  %v758_v34 = vadd.f32 %v726_v60, %v630_v58  ;;  %v3465_v11 = vmul.f32 %v817_v16, %v817_v16  ;;  %v818_v35 = vsub.f32 %v3231_v30, %v3312_v8 }
  0xf5   :  { %v727_v0 = vmul.f32 %v695_v17, %v695_v17  ;;  %v1013_v26 = vmin.f32 %v757_v61, 1e+30  ;;  %v728_v36 = vmul.f32 %v696_v12, %v696_v12  ;;  %v602_v56 = vsub.f32 %v3247_v38, %v3330_v15 }
  0xf6   :  { %v3461_v4 = vpop.permute.xlu1 %358  ;;  %v3463_v37 = vpop.permute.xlu0 %354  ;;  %v632_v10 = vmul.f32 %v600_v19, %v600_v19  ;;  %v3473_v18 = vmul.f32 %v815_v54, %v815_v54  ;;  %v603_v60 = vsub.f32 %v3253_v41, %v3342_v21  ;;  %v633_v16 = vmul.f32 %v601_v27, %v601_v27 }
  0xf7   :  { %5719 = vst [vmem:[#allocation59_spill] sm:$0xff] %v3461_v4  ;;  %v698_v28 = vsub.f32 %v3461_v4, %v666_v63  ;;  %v697_v57 = vsub.f32 %v3463_v37, %v666_v63  ;;  %1310 = vmin.xlane.f32.xlu1 %v1013_v26  ;;  %v759_v20 = vadd.f32 %v727_v0, %v631_v3  ;;  %v1014_v61 = vmin.f32 %v758_v34, 1e+30 }
  0xf8   :  { %1308 = vmin.xlane.f32.xlu0 %v1012_v24  ;;  %v760_v58 = vadd.f32 %v728_v36, %v632_v10  ;;  %v3481_v15 = vmul.f32 %v818_v35, %v818_v35  ;;  %v816_v26 = vsub.f32 %v3233_v31, %v3312_v8  ;;  %v604_v27 = vsub.f32 %v3251_v40, %v3342_v21 }
  0xf9   :  { %v729_v12 = vmul.f32 %v697_v57, %v697_v57  ;;  %v1015_v63 = vmin.f32 %v759_v20, 1e+30  ;;  %v730_v4 = vmul.f32 %v698_v28, %v698_v28  ;;  %v634_v3 = vmul.f32 %v602_v56, %v602_v56 }
  0xfa   :  { %v3477_v17 = vpop.permute.xlu1 %369  ;;  %v3479_v30 = vpop.permute.xlu0 %365  ;;  %v606_v36 = vsub.f32 %v3255_v42, %v3342_v21  ;;  %v605_v0 = vsub.f32 %v3257_v43, %v3342_v21  ;;  %v635_v31 = vmul.f32 %v603_v60, %v603_v60  ;;  %v1016_v28 = vmin.f32 %v760_v58, 1e+30 }
  0xfb   :  { %v700_v19 = vsub.f32 %v3477_v17, %v3411_v59  ;;  %v699_v54 = vsub.f32 %v3479_v30, %v3411_v59  ;;  %1314 = vmin.xlane.f32.xlu1 %v1015_v63  ;;  %v761_v34 = vadd.f32 %v729_v12, %v633_v16  ;;  %v762_v20 = vadd.f32 %v730_v4, %v634_v3 }
  0xfc   :  { %1312 = vmin.xlane.f32.xlu0 %v1014_v61  ;;  %v3499_v61 = vmul.f32 %v816_v26, %v816_v26  ;;  %v607_v56 = vsub.f32 %v3261_v45, %v3346_v22  ;;  %v3509_v60 = vsub.f32 %v3237_v33, %v3326_v14  ;;  %v636_v4 = vmul.f32 %v604_v27, %v604_v27 }
  0xfd   :  { %v731_v8 = vmul.f32 %v699_v54, %v699_v54  ;;  %v1017_v57 = vmin.f32 %v761_v34, 1e+30  ;;  %v732_v10 = vmul.f32 %v700_v19, %v700_v19  ;;  %v608_v63 = vsub.f32 %v3259_v44, %v3346_v22 }
  0xfe   :  { %v3495_v24 = vpop.permute.xlu1 %377  ;;  %v3497_v35 = vpop.permute.xlu0 %373  ;;  %v637_v58 = vmul.f32 %v605_v0, %v605_v0  ;;  %v638_v19 = vmul.f32 %v606_v36, %v606_v36  ;;  %v1018_v3 = vmin.f32 %v762_v20, 1e+30  ;;  %v609_v33 = vsub.f32 %v3265_v47, %v3346_v22 }
  0xff   :  { %5720 = vst [vmem:[#allocation60_spill] sm:$0xff] %v3495_v24  ;;  %5721 = vst [vmem:[#allocation61_spill] sm:$0xff] %v3497_v35  ;;  %v702_v16 = vsub.f32 %v3495_v24, %v3411_v59  ;;  %v701_v21 = vsub.f32 %v3497_v35, %v3411_v59  ;;  %1318 = vmin.xlane.f32.xlu1 %v1017_v57  ;;  %v763_v12 = vadd.f32 %v731_v8, %v635_v31 }
 0x100   :  { %1316 = vmin.xlane.f32.xlu0 %v1016_v28  ;;  %v764_v42 = vadd.f32 %v732_v10, %v636_v4  ;;  %v639_v0 = vmul.f32 %v607_v56, %v607_v56  ;;  %v610_v36 = vsub.f32 %v3263_v46, %v3346_v22  ;;  %v611_v8 = vsub.f32 %v3269_v49, %v3350_v23 }
 0x101   :  { %v733_v26 = vmul.f32 %v701_v21, %v701_v21  ;;  %v1019_v59 = vmin.f32 %v763_v12, 1e+30  ;;  %v734_v24 = vmul.f32 %v702_v16, %v702_v16  ;;  %v612_v57 = vsub.f32 %v3267_v48, %v3350_v23 }
 0x102   :  { %v3513_v54 = vpop.permute.xlu1 %388  ;;  %v3515_v34 = vpop.permute.xlu0 %384  ;;  %v613_v20 = vsub.f32 %v3273_v51, %v3350_v23  ;;  %v640_v16 = vmul.f32 %v608_v63, %v608_v63  ;;  %v1020_v12 = vmin.f32 %v764_v42, 1e+30  ;;  %v643_v51 = vmul.f32 %v611_v8, %v611_v8 }
 0x103   :  { %5722 = vst [vmem:[#allocation62_spill] sm:$0xff] %v3513_v54  ;;  %5723 = vst [vmem:[#allocation63_spill] sm:$0xff] %v3515_v34  ;;  %v704_v27 = vsub.f32 %v3513_v54, %v3415_v1  ;;  %v703_v31 = vsub.f32 %v3515_v34, %v3415_v1  ;;  %1322 = vmin.xlane.f32.xlu1 %v1019_v59  ;;  %v765_v28 = vadd.f32 %v733_v26, %v637_v58 }
 0x104   :  { %1320 = vmin.xlane.f32.xlu0 %v1018_v3  ;;  %v766_v4 = vadd.f32 %v734_v24, %v638_v19  ;;  %v614_v3 = vsub.f32 %v3271_v50, %v3350_v23  ;;  %v641_v59 = vmul.f32 %v609_v33, %v609_v33  ;;  %v840_v42 = vsub.f32 %v3275_v52, %v3364_v13 }
 0x105   :  { %v735_v10 = vmul.f32 %v703_v31, %v703_v31  ;;  %v1021_v22 = vmin.f32 %v765_v28, 1e+30  ;;  %v736_v46 = vmul.f32 %v704_v27, %v704_v27  ;;  %v642_v31 = vmul.f32 %v610_v36, %v610_v36 }
 0x106   :  { %v3531_v21 = vpop.permute.xlu1 %396  ;;  %v3533_v56 = vpop.permute.xlu0 %392  ;;  %v644_v19 = vmul.f32 %v612_v57, %v612_v57  ;;  %v645_v27 = vmul.f32 %v613_v20, %v613_v20  ;;  %v1022_v50 = vmin.f32 %v766_v4, 1e+30  ;;  %v839_v33 = vsub.f32 %v3277_v53, %v3364_v13  ;;  %v5728_v57 = vld [vmem:[#allocation50_spill] sm:$0xff] }
 0x107   :  { %5724 = vst [vmem:[#allocation64_spill] sm:$0xff] %v3531_v21  ;;  %5725 = vst [vmem:[#allocation65_spill] sm:$0xff] %v3533_v56  ;;  %v706_v58 = vsub.f32 %v3531_v21, %v3415_v1  ;;  %v705_v26 = vsub.f32 %v3533_v56, %v3415_v1  ;;  %1326 = vmin.xlane.f32.xlu1 %v1021_v22  ;;  %v767_v63 = vadd.f32 %v735_v10, %v639_v0 }
 0x108   :  { %1324 = vmin.xlane.f32.xlu0 %v1020_v12  ;;  %v768_v49 = vadd.f32 %v736_v46, %v640_v16  ;;  %v646_v8 = vmul.f32 %v614_v3, %v614_v3  ;;  %v616_v20 = vsub.f32 %v3275_v52, %v5728_v57  ;;  %v615_v10 = vsub.f32 %v3277_v53, %v5728_v57  ;;  %v5729_v12 = vld [vmem:[#allocation34_spill] sm:$0xff] }
 0x109   :  { %v737_v24 = vmul.f32 %v705_v26, %v705_v26  ;;  %v1023_v21 = vmin.f32 %v767_v63, 1e+30  ;;  %v738_v1 = vmul.f32 %v706_v58, %v706_v58  ;;  %v3557_v16 = vmul.f32 %v840_v42, %v840_v42 }
 0x10a   :  { %v3543_v28 = vpop.permute.xlu1 %407  ;;  %v3545_v23 = vpop.permute.xlu0 %403  ;;  %v617_v22 = vsub.f32 %v5729_v12, %v5728_v57  ;;  %v841_v4 = vsub.f32 %v5729_v12, %v3364_v13  ;;  %v1024_v52 = vmin.f32 %v768_v49, 1e+30  ;;  %v647_v12 = vmul.f32 %v615_v10, %v615_v10 }
 0x10b   :  { %5726 = vst [vmem:[#allocation66_spill] sm:$0xff] %v3543_v28  ;;  %5727 = vst [vmem:[#allocation67_spill] sm:$0xff] %v3545_v23  ;;  %v708_v0 = vsub.f32 %v3543_v28, %v3425_v5  ;;  %v707_v36 = vsub.f32 %v3545_v23, %v3425_v5  ;;  %1330 = vmin.xlane.f32.xlu1 %v1023_v21  ;;  %v769_v46 = vadd.f32 %v737_v24, %v641_v59  ;;  %v5732_v21 = vld [vmem:[#allocation33_spill] sm:$0xff] }
 0x10c   :  { %1328 = vmin.xlane.f32.xlu0 %v1022_v50  ;;  %v770_v48 = vadd.f32 %v738_v1, %v642_v31  ;;  %v3567_v50 = vmul.f32 %v839_v33, %v839_v33  ;;  %v618_v59 = vsub.f32 %v5732_v21, %v5728_v57  ;;  %v648_v23 = vmul.f32 %v616_v20, %v616_v20 }
 0x10d   :  { %v739_v58 = vmul.f32 %v707_v36, %v707_v36  ;;  %v1025_v63 = vmin.f32 %v769_v46, 1e+30  ;;  %v740_v53 = vmul.f32 %v708_v0, %v708_v0  ;;  %v3577_v49 = vsub.f32 %v5732_v21, %v3364_v13  ;;  %v5734_v13 = vld [vmem:[#allocation53_spill] sm:$0xff]  ;;  %v5737_v21 = vld [vmem:[#allocation40_spill] sm:$0xff] }
 0x10e   :  { %v3563_v26 = vpop.permute.xlu1 %415  ;;  %v3565_v3 = vpop.permute.xlu0 %411  ;;  %v3579_v31 = vmul.f32 %v841_v4, %v841_v4  ;;  %v649_v33 = vmul.f32 %v617_v22, %v617_v22  ;;  %v1026_v46 = vmin.f32 %v770_v48, 1e+30  ;;  %v650_v10 = vmul.f32 %v618_v59, %v618_v59 }
 0x10f   :  { %5730 = vst [vmem:[#allocation50_spill] sm:$0xff] %v3563_v26  ;;  %5731 = vst [vmem:[#allocation34_spill] sm:$0xff] %v3565_v3  ;;  %v710_v42 = vsub.f32 %v3563_v26, %v3425_v5  ;;  %v709_v24 = vsub.f32 %v3565_v3, %v3425_v5  ;;  %1334 = vmin.xlane.f32.xlu1 %v1025_v63  ;;  %v771_v36 = vadd.f32 %v739_v58, %v643_v51  ;;  %v5733_v5 = vld [vmem:[#allocation35_spill] sm:$0xff]  ;;  %v5735_v58 = vld [vmem:[#allocation36_spill] sm:$0xff] }
 0x110   :  { %1332 = vmin.xlane.f32.xlu0 %v1024_v52  ;;  %v772_v28 = vadd.f32 %v740_v53, %v644_v19  ;;  %v844_v52 = vsub.f32 %v5733_v5, %v3381_v55  ;;  %v619_v4 = vsub.f32 %v5735_v58, %v5734_v13  ;;  %v843_v22 = vsub.f32 %v5735_v58, %v3381_v55  ;;  %v5736_v63 = vld [vmem:[#allocation39_spill] sm:$0xff] }
 0x111   :  { %v741_v1 = vmul.f32 %v709_v24, %v709_v24  ;;  %v1027_v26 = vmin.f32 %v771_v36, 1e+30  ;;  %v742_v47 = vmul.f32 %v710_v42, %v710_v42  ;;  %v620_v19 = vsub.f32 %v5733_v5, %v5734_v13 }
 0x112   :  { %v427_v0 = vpop.permute.xlu1 %426  ;;  %v423_v57 = vpop.permute.xlu0 %422  ;;  %v846_v53 = vsub.f32 %v5736_v63, %v3381_v55  ;;  %v621_v42 = vsub.f32 %v5737_v21, %v5734_v13  ;;  %v1028_v3 = vmin.f32 %v772_v28, 1e+30  ;;  %v3602_v5 = vmul.f32 %v843_v22, %v843_v22 }
 0x113   :  { %v712_v51 = vsub.f32 %v427_v0, %v3429_v6  ;;  %v711_v20 = vsub.f32 %v423_v57, %v3429_v6  ;;  %1338 = vmin.xlane.f32.xlu1 %v1027_v26  ;;  %v773_v48 = vadd.f32 %v741_v1, %v645_v27  ;;  %v774_v45 = vadd.f32 %v742_v47, %v646_v8 }
 0x114   :  { %1336 = vmin.xlane.f32.xlu0 %v1026_v46  ;;  %v876_v46 = vmul.f32 %v844_v52, %v844_v52  ;;  %v622_v27 = vsub.f32 %v5736_v63, %v5734_v13  ;;  %v651_v44 = vmul.f32 %v619_v4, %v619_v4  ;;  %v878_v34 = vmul.f32 %v846_v53, %v846_v53  ;;  %v5739_v4 = vld [vmem:[#allocation47_spill] sm:$0xff] }
 0x115   :  { %v743_v24 = vmul.f32 %v711_v20, %v711_v20  ;;  %v1029_v56 = vmin.f32 %v773_v48, 1e+30  ;;  %v744_v58 = vmul.f32 %v712_v51, %v712_v51  ;;  %v652_v48 = vmul.f32 %v620_v19, %v620_v19 }
 0x116   :  { %v3595_v59 = vpop.permute.xlu1 %434  ;;  %v431_v36 = vpop.permute.xlu0 %430  ;;  %v653_v47 = vmul.f32 %v621_v42, %v621_v42  ;;  %v1030_v51 = vmin.f32 %v774_v45, 1e+30  ;;  %v911_v19 = vsub.f32 %v5739_v4, %v3385_v9  ;;  %v936_v45 = vsub.f32 %v427_v0, %v3435_v62  ;;  %v5740_v0 = vld [vmem:[#allocation52_spill] sm:$0xff] }
 0x117   :  { %v714_v26 = vsub.f32 %v3595_v59, %v3429_v6  ;;  %v713_v1 = vsub.f32 %v431_v36, %v3429_v6  ;;  %1342 = vmin.xlane.f32.xlu1 %v1029_v56  ;;  %v775_v20 = vadd.f32 %v743_v24, %v647_v12  ;;  %v776_v13 = vadd.f32 %v744_v58, %v648_v23  ;;  %v5738_v56 = vld [vmem:[#allocation46_spill] sm:$0xff] }
 0x118   :  { %1340 = vmin.xlane.f32.xlu0 %v1028_v3  ;;  %v654_v3 = vmul.f32 %v622_v27, %v622_v27  ;;  %v912_v12 = vsub.f32 %v5738_v56, %v3385_v9  ;;  %v935_v23 = vsub.f32 %v423_v57, %v3435_v62  ;;  %v913_v57 = vsub.f32 %v5740_v0, %v3385_v9 }
 0x119   :  { %v745_v28 = vmul.f32 %v713_v1, %v713_v1  ;;  %v1031_v54 = vmin.f32 %v775_v20, 1e+30  ;;  %v746_v63 = vmul.f32 %v714_v26, %v714_v26  ;;  %v1032_v20 = vmin.f32 %v776_v13, 1e+30 }
 0x11a   :  { %v446_v8 = vpop.permute.xlu1 %445  ;;  %v442_v52 = vpop.permute.xlu0 %441  ;;  %v937_v13 = vsub.f32 %v431_v36, %v3435_v62  ;;  %v945_v36 = vmul.f32 %v913_v57, %v913_v57 }
 0x11b   :  { %v716_v43 = vsub.f32 %v446_v8, %v3441_v7  ;;  %v940_v6 = vsub.f32 %v446_v8, %v3453_v29  ;;  %v715_v22 = vsub.f32 %v442_v52, %v3441_v7  ;;  %1346 = vmin.xlane.f32.xlu1 %v1031_v54  ;;  %v777_v53 = vadd.f32 %v745_v28, %v649_v33 }
 0x11c   :  { %1344 = vmin.xlane.f32.xlu0 %v1030_v51  ;;  %v778_v8 = vadd.f32 %v746_v63, %v650_v10  ;;  %v943_v33 = vmul.f32 %v911_v19, %v911_v19  ;;  %v968_v28 = vmul.f32 %v936_v45, %v936_v45  ;;  %v938_v45 = vsub.f32 %v3595_v59, %v3435_v62 }
 0x11d   :  { %v972_v42 = vmul.f32 %v940_v6, %v940_v6  ;;  %v747_v24 = vmul.f32 %v715_v22, %v715_v22  ;;  %v748_v58 = vmul.f32 %v716_v43, %v716_v43  ;;  %v1033_v27 = vmin.f32 %v777_v53, 1e+30 }
 0x11e   :  { %v454_v26 = vpop.permute.xlu1 %453  ;;  %v450_v1 = vpop.permute.xlu0 %449  ;;  %v1034_v63 = vmin.f32 %v778_v8, 1e+30  ;;  %v967_v53 = vmul.f32 %v935_v23, %v935_v23  ;;  %v3640_v8 = vadd.f32 %v968_v28, %v3557_v16  ;;  %v917_v16 = vsub.f32 %v3419_v25, %v3389_v2  ;;  %v5745_v28 = vld [vmem:[#allocation20_spill] sm:$0xff] }
 0x11f   :  { %v3613_v35 = vadd.f32 %v972_v42, %v876_v46  ;;  %v718_v56 = vsub.f32 %v454_v26, %v3441_v7  ;;  %v942_v51 = vsub.f32 %v454_v26, %v3453_v29  ;;  %v717_v54 = vsub.f32 %v450_v1, %v3441_v7  ;;  %1350 = vmin.xlane.f32.xlu1 %v1033_v27 }
 0x120   :  { %1348 = vmin.xlane.f32.xlu0 %v1032_v20  ;;  %v779_v43 = vadd.f32 %v747_v24, %v651_v44  ;;  %v780_v4 = vadd.f32 %v748_v58, %v652_v48  ;;  %v939_v42 = vsub.f32 %v442_v52, %v3453_v29  ;;  %v944_v26 = vmul.f32 %v912_v12, %v912_v12  ;;  %v5741_v20 = vld [vmem:[#allocation51_spill] sm:$0xff] }
 0x121   :  { %v974_v6 = vmul.f32 %v942_v51, %v942_v51  ;;  %v749_v10 = vmul.f32 %v717_v54, %v717_v54  ;;  %v750_v46 = vmul.f32 %v718_v56, %v718_v56  ;;  %v914_v27 = vsub.f32 %v5741_v20, %v3385_v9  ;;  %v5749_v20 = vld [vmem:[#allocation48_spill] sm:$0xff] }
 0x122   :  { %v1035_v22 = vmin.f32 %v779_v43, 1e+30  ;;  %v3627_v44 = vadd.f32 %v943_v33, %v3473_v18  ;;  %v941_v48 = vsub.f32 %v450_v1, %v3453_v29  ;;  %v1036_v12 = vmin.f32 %v780_v4, 1e+30  ;;  %v5743_v29 = vld [vmem:[#allocation54_spill] sm:$0xff] }
 0x123   :  { %v3622_v7 = vadd.f32 %v974_v6, %v878_v34  ;;  %v781_v19 = vadd.f32 %v749_v10, %v653_v47  ;;  %v5742_v34 = vld [vmem:[#allocation55_spill] sm:$0xff]  ;;  %v969_v47 = vmul.f32 %v937_v13, %v937_v13  ;;  %v782_v24 = vadd.f32 %v750_v46, %v654_v3  ;;  %v5744_v33 = vld [vmem:[#allocation18_spill] sm:$0xff]  ;;  %v5746_v6 = vld [vmem:[#allocation57_spill] sm:$0xff] }
 0x124   :  { %1352 = vmin.xlane.f32.xlu0 %v1034_v63  ;;  %1354 = vmin.xlane.f32.xlu1 %v1035_v22  ;;  %v915_v52 = vsub.f32 %v5742_v34, %v3389_v2  ;;  %v845_v9 = vsub.f32 %v5737_v21, %v3381_v55  ;;  %v971_v58 = vmul.f32 %v939_v42, %v939_v42  ;;  %v1039_v55 = vmin.f32 %v3627_v44, 1e+30 }
 0x125   :  { %v1037_v23 = vmin.f32 %v781_v19, 1e+30  ;;  %v3637_v18 = vadd.f32 %v967_v53, %v3567_v50  ;;  %v946_v62 = vmul.f32 %v914_v27, %v914_v27  ;;  %v916_v59 = vsub.f32 %v5743_v29, %v3389_v2  ;;  %v5748_v19 = vld [vmem:[#allocation19_spill] sm:$0xff] }
 0x126   :  { %v3645_v1 = vadd.f32 %v944_v26, %v3499_v61  ;;  %v970_v3 = vmul.f32 %v938_v45, %v938_v45  ;;  %v973_v56 = vmul.f32 %v941_v48, %v941_v48  ;;  %v3649_v21 = vadd.f32 %v945_v36, %v3465_v11  ;;  %v5751_v36 = vld [vmem:[#allocation49_spill] sm:$0xff]  ;;  %v5752_v45 = vld [vmem:[#allocation43_spill] sm:$0xff] }
 0x127   :  { %v947_v50 = vmul.f32 %v915_v52, %v915_v52  ;;  %v1038_v51 = vmin.f32 %v782_v24, 1e+30  ;;  %v3654_v54 = vadd.f32 %v969_v47, %v3579_v31  ;;  %v820_v0 = vsub.f32 %v5744_v33, %v3326_v14 }
 0x128   :  { %1356 = vmin.xlane.f32.xlu0 %v1036_v12  ;;  %1358 = vmin.xlane.f32.xlu1 %v1037_v23  ;;  %v874_v61 = vmul.f32 %v3577_v49, %v3577_v49  ;;  %v877_v57 = vmul.f32 %v845_v9, %v845_v9  ;;  %v3661_v43 = vadd.f32 %v971_v58, %v3602_v5  ;;  %v1040_v31 = vmin.f32 %v3645_v1, 1e+30 }
 0x129   :  { %v851_v11 = vmul.f32 %v3509_v60, %v3509_v60  ;;  %v821_v25 = vsub.f32 %v5745_v28, %v3326_v14  ;;  %v948_v13 = vmul.f32 %v916_v59, %v916_v59  ;;  %v918_v10 = vsub.f32 %v5746_v6, %v3389_v2  ;;  %v5747_v60 = vld [vmem:[#allocation56_spill] sm:$0xff] }
 0x12a   :  { %v3671_v49 = vadd.f32 %v946_v62, %v3481_v15  ;;  %v3673_v46 = vadd.f32 %v970_v3, %v874_v61  ;;  %v3675_v5 = vadd.f32 %v973_v56, %v877_v57  ;;  %v949_v63 = vmul.f32 %v917_v16, %v917_v16  ;;  %v5750_v15 = vld [vmem:[#allocation22_spill] sm:$0xff]  ;;  %v5754_v62 = vld [vmem:[#allocation21_spill] sm:$0xff] }
 0x12b   :  { %v919_v22 = vsub.f32 %v3445_v32, %v5747_v60  ;;  %v1041_v4 = vmin.f32 %v3649_v21, 1e+30  ;;  %v3680_v53 = vadd.f32 %v947_v50, %v851_v11  ;;  %v852_v42 = vmul.f32 %v820_v0, %v820_v0  ;;  %v5753_v32 = vld [vmem:[#allocation58_spill] sm:$0xff] }
 0x12c   :  { %1360 = vmin.xlane.f32.xlu0 %v1038_v51  ;;  %1618 = vmin.xlane.f32.xlu1 %v1039_v55  ;;  %v822_v26 = vsub.f32 %v5748_v19, %v3326_v14  ;;  %v853_v2 = vmul.f32 %v821_v25, %v821_v25  ;;  %v823_v27 = vsub.f32 %v5750_v15, %v5749_v20  ;;  %v1042_v52 = vmin.f32 %v3671_v49, 1e+30  ;;  %v5755_v56 = vld [vmem:[#allocation38_spill] sm:$0xff] }
 0x12d   :  { %v3688_v48 = vrot.slane %v5752_v45, %v5751_v36  ;;  %v950_v23 = vmul.f32 %v918_v10, %v918_v10  ;;  %v920_v34 = vsub.f32 %v5753_v32, %v5747_v60  ;;  %v3693_v47 = vadd.f32 %v948_v13, %v852_v42 }
 0x12e   :  { %v951_v12 = vmul.f32 %v919_v22, %v919_v22  ;;  %v921_v14 = vsub.f32 %v3463_v37, %v5747_v60  ;;  %v1043_v24 = vmin.f32 %v3680_v53, 1e+30  ;;  %v3698_v9 = vadd.f32 %v949_v63, %v853_v2  ;;  %v5756_v37 = vld [vmem:[#allocation59_spill] sm:$0xff]  ;;  %v5758_v2 = vld [vmem:[#allocation37_spill] sm:$0xff] }
 0x12f   :  { %v854_v58 = vmul.f32 %v822_v26, %v822_v26  ;;  %v824_v29 = vsub.f32 %v5754_v62, %v5749_v20  ;;  %v855_v59 = vmul.f32 %v823_v27, %v823_v27  ;;  %v825_v3 = vsub.f32 %v3249_v39, %v5749_v20 }
 0x130   :  { %1620 = vmin.xlane.f32.xlu0 %v1040_v31  ;;  %1622 = vmin.xlane.f32.xlu1 %v1041_v4  ;;  %v3706_v55 = vrot.slane %v5752_v45, %v5755_v56  ;;  %v952_v50 = vmul.f32 %v920_v34, %v920_v34  ;;  %v922_v16 = vsub.f32 %v5756_v37, %v5747_v60  ;;  %v1044_v51 = vmin.f32 %v3693_v47, 1e+30 }
 0x131   :  { %v3711_v33 = vadd.f32 %v950_v23, %v854_v58  ;;  %v953_v0 = vmul.f32 %v921_v14, %v921_v14  ;;  %v923_v61 = vsub.f32 %v3479_v30, %v3688_v48  ;;  %v1045_v39 = vmin.f32 %v3698_v9, 1e+30  ;;  %v5757_v30 = vld [vmem:[#allocation17_spill] sm:$0xff] }
 0x132   :  { %v3716_v57 = vadd.f32 %v951_v12, %v855_v59  ;;  %v856_v11 = vmul.f32 %v824_v29, %v824_v29  ;;  %v826_v28 = vsub.f32 %v3247_v38, %v5749_v20  ;;  %v857_v25 = vmul.f32 %v825_v3, %v825_v3  ;;  %v5761_v14 = vld [vmem:[#allocation41_spill] sm:$0xff]  ;;  %v5762_v3 = vld [vmem:[#allocation24_spill] sm:$0xff] }
 0x133   :  { %v827_v13 = vsub.f32 %v3253_v41, %v3706_v55  ;;  %v954_v31 = vmul.f32 %v922_v16, %v922_v16  ;;  %v1046_v6 = vmin.f32 %v3711_v33, 1e+30  ;;  %v3726_v63 = vsub.s32 4, %v5757_v30 }
 0x134   :  { %1624 = vmin.xlane.f32.xlu0 %v1042_v52  ;;  %1626 = vmin.xlane.f32.xlu1 %v1043_v24  ;;  %v3723_v10 = vadd.f32 %v952_v50, %v856_v11  ;;  %v924_v60 = vsub.f32 %v3477_v17, %v3688_v48  ;;  %v955_v22 = vmul.f32 %v923_v61, %v923_v61  ;;  %v1047_v38 = vmin.f32 %v3716_v57, 1e+30  ;;  %v5760_v52 = vld [vmem:[#allocation44_spill] sm:$0xff]  ;;  %v5764_v61 = vld [vmem:[#allocation63_spill] sm:$0xff] }
 0x135   :  { %v3731_v4 = vadd.f32 %v953_v0, %v857_v25  ;;  %v858_v42 = vmul.f32 %v826_v28, %v826_v28  ;;  %v828_v41 = vsub.f32 %v3251_v40, %v3706_v55  ;;  %v859_v19 = vmul.f32 %v827_v13, %v827_v13  ;;  %v5759_v40 = vld [vmem:[#allocation61_spill] sm:$0xff] }
 0x136   :  { %v1048_v26 = vmin.f32 %v3723_v10, 1e+30  ;;  %v3738_v20 = vrot.slane %v5758_v2, %v3726_v63  ;;  %v956_v15 = vmul.f32 %v924_v60, %v924_v60  ;;  %v925_v34 = vsub.f32 %v5759_v40, %v3688_v48  ;;  %v5766_v60 = vld [vmem:[#allocation26_spill] sm:$0xff] }
 0x137   :  { %v1049_v17 = vmin.f32 %v3731_v4, 1e+30  ;;  %v3741_v27 = vadd.f32 %v954_v31, %v858_v42  ;;  %v3743_v23 = vadd.f32 %v955_v22, %v859_v19  ;;  %v860_v32 = vmul.f32 %v828_v41, %v828_v41  ;;  %v5765_v31 = vld [vmem:[#allocation25_spill] sm:$0xff] }
 0x138   :  { %1628 = vmin.xlane.f32.xlu0 %v1044_v51  ;;  %1630 = vmin.xlane.f32.xlu1 %v1045_v39  ;;  %v3749_v12 = vrot.slane %v5760_v52, %v5751_v36  ;;  %v3753_v24 = vrot.slane %v5761_v14, %v3726_v63  ;;  %v1103_v59 = vadd.f32 %v3738_v20, %v3627_v44  ;;  %v5763_v51 = vld [vmem:[#allocation62_spill] sm:$0xff] }
 0x139   :  { %v1050_v58 = vmin.f32 %v3741_v27, 1e+30  ;;  %v1051_v62 = vmin.f32 %v3743_v23, 1e+30  ;;  %v3757_v29 = vadd.f32 %v956_v15, %v860_v32  ;;  %v829_v50 = vsub.f32 %v5762_v3, %v3706_v55 }
 0x13a   :  { %v3765_v37 = vrot.slane %v5760_v52, %v5755_v56  ;;  %v957_v16 = vmul.f32 %v925_v34, %v925_v34  ;;  %v928_v0 = vsub.f32 %v5763_v51, %v3749_v12  ;;  %v927_v39 = vsub.f32 %v5764_v61, %v3749_v12  ;;  %v5767_v34 = vld [vmem:[#allocation60_spill] sm:$0xff] }
 0x13b   :  { %v1052_v11 = vmin.f32 %v3757_v29, 1e+30  ;;  %v1135_v28 = vmin.f32 %v1103_v59, 1e+30  ;;  %v1104_v44 = vadd.f32 %v3738_v20, %v3645_v1  ;;  %v1107_v25 = vadd.f32 %v3753_v24, %v3680_v53  ;;  %v5770_v59 = vld [vmem:[#allocation42_spill] sm:$0xff] }
 0x13c   :  { %1632 = vmin.xlane.f32.xlu0 %v1046_v6  ;;  %1634 = vmin.xlane.f32.xlu1 %v1047_v38  ;;  %v861_v13 = vmul.f32 %v829_v50, %v829_v50  ;;  %v832_v6 = vsub.f32 %v5765_v31, %v3765_v37  ;;  %v831_v22 = vsub.f32 %v5766_v60, %v3765_v37 }
 0x13d   :  { %v960_v38 = vmul.f32 %v928_v0, %v928_v0  ;;  %v959_v42 = vmul.f32 %v927_v39, %v927_v39  ;;  %v1136_v41 = vmin.f32 %v1104_v44, 1e+30  ;;  %v1139_v19 = vmin.f32 %v1107_v25, 1e+30  ;;  %v5771_v0 = vld [vmem:[#allocation23_spill] sm:$0xff]  ;;  %v5773_v25 = vld [vmem:[#allocation66_spill] sm:$0xff] }
 0x13e   :  { %v3782_v1 = vadd.f32 %v957_v16, %v861_v13  ;;  %v864_v2 = vmul.f32 %v832_v6, %v832_v6  ;;  %v863_v53 = vmul.f32 %v831_v22, %v831_v22  ;;  %v926_v52 = vsub.f32 %v5767_v34, %v3688_v48  ;;  %v5774_v13 = vld [vmem:[#allocation67_spill] sm:$0xff] }
 0x13f   :  { %v3799_v3 = vrot.slane %v5770_v59, %v3726_v63  ;;  %v1105_v51 = vadd.f32 %v3738_v20, %v3649_v21  ;;  %v1109_v48 = vadd.f32 %v3753_v24, %v3698_v9  ;;  %v830_v61 = vsub.f32 %v5771_v0, %v3706_v55  ;;  %v5777_v59 = vld [vmem:[#allocation64_spill] sm:$0xff] }
 0x140   :  { %1636 = vmin.xlane.f32.xlu0 %v1048_v26  ;;  %1638 = vmin.xlane.f32.xlu1 %v1049_v17  ;;  %v1108_v26 = vadd.f32 %v3753_v24, %v3693_v47  ;;  %v1053_v17 = vmin.f32 %v3782_v1, 1e+30  ;;  %v3785_v32 = vadd.f32 %v959_v42, %v863_v53  ;;  %v3787_v40 = vadd.f32 %v960_v38, %v864_v2  ;;  %v5768_v47 = vld [vmem:[#allocation65_spill] sm:$0xff] }
 0x141   :  { %v929_v14 = vsub.f32 %v5768_v47, %v3749_v12  ;;  %v1137_v31 = vmin.f32 %v1105_v51, 1e+30  ;;  %v1141_v6 = vmin.f32 %v1109_v48, 1e+30  ;;  %v1111_v55 = vadd.f32 %v3799_v3, %v3716_v57  ;;  %v5775_v38 = vld [vmem:[#allocation29_spill] sm:$0xff] }
 0x142   :  { %v1140_v15 = vmin.f32 %v1108_v26, 1e+30  ;;  %v1055_v50 = vmin.f32 %v3785_v32, 1e+30  ;;  %v1056_v16 = vmin.f32 %v3787_v40, 1e+30  ;;  %v1112_v60 = vadd.f32 %v3799_v3, %v3723_v10 }
 0x143   :  { %v961_v44 = vmul.f32 %v929_v14, %v929_v14  ;;  %v1143_v53 = vmin.f32 %v1111_v55, 1e+30  ;;  %v1106_v0 = vadd.f32 %v3738_v20, %v3671_v49 }
 0x144   :  { %1640 = vmin.xlane.f32.xlu0 %v1050_v58  ;;  %1642 = vmin.xlane.f32.xlu1 %v1051_v62  ;;  %v5769_v58 = vld [vmem:[#allocation45_spill] sm:$0xff] }
 0x145   :  { %v3795_v62 = vrot.slane %v5769_v58, %v5751_v36  ;;  %v5772_v36 = vld [vmem:[#allocation28_spill] sm:$0xff] }
 0x146   :  { %v833_v39 = vsub.f32 %v5772_v36, %v3765_v37  ;;  %v5778_v36 = vld [vmem:[#allocation27_spill] sm:$0xff] }
 0x147   :  { %v932_v21 = vsub.f32 %v5773_v25, %v3795_v62  ;;  %v931_v9 = vsub.f32 %v5774_v13, %v3795_v62 }
 0x148   :  { %1644 = vmin.xlane.f32.xlu0 %v1052_v11  ;;  %1938 = vmin.xlane.f32.xlu1 %v1135_v28  ;;  %v3813_v11 = vrot.slane %v5769_v58, %v5755_v56  ;;  %v958_v28 = vmul.f32 %v926_v52, %v926_v52  ;;  %v862_v56 = vmul.f32 %v830_v61, %v830_v61 }
 0x149   :  { %v865_v22 = vmul.f32 %v833_v39, %v833_v39  ;;  %v964_v26 = vmul.f32 %v932_v21, %v932_v21  ;;  %v963_v2 = vmul.f32 %v931_v9, %v931_v9  ;;  %v1110_v61 = vadd.f32 %v3753_v24, %v3711_v33  ;;  %v5780_v33 = vld [vmem:[#allocation32_spill] sm:$0xff] }
 0x14a   :  { %v836_v42 = vsub.f32 %v5775_v38, %v3813_v11  ;;  %v834_v39 = vsub.f32 %v5778_v36, %v3765_v37  ;;  %v1113_v21 = vadd.f32 %v3799_v3, %v3731_v4  ;;  %v837_v24 = vsub.f32 %v5780_v33, %v3813_v11 }
 0x14b   :  { %v3829_v57 = vadd.f32 %v961_v44, %v865_v22  ;;  %v1138_v44 = vmin.f32 %v1106_v0, 1e+30  ;;  %v1142_v25 = vmin.f32 %v1110_v61, 1e+30  ;;  %v1065_v61 = vmin.f32 %v3654_v54, 1e+30 }
 0x14c   :  { %1940 = vmin.xlane.f32.xlu0 %v1136_v41  ;;  %1946 = vmin.xlane.f32.xlu1 %v1139_v19  ;;  %v5776_v41 = vld [vmem:[#allocation30_spill] sm:$0xff]  ;;  %v868_v34 = vmul.f32 %v836_v42, %v836_v42  ;;  %v866_v20 = vmul.f32 %v834_v39, %v834_v39  ;;  %v1145_v13 = vmin.f32 %v1113_v21, 1e+30  ;;  %v869_v55 = vmul.f32 %v837_v24, %v837_v24  ;;  %v3051_v39 = vld [vmem:[#allocation8 + $0x28] sm:$0xff] }
 0x14d   :  { %v835_v19 = vsub.f32 %v5776_v41, %v3813_v11  ;;  %v1057_v47 = vmin.f32 %v3829_v57, 1e+30  ;;  %v1063_v42 = vmin.f32 %v3637_v18, 1e+30  ;;  %v3050_v41 = vld [vmem:[#allocation8 + $0x20] sm:$0xff] }
 0x14e   :  { %v3835_v58 = vadd.f32 %v964_v26, %v868_v34  ;;  %v5782_v26 = vld [vmem:[#allocation31_spill] sm:$0xff]  ;;  %v1067_v36 = vmin.f32 %v3661_v43, 1e+30 }
 0x14f   :  { %v867_v10 = vmul.f32 %v835_v19, %v835_v19  ;;  %v1090_v19 = vrot.slane %v3050_v41, %v3726_v63  ;;  %v1070_v41 = vmin.f32 %v3622_v7, 1e+30 }
 0x150   :  { %1948 = vmin.xlane.f32.xlu0 %v1140_v15  ;;  %1646 = vmin.xlane.f32.xlu1 %v1053_v17  ;;  %v1144_v15 = vmin.f32 %v1112_v60, 1e+30  ;;  %v3827_v17 = vadd.f32 %v958_v28, %v862_v56  ;;  %v1060_v48 = vmin.f32 %v3835_v58, 1e+30  ;;  %v5779_v28 = vld [vmem:[#allocation34_spill] sm:$0xff] }
 0x151   :  { %v3833_v14 = vadd.f32 %v963_v2, %v867_v10  ;;  %v5781_v56 = vld [vmem:[#allocation50_spill] sm:$0xff]  ;;  %v838_v2 = vsub.f32 %v5782_v26, %v3813_v11  ;;  %v1119_v10 = vadd.f32 %v1090_v19, %v3785_v32  ;;  %v1120_v11 = vadd.f32 %v1090_v19, %v3787_v40 }
 0x152   :  { %v1054_v52 = vmin.f32 %v3827_v17, 1e+30  ;;  %v934_v22 = vsub.f32 %v5781_v56, %v3795_v62  ;;  %v1121_v21 = vadd.f32 %v1090_v19, %v3829_v57 }
 0x153   :  { %v1059_v51 = vmin.f32 %v3833_v14, 1e+30 }
 0x154   :  { %1650 = vmin.xlane.f32.xlu0 %v1055_v50  ;;  %1652 = vmin.xlane.f32.xlu1 %v1056_v16  ;;  %v930_v50 = vsub.f32 %v5777_v59, %v3749_v12  ;;  %v3841_v16 = vrot.slane %v5752_v45, %v3726_v63  ;;  %v933_v45 = vsub.f32 %v5779_v28, %v3795_v62 }
 0x156   :  { %v962_v12 = vmul.f32 %v930_v50, %v930_v50  ;;  %v1115_v49 = vadd.f32 %v3841_v16, %v3743_v23  ;;  %v965_v37 = vmul.f32 %v933_v45, %v933_v45  ;;  %v1117_v62 = vadd.f32 %v3841_v16, %v3782_v1 }
 0x157   :  { %v1118_v40 = vadd.f32 %v3841_v16, %v3827_v17 }
 0x158   :  { %1942 = vmin.xlane.f32.xlu0 %v1137_v31  ;;  %1950 = vmin.xlane.f32.xlu1 %v1141_v6  ;;  %v1147_v9 = vmin.f32 %v1115_v49, 1e+30  ;;  %v1116_v31 = vadd.f32 %v3841_v16, %v3757_v29  ;;  %v3861_v6 = vadd.f32 %v962_v12, %v866_v20  ;;  %v3864_v60 = vadd.f32 %v965_v37, %v869_v55 }
 0x159   :  { %v1114_v29 = vadd.f32 %v3799_v3, %v3741_v27  ;;  %v1149_v3 = vmin.f32 %v1117_v62, 1e+30  ;;  %v1094_v12 = vrot.slane %v3051_v39, %v3726_v63  ;;  %v1153_v16 = vmin.f32 %v1121_v21, 1e+30 }
 0x15a   :  { %v1148_v4 = vmin.f32 %v1116_v31, 1e+30  ;;  %v1058_v23 = vmin.f32 %v3861_v6, 1e+30  ;;  %v1061_v38 = vmin.f32 %v3864_v60, 1e+30  ;;  %v1122_v37 = vadd.f32 %v1090_v19, %v3861_v6 }
 0x15b   :  { %v1146_v34 = vmin.f32 %v1114_v29, 1e+30  ;;  %v1123_v49 = vadd.f32 %v1094_v12, %v3833_v14  ;;  %v1124_v24 = vadd.f32 %v1094_v12, %v3835_v58  ;;  %v1125_v31 = vadd.f32 %v1094_v12, %v3864_v60 }
 0x15c   :  { %1954 = vmin.xlane.f32.xlu0 %v1143_v53  ;;  %1956 = vmin.xlane.f32.xlu1 %v1144_v15  ;;  %v966_v53 = vmul.f32 %v934_v22, %v934_v22  ;;  %v1064_v15 = vmin.f32 %v3640_v8, 1e+30  ;;  %v1066_v58 = vmin.f32 %v3673_v46, 1e+30  ;;  %v1069_v6 = vmin.f32 %v3675_v5, 1e+30 }
 0x15d   :  { %v1155_v33 = vmin.f32 %v1123_v49, 1e+30  ;;  %v1156_v55 = vmin.f32 %v1124_v24, 1e+30  ;;  %v1154_v56 = vmin.f32 %v1122_v37, 1e+30 }
 0x15e   :  { %v1157_v29 = vmin.f32 %v1125_v31, 1e+30 }
 0x160   :  { %1648 = vmin.xlane.f32.xlu0 %v1054_v52  ;;  %1654 = vmin.xlane.f32.xlu1 %v1057_v47  ;;  %v870_v52 = vmul.f32 %v838_v2, %v838_v2  ;;  %v1151_v47 = vmin.f32 %v1119_v10, 1e+30 }
 0x162   :  { %v998_v59 = vadd.f32 %v966_v53, %v870_v52 }
 0x164   :  { %1658 = vmin.xlane.f32.xlu0 %v1059_v51  ;;  %1660 = vmin.xlane.f32.xlu1 %v1060_v48  ;;  %v1152_v48 = vmin.f32 %v1120_v11, 1e+30  ;;  %v1062_v1 = vmin.f32 %v998_v59, 1e+30  ;;  %v3927_v19 = vadd.f32 %v1094_v12, %v998_v59 }
 0x168   :  { %1944 = vmin.xlane.f32.xlu0 %v1138_v44  ;;  %1952 = vmin.xlane.f32.xlu1 %v1142_v25  ;;  %v1068_v44 = vmin.f32 %v3613_v35, 1e+30  ;;  %v1150_v25 = vmin.f32 %v1118_v40, 1e+30 }
 0x16c   :  { %1958 = vmin.xlane.f32.xlu0 %v1145_v13  ;;  %1962 = vmin.xlane.f32.xlu1 %v1147_v9  ;;  %v3052_v13 = vld [vmem:[#allocation8 + $0x30] sm:$0xff] }
 0x16d   :  { %v1098_v57 = vrot.slane %v3052_v13, %v3726_v63 }
 0x16f   :  { %v1127_v22 = vadd.f32 %v1098_v57, %v3637_v18  ;;  %v3942_v53 = vadd.f32 %v1098_v57, %v3673_v46 }
 0x170   :  { %1964 = vmin.xlane.f32.xlu0 %v1148_v4  ;;  %1656 = vmin.xlane.f32.xlu1 %v1058_v23  ;;  %v3053_v4 = vld [vmem:[#allocation8 + $0x38] sm:$0xff] }
 0x171   :  { %v1102_v23 = vrot.slane %v3053_v4, %v3726_v63  ;;  %v3930_v63 = vadd.f32 %v1098_v57, %v3654_v54 }
 0x173   :  { %v3934_v26 = vadd.f32 %v1102_v23, %v3661_v43  ;;  %v3937_v18 = vadd.f32 %v1102_v23, %v3613_v35  ;;  %v3948_v54 = vadd.f32 %v1102_v23, %v3622_v7  ;;  %v1159_v43 = vmin.f32 %v1127_v22, 1e+30 }
 0x174   :  { %1662 = vmin.xlane.f32.xlu0 %v1061_v38  ;;  %1666 = vmin.xlane.f32.xlu1 %v1063_v42  ;;  %v1128_v38 = vadd.f32 %v1098_v57, %v3640_v8  ;;  %v5783_v8 = vlaneseq  ;;  %v1161_v7 = vmin.f32 %v3930_v63, 1e+30 }
 0x175   :  { %v1164_v11 = vmin.f32 %v3937_v18, 1e+30 }
 0x176   :  { %v2355_v2 = vand.u32 127, %v5783_v8  ;;  %v1160_v46 = vmin.f32 %v1128_v38, 1e+30 }
 0x178   :  { %1668 = vmin.xlane.f32.xlu0 %v1064_v15  ;;  %1960 = vmin.xlane.f32.xlu1 %v1146_v34  ;;  %v3882_v50 = vpop.xlane.xlu1 %1300  ;;  %v3945_v15 = vadd.f32 %v1102_v23, %v3675_v5  ;;  %v2367_v35 = vadd.s32 4294967280, %v2355_v2  ;;  %v2360_v34 = vadd.s32 4294967288, %v2355_v2  ;;  %v1158_v5 = vmin.f32 %v3927_v19, 1e+30 }
 0x179   :  { %v3879_v27 = vpop.xlane.xlu0 %1298  ;;  %2858 = vrsqrt.f32 %v3882_v50  ;;  %v2374_v52 = vadd.s32 4294967272, %v2355_v2  ;;  %vm1371_vm0 = vcmp.eq.f32.partialorder %v3882_v50, inf  ;;  %vm1373_vm1 = vcmp.eq.f32.partialorder %v3882_v50, 0.0 }
 0x17a   :  { %2860 = vrsqrt.f32 %v3879_v27  ;;  %v3968_v40 = vsub.s32 %v2367_v35, %v5757_v30  ;;  %v3971_v39 = vsub.s32 %v2360_v34, %v5757_v30  ;;  %vm1364_vm2 = vcmp.eq.f32.partialorder %v3879_v27, inf }
 0x17b   :  { %v3981_v49 = vsub.s32 %v2374_v52, %v5757_v30  ;;  %vm1366_vm3 = vcmp.eq.f32.partialorder %v3879_v27, 0.0  ;;  %v1367_v24 = vand.u32 2147483648, %v3879_v27 }
 0x17c   :  { %1966 = vmin.xlane.f32.xlu0 %v1149_v3  ;;  %1970 = vmin.xlane.f32.xlu1 %v1151_v47  ;;  %v1163_v47 = vmin.f32 %v3934_v26, 1e+30 }
 0x17d   :  { %v3884_v51 = vpop.xlane.xlu0 %1302 }
 0x17e   :  { %2862 = vrsqrt.f32 %v3884_v51  ;;  %vm1378_vm4 = vcmp.eq.f32.partialorder %v3884_v51, inf  ;;  %vm1380_vm5 = vcmp.eq.f32.partialorder %v3884_v51, 0.0  ;;  %v1381_v13 = vand.u32 2147483648, %v3884_v51 }
 0x180   :  { %1972 = vmin.xlane.f32.xlu0 %v1152_v48  ;;  %1664 = vmin.xlane.f32.xlu1 %v1062_v1  ;;  %v3886_v32 = vpop.xlane.xlu1 %1306  ;;  %v1162_v48 = vmin.f32 %v3942_v53, 1e+30  ;;  %v1165_v1 = vmin.f32 %v3945_v15, 1e+30 }
 0x181   :  { %v3888_v0 = vpop.xlane.xlu0 %1304  ;;  %2864 = vrsqrt.f32 %v3886_v32  ;;  %vm1392_vm6 = vcmp.eq.f32.partialorder %v3886_v32, inf  ;;  %vm1394_vm7 = vcmp.eq.f32.partialorder %v3886_v32, 0.0 }
 0x182   :  { %2866 = vrsqrt.f32 %v3888_v0  ;;  %vm1385_vm8 = vcmp.eq.f32.partialorder %v3888_v0, inf  ;;  %vm1387_vm9 = vcmp.eq.f32.partialorder %v3888_v0, 0.0 }
 0x183   :  { %v2859_v3 = vpop.eup %2858 }
 0x184   :  { %1670 = vmin.xlane.f32.xlu0 %v1065_v61  ;;  %1674 = vmin.xlane.f32.xlu1 %v1067_v36  ;;  %v3895_v28 = vpop.xlane.xlu1 %1310  ;;  %v2861_v59 = vpop.eup %2860  ;;  %v1166_v61 = vmin.f32 %v3948_v54, 1e+30  ;;  %v3965_v36 = vsub.s32 %v2355_v2, %v5757_v30 }
 0x185   :  { %v3897_v45 = vpop.xlane.xlu0 %1308  ;;  %2868 = vrsqrt.f32 %v3895_v28  ;;  %vm1406_vm10 = vcmp.eq.f32.partialorder %v3895_v28, inf  ;;  %vm1408_vm12 = vcmp.eq.f32.partialorder %v3895_v28, 0.0 }
 0x186   :  { %2870 = vrsqrt.f32 %v3897_v45  ;;  %vm1399_vm11 = vcmp.eq.f32.partialorder %v3897_v45, inf  ;;  %vm1401_vm13 = vcmp.eq.f32.partialorder %v3897_v45, 0.0 }
 0x188   :  { %1676 = vmin.xlane.f32.xlu0 %v1068_v44  ;;  %1968 = vmin.xlane.f32.xlu1 %v1150_v25  ;;  %v3902_v20 = vpop.xlane.xlu1 %1314  ;;  %v2863_v12 = vpop.eup %2862  ;;  %v1370_v44 = vmul.f32 %v2859_v3, %v3882_v50 }
 0x189   :  { %v3904_v17 = vpop.xlane.xlu0 %1312  ;;  %2872 = vrsqrt.f32 %v3902_v20  ;;  %v1377_v30 = vmul.f32 %v2863_v12, %v3884_v51  ;;  %vm1420_vm14 = vcmp.eq.f32.partialorder %v3902_v20, inf  ;;  %vm1422_vm15 = vcmp.eq.f32.partialorder %v3902_v20, 0.0 }
 0x18a   :  { %2874 = vrsqrt.f32 %v3904_v17  ;;  %v1372_v31 = vsel %vm1371_vm0, %v3882_v50, %v1370_v44  ;;  %vm1413_vm0 = vcmp.eq.f32.partialorder %v3904_v17, inf }
 0x18b   :  { %v2865_v37 = vpop.eup %2864  ;;  %v1379_v19 = vsel %vm1378_vm4, %v3884_v51, %v1377_v30  ;;  %v1416_v51 = vand.u32 2147483648, %v3904_v17 }
 0x18c   :  { %1974 = vmin.xlane.f32.xlu0 %v1153_v16  ;;  %1978 = vmin.xlane.f32.xlu1 %v1155_v33  ;;  %v3911_v14 = vpop.xlane.xlu1 %1318  ;;  %v1374_v16 = vand.u32 2147483648, %v3882_v50  ;;  %v1363_v33 = vmul.f32 %v2861_v59, %v3879_v27  ;;  %v2867_v57 = vpop.eup %2866  ;;  %v1391_v38 = vmul.f32 %v2865_v37, %v3886_v32  ;;  %v1402_v50 = vand.u32 2147483648, %v3897_v45 }
 0x18d   :  { %v3913_v9 = vpop.xlane.xlu0 %1316  ;;  %2876 = vrsqrt.f32 %v3911_v14  ;;  %v1384_v63 = vmul.f32 %v2867_v57, %v3888_v0  ;;  %v4044_v52 = vsel %vm1380_vm5, %v1381_v13, %v1379_v19  ;;  %v1437_v44 = vand.u32 2147483648, %v3911_v14 }
 0x18e   :  { %2878 = vrsqrt.f32 %v3913_v9  ;;  %v1393_v3 = vsel %vm1392_vm6, %v3886_v32, %v1391_v38  ;;  %vm1427_vm4 = vcmp.eq.f32.partialorder %v3913_v9, inf  ;;  %vm1429_vm5 = vcmp.eq.f32.partialorder %v3913_v9, 0.0 }
 0x18f   :  { %v2869_v23 = vpop.eup %2868  ;;  %v1386_v59 = vsel %vm1385_vm8, %v3888_v0, %v1384_v63 }
 0x190   :  { %1980 = vmin.xlane.f32.xlu0 %v1156_v55  ;;  %1672 = vmin.xlane.f32.xlu1 %v1066_v58  ;;  %v3922_v42 = vpop.xlane.xlu1 %1322  ;;  %v1395_v55 = vand.u32 2147483648, %v3886_v32  ;;  %v2871_v22 = vpop.eup %2870  ;;  %v1405_v34 = vmul.f32 %v2869_v23, %v3895_v28  ;;  %v1430_v32 = vand.u32 2147483648, %v3913_v9 }
 0x191   :  { %v3924_v60 = vpop.xlane.xlu0 %1320  ;;  %2880 = vrsqrt.f32 %v3922_v42  ;;  %vm1448_vm6 = vcmp.eq.f32.partialorder %v3922_v42, inf  ;;  %v1451_v57 = vand.u32 2147483648, %v3922_v42  ;;  %vm1450_vm8 = vcmp.eq.f32.partialorder %v3922_v42, 0.0 }
 0x192   :  { %2882 = vrsqrt.f32 %v3924_v60  ;;  %v1407_v26 = vsel %vm1406_vm10, %v3895_v28, %v1405_v34  ;;  %v1444_v53 = vand.u32 2147483648, %v3924_v60 }
 0x193   :  { %v2873_v35 = vpop.eup %2872 }
 0x194   :  { %1678 = vmin.xlane.f32.xlu0 %v1069_v6  ;;  %1976 = vmin.xlane.f32.xlu1 %v1154_v56  ;;  %v3952_v62 = vpop.xlane.xlu1 %1326  ;;  %v1365_v6 = vsel %vm1364_vm2, %v3879_v27, %v1363_v33  ;;  %v1388_v56 = vand.u32 2147483648, %v3888_v0  ;;  %v2875_v27 = vpop.eup %2874  ;;  %vm1434_vm2 = vcmp.eq.f32.partialorder %v3911_v14, inf  ;;  %v1419_v12 = vmul.f32 %v2873_v35, %v3902_v20 }
 0x195   :  { %v3954_v10 = vpop.xlane.xlu0 %1324  ;;  %v4029_v8 = vsel %vm1366_vm3, %v1367_v24, %v1365_v6  ;;  %2884 = vrsqrt.f32 %v3952_v62  ;;  %vm1436_vm3 = vcmp.eq.f32.partialorder %v3911_v14, 0.0  ;;  %v4073_v24 = vsel %vm1394_vm7, %v1395_v55, %v1393_v3 }
 0x196   :  { %2886 = vrsqrt.f32 %v3954_v10  ;;  %v4084_v37 = vsel %vm1387_vm9, %v1388_v56, %v1386_v59  ;;  %vm1441_vm7 = vcmp.eq.f32.partialorder %v3924_v60, inf  ;;  %v1421_v23 = vsel %vm1420_vm14, %v3902_v20, %v1419_v12 }
 0x197   :  { %vm1443_vm9 = vcmp.eq.f32.partialorder %v3924_v60, 0.0  ;;  %vm1462_vm10 = vcmp.eq.f32.partialorder %v3952_v62, inf  ;;  %v1458_v63 = vand.u32 2147483648, %v3954_v10 }
 0x198   :  { %1982 = vmin.xlane.f32.xlu0 %v1157_v29  ;;  %1986 = vmin.xlane.f32.xlu1 %v1159_v43  ;;  %v3976_v25 = vpop.xlane.xlu1 %1330  ;;  %v1409_v29 = vand.u32 2147483648, %v3895_v28 }
 0x199   :  { %v3978_v21 = vpop.xlane.xlu0 %1328  ;;  %2888 = vrsqrt.f32 %v3976_v25  ;;  %vm1476_vm14 = vcmp.eq.f32.partialorder %v3976_v25, inf }
 0x19a   :  { %2890 = vrsqrt.f32 %v3978_v21  ;;  %v1472_v59 = vand.u32 2147483648, %v3978_v21 }
 0x19c   :  { %1988 = vmin.xlane.f32.xlu0 %v1160_v46  ;;  %1680 = vmin.xlane.f32.xlu1 %v1070_v41  ;;  %v4002_v58 = vpop.xlane.xlu1 %1334  ;;  %v4019_v41 = vsel %vm1373_vm1, %v1374_v16, %v1372_v31  ;;  %v1398_v46 = vmul.f32 %v2871_v22, %v3897_v45  ;;  %vm1415_vm1 = vcmp.eq.f32.partialorder %v3904_v17, 0.0  ;;  %v4100_v31 = vsel %vm1408_vm12, %v1409_v29, %v1407_v26 }
 0x19d   :  { %v4004_v4 = vpop.xlane.xlu0 %1332  ;;  %2892 = vrsqrt.f32 %v4002_v58  ;;  %vm1464_vm12 = vcmp.eq.f32.partialorder %v3952_v62, 0.0 }
 0x19e   :  { %v1400_v18 = vsel %vm1399_vm11, %v3897_v45, %v1398_v46  ;;  %2894 = vrsqrt.f32 %v4004_v4  ;;  %vm1455_vm11 = vcmp.eq.f32.partialorder %v3954_v10, inf }
 0x19f   :  { %v4104_v55 = vsel %vm1401_vm13, %v1402_v50, %v1400_v18  ;;  %vm1457_vm13 = vcmp.eq.f32.partialorder %v3954_v10, 0.0 }
 0x1a0   :  { %1984 = vmin.xlane.f32.xlu0 %v1158_v5  ;;  %1990 = vmin.xlane.f32.xlu1 %v1161_v7  ;;  %v4034_v2 = vpop.xlane.xlu1 %1338  ;;  %v1423_v5 = vand.u32 2147483648, %v3902_v20  ;;  %v2877_v7 = vpop.eup %2876  ;;  %v1479_v20 = vand.u32 2147483648, %v3976_v25 }
 0x1a1   :  { %v4036_v43 = vpop.xlane.xlu0 %1336  ;;  %v1433_v30 = vmul.f32 %v2877_v7, %v3911_v14  ;;  %2896 = vrsqrt.f32 %v4034_v2 }
 0x1a2   :  { %v4130_v29 = vsel %vm1422_vm15, %v1423_v5, %v1421_v23  ;;  %2898 = vrsqrt.f32 %v4036_v43  ;;  %vm1478_vm15 = vcmp.eq.f32.partialorder %v3976_v25, 0.0 }
 0x1a3   :  { %v1435_v56 = vsel %vm1434_vm2, %v3911_v14, %v1433_v30  ;;  %vm1490_vm2 = vcmp.eq.f32.partialorder %v4002_v58, inf }
 0x1a4   :  { %1994 = vmin.xlane.f32.xlu0 %v1163_v47  ;;  %1996 = vmin.xlane.f32.xlu1 %v1164_v11  ;;  %v4067_v16 = vpop.xlane.xlu1 %1342  ;;  %v1412_v47 = vmul.f32 %v2875_v27, %v3904_v17  ;;  %v2879_v11 = vpop.eup %2878 }
 0x1a5   :  { %v4069_v33 = vpop.xlane.xlu0 %1340  ;;  %v2881_v13 = vpop.eup %2880  ;;  %v1426_v45 = vmul.f32 %v2879_v11, %v3913_v9  ;;  %2900 = vrsqrt.f32 %v4067_v16 }
 0x1a6   :  { %v2883_v0 = vpop.eup %2882  ;;  %v1414_v28 = vsel %vm1413_vm0, %v3904_v17, %v1412_v47  ;;  %v1447_v22 = vmul.f32 %v2881_v13, %v3922_v42  ;;  %v4152_v17 = vsel %vm1436_vm3, %v1437_v44, %v1435_v56  ;;  %vm1469_vm0 = vcmp.eq.f32.partialorder %v3978_v21, inf }
 0x1a7   :  { %v2885_v6 = vpop.eup %2884  ;;  %v1440_v19 = vmul.f32 %v2883_v0, %v3924_v60  ;;  %v4139_v35 = vsel %vm1415_vm1, %v1416_v51, %v1414_v28  ;;  %2902 = vrsqrt.f32 %v4069_v33  ;;  %vm1471_vm1 = vcmp.eq.f32.partialorder %v3978_v21, 0.0 }
 0x1a8   :  { %1992 = vmin.xlane.f32.xlu0 %v1162_v48  ;;  %1998 = vmin.xlane.f32.xlu1 %v1165_v1  ;;  %v4111_v48 = vpop.xlane.xlu1 %1346  ;;  %v1465_v1 = vand.u32 2147483648, %v3952_v62  ;;  %v2887_v38 = vpop.eup %2886  ;;  %v1449_v5 = vsel %vm1448_vm6, %v3922_v42, %v1447_v22  ;;  %v1461_v27 = vmul.f32 %v2885_v6, %v3952_v62  ;;  %vm1492_vm3 = vcmp.eq.f32.partialorder %v4002_v58, 0.0 }
 0x1a9   :  { %v4113_v15 = vpop.xlane.xlu0 %1344  ;;  %v2889_v50 = vpop.eup %2888  ;;  %v1454_v14 = vmul.f32 %v2887_v38, %v3954_v10  ;;  %2904 = vrsqrt.f32 %v4111_v48  ;;  %v1442_v3 = vsel %vm1441_vm7, %v3924_v60, %v1440_v19  ;;  %v4186_v11 = vsel %vm1450_vm8, %v1451_v57, %v1449_v5 }
 0x1aa   :  { %v2891_v54 = vpop.eup %2890  ;;  %v1475_v7 = vmul.f32 %v2889_v50, %v3976_v25  ;;  %2906 = vrsqrt.f32 %v4113_v15  ;;  %v4193_v30 = vsel %vm1443_vm9, %v1444_v53, %v1442_v3  ;;  %v1486_v13 = vand.u32 2147483648, %v4004_v4 }
 0x1ab   :  { %v2893_v51 = vpop.eup %2892  ;;  %v1468_v44 = vmul.f32 %v2891_v54, %v3978_v21  ;;  %v1456_v42 = vsel %vm1455_vm11, %v3954_v10, %v1454_v14  ;;  %vm1504_vm6 = vcmp.eq.f32.partialorder %v4034_v2, inf  ;;  %v1507_v0 = vand.u32 2147483648, %v4034_v2 }
 0x1ac   :  { %2000 = vmin.xlane.f32.xlu0 %v1166_v61  ;;  %v4146_v34 = vpop.xlane.xlu1 %1350  ;;  %v1428_v61 = vsel %vm1427_vm4, %v3913_v9, %v1426_v45  ;;  %v2895_v47 = vpop.eup %2894  ;;  %v1493_v9 = vand.u32 2147483648, %v4002_v58  ;;  %vm1483_vm4 = vcmp.eq.f32.partialorder %v4004_v4, inf  ;;  %v1477_v57 = vsel %vm1476_vm14, %v3976_v25, %v1475_v7 }
 0x1ad   :  { %v4148_v46 = vpop.xlane.xlu0 %1348  ;;  %v4175_v12 = vsel %vm1429_vm5, %v1430_v32, %v1428_v61  ;;  %2908 = vrsqrt.f32 %v4146_v34  ;;  %v1463_v32 = vsel %vm1462_vm10, %v3952_v62, %v1461_v27  ;;  %vm1485_vm5 = vcmp.eq.f32.partialorder %v4004_v4, 0.0  ;;  %v2897_v23 = vpop.eup %2896 }
 0x1ae   :  { %v1489_v60 = vmul.f32 %v2893_v51, %v4002_v58  ;;  %v1470_v53 = vsel %vm1469_vm0, %v3978_v21, %v1468_v44  ;;  %v1482_v28 = vmul.f32 %v2895_v47, %v4004_v4  ;;  %vm1497_vm7 = vcmp.eq.f32.partialorder %v4036_v43, inf  ;;  %v2899_v56 = vpop.eup %2898 }
 0x1af   :  { %2910 = vrsqrt.f32 %v4148_v46  ;;  %v4223_v22 = vsel %vm1464_vm12, %v1465_v1, %v1463_v32  ;;  %v4227_v38 = vsel %vm1457_vm13, %v1458_v63, %v1456_v42  ;;  %vm1506_vm8 = vcmp.eq.f32.partialorder %v4034_v2, 0.0  ;;  %v2901_v50 = vpop.eup %2900 }
 0x1b0   :  { %v1500_v19 = vand.u32 2147483648, %v4036_v43  ;;  %vm1518_vm9 = vcmp.eq.f32.partialorder %v4067_v16, inf  ;;  %v4234_v54 = vsel %vm1478_vm15, %v1479_v20, %v1477_v57  ;;  %vm1499_vm10 = vcmp.eq.f32.partialorder %v4036_v43, 0.0 }
 0x1b1   :  { %v4180_v26 = vpop.xlane.xlu1 %1354  ;;  %v4182_v18 = vpop.xlane.xlu0 %1352  ;;  %v1521_v62 = vand.u32 2147483648, %v4067_v16  ;;  %vm1511_vm11 = vcmp.eq.f32.partialorder %v4069_v33, inf  ;;  %v1514_v10 = vand.u32 2147483648, %v4069_v33  ;;  %v4242_v63 = vsel %vm1471_vm1, %v1472_v59, %v1470_v53 }
 0x1b2   :  { %v2903_v1 = vpop.eup %2902  ;;  %v1491_v61 = vsel %vm1490_vm2, %v4002_v58, %v1489_v60  ;;  %v1503_v25 = vmul.f32 %v2897_v23, %v4034_v2  ;;  %vm1520_vm12 = vcmp.eq.f32.partialorder %v4067_v16, 0.0  ;;  %2912 = vrsqrt.f32 %v4180_v26 }
 0x1b3   :  { %v2905_v20 = vpop.eup %2904  ;;  %v1484_v5 = vsel %vm1483_vm4, %v4004_v4, %v1482_v28  ;;  %v1496_v27 = vmul.f32 %v2899_v56, %v4036_v43  ;;  %vm1532_vm13 = vcmp.eq.f32.partialorder %v4111_v48, inf  ;;  %2914 = vrsqrt.f32 %v4182_v18 }
 0x1b4   :  { %v2907_v3 = vpop.eup %2906  ;;  %v1517_v7 = vmul.f32 %v2901_v50, %v4067_v16  ;;  %vm1513_vm14 = vcmp.eq.f32.partialorder %v4069_v33, 0.0  ;;  %vm1534_vm15 = vcmp.eq.f32.partialorder %v4111_v48, 0.0  ;;  %v1535_v59 = vand.u32 2147483648, %v4111_v48 }
 0x1b5   :  { %v4215_v45 = vpop.xlane.xlu1 %1358  ;;  %v4217_v6 = vpop.xlane.xlu0 %1356  ;;  %v4267_v44 = vsel %vm1492_vm3, %v1493_v9, %v1491_v61  ;;  %vm1525_vm0 = vcmp.eq.f32.partialorder %v4113_v15, inf  ;;  %vm1527_vm1 = vcmp.eq.f32.partialorder %v4113_v15, 0.0  ;;  %v1528_v47 = vand.u32 2147483648, %v4113_v15 }
 0x1b6   :  { %v4274_v32 = vsel %vm1485_vm5, %v1486_v13, %v1484_v5  ;;  %v1505_v42 = vsel %vm1504_vm6, %v4034_v2, %v1503_v25  ;;  %v1510_v57 = vmul.f32 %v2903_v1, %v4069_v33  ;;  %v1531_v58 = vmul.f32 %v2905_v20, %v4111_v48 }
 0x1b7   :  { %v2909_v51 = vpop.eup %2908  ;;  %v1498_v9 = vsel %vm1497_vm7, %v4036_v43, %v1496_v27  ;;  %v1524_v60 = vmul.f32 %v2907_v3, %v4113_v15  ;;  %vm1546_vm2 = vcmp.eq.f32.partialorder %v4146_v34, inf  ;;  %vm1548_vm3 = vcmp.eq.f32.partialorder %v4146_v34, 0.0 }
 0x1b8   :  { %v1519_v23 = vsel %vm1518_vm9, %v4067_v16, %v1517_v7  ;;  %v1545_v53 = vmul.f32 %v2909_v51, %v4146_v34  ;;  %v1549_v28 = vand.u32 2147483648, %v4146_v34  ;;  %v4299_v50 = vsel %vm1506_vm8, %v1507_v0, %v1505_v42 }
 0x1b9   :  { %v4256_v21 = vpop.xlane.xlu1 %1618  ;;  %v4258_v14 = vpop.xlane.xlu0 %1360  ;;  %vm1539_vm4 = vcmp.eq.f32.partialorder %v4148_v46, inf  ;;  %v4306_v61 = vsel %vm1499_vm10, %v1500_v19, %v1498_v9  ;;  %v1512_v25 = vsel %vm1511_vm11, %v4069_v33, %v1510_v57  ;;  %v1533_v2 = vsel %vm1532_vm13, %v4111_v48, %v1531_v58 }
 0x1ba   :  { %2916 = vrsqrt.f32 %v4256_v21  ;;  %v2911_v56 = vpop.eup %2910  ;;  %v4317_v0 = vsel %vm1520_vm12, %v1521_v62, %v1519_v23  ;;  %v1526_v43 = vsel %vm1525_vm0, %v4113_v15, %v1524_v60  ;;  %v1547_v3 = vsel %vm1546_vm2, %v4146_v34, %v1545_v53 }
 0x1bb   :  { %5784 = vst [vmem:[#allocation33_spill] sm:$0xff] %v4317_v0  ;;  %v1538_v16 = vmul.f32 %v2911_v56, %v4148_v46  ;;  %v4336_v51 = vsel %vm1513_vm14, %v1514_v10, %v1512_v25  ;;  %v4340_v42 = vsel %vm1534_vm15, %v1535_v59, %v1533_v2  ;;  %v4346_v9 = vsel %vm1527_vm1, %v1528_v47, %v1526_v43 }
 0x1bc   :  { %v2913_v27 = vpop.eup %2912  ;;  %5785 = vst [vmem:[#allocation35_spill] sm:$0xff] %v4346_v9  ;;  %vm1684_vm5 = vcmp.eq.f32.partialorder %v4256_v21, inf  ;;  %vm1686_vm6 = vcmp.eq.f32.partialorder %v4256_v21, 0.0  ;;  %v4353_v33 = vsel %vm1548_vm3, %v1549_v28, %v1547_v3  ;;  %v1687_v10 = vand.u32 2147483648, %v4256_v21 }
 0x1bd   :  { %v4287_v4 = vpop.xlane.xlu1 %1622  ;;  %v4289_v13 = vpop.xlane.xlu0 %1620  ;;  %5786 = vst [vmem:[#allocation53_spill] sm:$0xff] %v4353_v33  ;;  %v4365_v47 = vsel %vm1539_vm4, %v4148_v46, %v1538_v16  ;;  %v4368_v23 = vmul.f32 %v2913_v27, %v4180_v26  ;;  %vm5674_vm13 = vcmask 130112   ;;  %vm1560_vm4 = vcmp.eq.f32.partialorder %v4180_v26, inf }
 0x1be   :  { %2918 = vrsqrt.f32 %v4287_v4  ;;  %v2915_v7 = vpop.eup %2914  ;;  %vm1698_vm7 = vcmp.eq.f32.partialorder %v4287_v4, inf  ;;  %vm1700_vm8 = vcmp.eq.f32.partialorder %v4287_v4, 0.0  ;;  %v1701_v2 = vand.u32 2147483648, %v4287_v4 }
 0x1bf   :  { %2920 = vrsqrt.f32 %v4289_v13  ;;  %v4373_v53 = vmul.f32 %v2915_v7, %v4182_v18  ;;  %vm1691_vm9 = vcmp.eq.f32.partialorder %v4289_v13, inf  ;;  %vm1693_vm10 = vcmp.eq.f32.partialorder %v4289_v13, 0.0 }
 0x1c0   :  { %2922 = vrsqrt.f32 %v4215_v45  ;;  %v1694_v16 = vand.u32 2147483648, %v4289_v13 }
 0x1c1   :  { %2924 = vrsqrt.f32 %v4217_v6  ;;  %v4324_v20 = vpop.xlane.xlu1 %1626  ;;  %v4326_v5 = vpop.xlane.xlu0 %1624 }
 0x1c2   :  { %2926 = vrsqrt.f32 %v4324_v20  ;;  %vm1712_vm11 = vcmp.eq.f32.partialorder %v4324_v20, inf  ;;  %vm1714_vm12 = vcmp.eq.f32.partialorder %v4324_v20, 0.0  ;;  %vm1705_vm14 = vcmp.eq.f32.partialorder %v4326_v5, inf }
 0x1c3   :  { %2928 = vrsqrt.f32 %v4326_v5  ;;  %vm1707_vm15 = vcmp.eq.f32.partialorder %v4326_v5, 0.0 }
 0x1c4   :  { %v2917_v58 = vpop.eup %2916  ;;  %2930 = vrsqrt.f32 %v4258_v14 }
 0x1c5   :  { %v1683_v48 = vmul.f32 %v2917_v58, %v4256_v21  ;;  %v4358_v59 = vpop.xlane.xlu1 %1630  ;;  %v4360_v15 = vpop.xlane.xlu0 %1628 }
 0x1c6   :  { %2932 = vrsqrt.f32 %v4358_v59  ;;  %vm1726_vm0 = vcmp.eq.f32.partialorder %v4358_v59, inf  ;;  %vm1728_vm1 = vcmp.eq.f32.partialorder %v4358_v59, 0.0  ;;  %vm1719_vm2 = vcmp.eq.f32.partialorder %v4360_v15, inf }
 0x1c7   :  { %v1685_v28 = vsel %vm1684_vm5, %v4256_v21, %v1683_v48  ;;  %2934 = vrsqrt.f32 %v4360_v15  ;;  %vm1721_vm3 = vcmp.eq.f32.partialorder %v4360_v15, 0.0  ;;  %vm1553_vm5 = vcmp.eq.f32.partialorder %v4182_v18, inf }
 0x1c8   :  { %v2919_v56 = vpop.eup %2918  ;;  %v1688_v25 = vsel %vm1686_vm6, %v1687_v10, %v1685_v28 }
 0x1c9   :  { %v2921_v43 = vpop.eup %2920  ;;  %v2226_v27 = vsub.f32 %v1688_v25, %v4029_v8  ;;  %v1697_v3 = vmul.f32 %v2919_v56, %v4287_v4  ;;  %v4387_v7 = vpop.xlane.xlu1 %1634  ;;  %v1715_v56 = vand.u32 2147483648, %v4324_v20 }
 0x1ca   :  { %v4389_v58 = vpop.xlane.xlu0 %1632  ;;  %v4391_v21 = vpop.eup %2922  ;;  %v1690_v48 = vmul.f32 %v2921_v43, %v4289_v13  ;;  %2936 = vrsqrt.f32 %v4387_v7  ;;  %vm1740_vm6 = vcmp.eq.f32.partialorder %v4387_v7, inf }
 0x1cb   :  { %v4397_v8 = vpop.eup %2924  ;;  %v2258_v10 = vadd.f32 0.5, %v2226_v27  ;;  %v1699_v28 = vsel %vm1698_vm7, %v4287_v4, %v1697_v3  ;;  %2938 = vrsqrt.f32 %v4389_v58  ;;  %v1708_v4 = vand.u32 2147483648, %v4326_v5 }
 0x1cc   :  { %v2927_v25 = vpop.eup %2926  ;;  %v4406_v43 = vsel %vm1700_vm8, %v1701_v2, %v1699_v28  ;;  %v1692_v34 = vsel %vm1691_vm9, %v4289_v13, %v1690_v48  ;;  %vm1574_vm7 = vcmp.eq.f32.partialorder %v4215_v45, inf  ;;  %vm1541_vm8 = vcmp.eq.f32.partialorder %v4148_v46, 0.0 }
 0x1cd   :  { %v2929_v27 = vpop.eup %2928  ;;  %v1695_v60 = vsel %vm1693_vm10, %v1694_v16, %v1692_v34  ;;  %v1711_v57 = vmul.f32 %v2927_v25, %v4324_v20  ;;  %v4419_v2 = vpop.xlane.xlu1 %1638  ;;  %v2290_v13 = vmax.f32 %v2258_v10, 0.0  ;;  %v1729_v16 = vand.u32 2147483648, %v4358_v59 }
 0x1ce   :  { %v4421_v28 = vpop.xlane.xlu0 %1636  ;;  %v2227_v48 = vsub.f32 %v1695_v60, %v4019_v41  ;;  %v1704_v62 = vmul.f32 %v2929_v27, %v4326_v5  ;;  %2940 = vrsqrt.f32 %v4419_v2  ;;  %v4427_v3 = vpop.eup %2930  ;;  %vm1742_vm9 = vcmp.eq.f32.partialorder %v4387_v7, 0.0 }
 0x1cf   :  { %v1713_v34 = vsel %vm1712_vm11, %v4324_v20, %v1711_v57  ;;  %2942 = vrsqrt.f32 %v4421_v28  ;;  %vm1562_vm10 = vcmp.eq.f32.partialorder %v4180_v26, 0.0  ;;  %vm1555_vm11 = vcmp.eq.f32.partialorder %v4182_v18, 0.0 }
 0x1d0   :  { %v2933_v25 = vpop.eup %2932  ;;  %v2259_v19 = vadd.f32 0.5, %v2227_v48  ;;  %v1716_v41 = vsel %vm1714_vm12, %v1715_v56, %v1713_v34  ;;  %v1706_v60 = vsel %vm1705_vm14, %v4326_v5, %v1704_v62  ;;  %v1722_v5 = vand.u32 2147483648, %v4360_v15 }
 0x1d1   :  { %v2935_v10 = vpop.eup %2934  ;;  %v2230_v27 = vsub.f32 %v1716_v41, %v4073_v24  ;;  %v4443_v57 = vsel %vm1707_vm15, %v1708_v4, %v1706_v60  ;;  %v1725_v1 = vmul.f32 %v2933_v25, %v4358_v59  ;;  %v4447_v48 = vpop.xlane.xlu1 %1642  ;;  %v2359_v4 = vrot.slane %v2290_v13, %v3965_v36 }
 0x1d2   :  { %v4449_v20 = vpop.xlane.xlu0 %1640  ;;  %v2291_v62 = vmax.f32 %v2259_v19, 0.0  ;;  %v1718_v24 = vmul.f32 %v2935_v10, %v4360_v15  ;;  %vm1576_vm12 = vcmp.eq.f32.partialorder %v4215_v45, 0.0  ;;  %vm1733_vm14 = vcmp.eq.f32.partialorder %v4389_v58, inf }
 0x1d3   :  { %v1727_v34 = vsel %vm1726_vm0, %v4358_v59, %v1725_v1  ;;  %v2262_v41 = vadd.f32 0.5, %v2230_v27  ;;  %vm1735_vm15 = vcmp.eq.f32.partialorder %v4389_v58, 0.0  ;;  %vm1567_vm0 = vcmp.eq.f32.partialorder %v4217_v6, inf }
 0x1d4   :  { %v2937_v19 = vpop.eup %2936  ;;  %v2364_v25 = vrot.slane %v2291_v62, %v3971_v39  ;;  %v4467_v60 = vsel %vm1728_vm1, %v1729_v16, %v1727_v34  ;;  %v1720_v13 = vsel %vm1719_vm2, %v4360_v15, %v1718_v24  ;;  %v1743_v15 = vand.u32 2147483648, %v4387_v7 }
 0x1d5   :  { %v2939_v10 = vpop.eup %2938  ;;  %v1723_v56 = vsel %vm1721_vm3, %v1722_v5, %v1720_v13  ;;  %v1739_v62 = vmul.f32 %v2937_v19, %v4387_v7  ;;  %v4479_v59 = vpop.xlane.xlu1 %1938  ;;  %v1736_v19 = vand.u32 2147483648, %v4389_v58  ;;  %vm1581_vm1 = vcmp.eq.f32.partialorder %v4258_v14, inf }
 0x1d6   :  { %v4481_v16 = vpop.xlane.xlu0 %1644  ;;  %v4486_v27 = vsel %vm5674_vm13, %v2364_v25, %v2359_v4  ;;  %v2231_v24 = vsub.f32 %v1723_v56, %v4104_v55  ;;  %v1732_v5 = vmul.f32 %v2939_v10, %v4389_v58  ;;  %v2294_v55 = vmax.f32 %v2262_v41, 0.0 }
 0x1d7   :  { %5787 = vst [vmem:[#allocation36_spill] sm:$0xff] %v4486_v27  ;;  %v1741_v34 = vsel %vm1740_vm6, %v4387_v7, %v1739_v62  ;;  %v1573_v10 = vmul.f32 %v4391_v21, %v4215_v45  ;;  %vm1754_vm2 = vcmp.eq.f32.partialorder %v4419_v2, inf  ;;  %v1757_v7 = vand.u32 2147483648, %v4419_v2 }
 0x1d8   :  { %v2941_v4 = vpop.eup %2940  ;;  %v2263_v56 = vadd.f32 0.5, %v2231_v24  ;;  %v1744_v25 = vsel %vm1742_vm9, %v1743_v15, %v1741_v34  ;;  %v1734_v13 = vsel %vm1733_vm14, %v4389_v58, %v1732_v5  ;;  %v1561_v58 = vsel %vm1560_vm4, %v4180_v26, %v4368_v23 }
 0x1d9   :  { %v2234_v62 = vsub.f32 %v1744_v25, %v4130_v29  ;;  %v1737_v1 = vsel %vm1735_vm15, %v1736_v19, %v1734_v13  ;;  %v1753_v27 = vmul.f32 %v2941_v4, %v4419_v2  ;;  %v4507_v33 = vpop.xlane.xlu1 %1946  ;;  %vm1756_vm3 = vcmp.eq.f32.partialorder %v4419_v2, 0.0  ;;  %v2943_v15 = vpop.eup %2942 }
 0x1da   :  { %v4509_v9 = vpop.xlane.xlu0 %1940  ;;  %v2295_v0 = vmax.f32 %v2263_v56, 0.0  ;;  %v2233_v41 = vsub.f32 %v1737_v1, %v4139_v35  ;;  %2944 = vrsqrt.f32 %v4447_v48  ;;  %v1554_v35 = vsel %vm1553_vm5, %v4182_v18, %v4373_v53 }
 0x1db   :  { %v1755_v29 = vsel %vm1754_vm2, %v4419_v2, %v1753_v27  ;;  %v2384_v21 = vrot.slane %v2294_v55, %v3965_v36  ;;  %v1575_v23 = vsel %vm1574_vm7, %v4215_v45, %v1573_v10  ;;  %v1566_v2 = vmul.f32 %v4397_v8, %v4217_v6 }
 0x1dc   :  { %v2388_v1 = vrot.slane %v2295_v0, %v3971_v39  ;;  %v1758_v24 = vsel %vm1756_vm3, %v1757_v7, %v1755_v29  ;;  %v1580_v27 = vmul.f32 %v4427_v3, %v4258_v14  ;;  %v5788_v0 = vand.u32 2147483648, %v4148_v46 }
 0x1dd   :  { %v2236_v5 = vsub.f32 %v1758_v24, %v4152_v17  ;;  %v4535_v34 = vpop.xlane.xlu1 %1646  ;;  %v1746_v8 = vmul.f32 %v2943_v15, %v4421_v28  ;;  %2946 = vrsqrt.f32 %v4449_v20  ;;  %v5790_v17 = vand.u32 2147483648, %v4180_v26 }
 0x1de   :  { %v4537_v53 = vpop.xlane.xlu0 %1948  ;;  %v4544_v19 = vsel %vm1541_vm8, %v5788_v0, %v4365_v47  ;;  %v4547_v4 = vsel %vm5674_vm13, %v2388_v1, %v2384_v21  ;;  %v5791_v55 = vand.u32 2147483648, %v4182_v18  ;;  %vm1747_vm4 = vcmp.eq.f32.partialorder %v4421_v28, inf }
 0x1df   :  { %5789 = vst [vmem:[#allocation39_spill] sm:$0xff] %v4547_v4  ;;  %v4555_v3 = vsel %vm1562_vm10, %v5790_v17, %v1561_v58  ;;  %v1750_v47 = vand.u32 2147483648, %v4421_v28  ;;  %v5792_v56 = vand.u32 2147483648, %v4215_v45  ;;  %v1748_v26 = vsel %vm1747_vm4, %v4421_v28, %v1746_v8 }
 0x1e0   :  { %v4561_v46 = vsel %vm1555_vm11, %v5791_v55, %v1554_v35  ;;  %vm1749_vm5 = vcmp.eq.f32.partialorder %v4421_v28, 0.0  ;;  %2948 = vrsqrt.f32 %v4479_v59  ;;  %v4577_v18 = vsel %vm1567_vm0, %v4217_v6, %v1566_v2 }
 0x1e1   :  { %v4569_v25 = vsel %vm1576_vm12, %v5792_v56, %v1575_v23  ;;  %v4582_v13 = vsel %vm1581_vm1, %v4258_v14, %v1580_v27  ;;  %v5793_v45 = vsub.f32 %v4406_v43, %v4044_v52  ;;  %v1751_v7 = vsel %vm1749_vm5, %v1750_v47, %v1748_v26  ;;  %v4589_v58 = vpop.xlane.xlu1 %1652 }
 0x1e2   :  { %v4591_v28 = vpop.xlane.xlu0 %1650  ;;  %v5794_v29 = vsub.f32 %v4443_v57, %v4084_v37  ;;  %v5795_v21 = vsub.f32 %v4467_v60, %v4100_v31  ;;  %v2235_v24 = vsub.f32 %v1751_v7, %v4175_v12  ;;  %2950 = vrsqrt.f32 %v4481_v16 }
 0x1e3   :  { %v4587_v10 = vadd.f32 0.5, %v5793_v45  ;;  %v4605_v52 = vadd.f32 0.5, %v2234_v62  ;;  %v4607_v43 = vadd.f32 0.5, %v2233_v41  ;;  %vm1768_vm6 = vcmp.eq.f32.partialorder %v4447_v48, inf }
 0x1e4   :  { %v4596_v35 = vadd.f32 0.5, %v5794_v29  ;;  %v4601_v1 = vadd.f32 0.5, %v5795_v21  ;;  %2952 = vrsqrt.f32 %v4507_v33  ;;  %v4611_v37 = vadd.f32 0.5, %v2236_v5  ;;  %v2945_v57 = vpop.eup %2944 }
 0x1e5   :  { %vm1770_vm7 = vcmp.eq.f32.partialorder %v4447_v48, 0.0  ;;  %v1771_v31 = vand.u32 2147483648, %v4447_v48  ;;  %vm1761_vm8 = vcmp.eq.f32.partialorder %v4449_v20, inf  ;;  %vm1763_vm9 = vcmp.eq.f32.partialorder %v4449_v20, 0.0  ;;  %v4620_v60 = vpop.xlane.xlu1 %1950 }
 0x1e6   :  { %v1764_v12 = vand.u32 2147483648, %v4449_v20  ;;  %vm2004_vm10 = vcmp.eq.f32.partialorder %v4479_v59, inf  ;;  %2954 = vrsqrt.f32 %v4509_v9  ;;  %v4622_v62 = vpop.xlane.xlu0 %1942  ;;  %v1767_v41 = vmul.f32 %v2945_v57, %v4447_v48 }
 0x1e7   :  { %vm2006_vm11 = vcmp.eq.f32.partialorder %v4479_v59, 0.0  ;;  %v2007_v15 = vand.u32 2147483648, %v4479_v59  ;;  %2956 = vrsqrt.f32 %v4535_v34  ;;  %vm1775_vm12 = vcmp.eq.f32.partialorder %v4481_v16, inf  ;;  %v2947_v2 = vpop.eup %2946 }
 0x1e8   :  { %vm1777_vm14 = vcmp.eq.f32.partialorder %v4481_v16, 0.0  ;;  %v1778_v23 = vand.u32 2147483648, %v4481_v16  ;;  %2958 = vrsqrt.f32 %v4537_v53  ;;  %v4632_v27 = vadd.f32 0.5, %v2235_v24 }
 0x1e9   :  { %v1769_v5 = vsel %vm1768_vm6, %v4447_v48, %v1767_v41  ;;  %vm2032_vm15 = vcmp.eq.f32.partialorder %v4507_v33, inf  ;;  %vm2034_vm0 = vcmp.eq.f32.partialorder %v4507_v33, 0.0  ;;  %v1760_v8 = vmul.f32 %v2947_v2, %v4449_v20  ;;  %v4644_v55 = vpop.xlane.xlu1 %1956 }
 0x1ea   :  { %v1772_v0 = vsel %vm1770_vm7, %v1771_v31, %v1769_v5  ;;  %v2035_v17 = vand.u32 2147483648, %v4507_v33  ;;  %2960 = vrsqrt.f32 %v4589_v58  ;;  %v4646_v47 = vpop.xlane.xlu0 %1954  ;;  %v2949_v56 = vpop.eup %2948  ;;  %vm2011_vm1 = vcmp.eq.f32.partialorder %v4509_v9, inf }
 0x1eb   :  { %v2238_v26 = vsub.f32 %v1772_v0, %v4186_v11  ;;  %vm2013_vm2 = vcmp.eq.f32.partialorder %v4509_v9, 0.0  ;;  %2962 = vrsqrt.f32 %v4591_v28  ;;  %v1762_v48 = vsel %vm1761_vm8, %v4449_v20, %v1760_v8 }
 0x1ec   :  { %v2003_v45 = vmul.f32 %v2949_v56, %v4479_v59  ;;  %v2014_v7 = vand.u32 2147483648, %v4509_v9  ;;  %vm1782_vm3 = vcmp.eq.f32.partialorder %v4535_v34, inf  ;;  %v2951_v29 = vpop.eup %2950  ;;  %v1765_v11 = vsel %vm1763_vm9, %v1764_v12, %v1762_v48 }
 0x1ed   :  { %vm1784_vm4 = vcmp.eq.f32.partialorder %v4535_v34, 0.0  ;;  %v1785_v21 = vand.u32 2147483648, %v4535_v34  ;;  %2964 = vrsqrt.f32 %v4620_v60  ;;  %v2237_v31 = vsub.f32 %v1765_v11, %v4193_v30  ;;  %v4669_v2 = vpop.xlane.xlu1 %1654 }
 0x1ee   :  { %v2953_v24 = vpop.eup %2952  ;;  %v2005_v57 = vsel %vm2004_vm10, %v4479_v59, %v2003_v45  ;;  %v1774_v41 = vmul.f32 %v2951_v29, %v4481_v16  ;;  %vm2039_vm5 = vcmp.eq.f32.partialorder %v4537_v53, inf  ;;  %v4671_v20 = vpop.xlane.xlu0 %1648  ;;  %vm2041_vm6 = vcmp.eq.f32.partialorder %v4537_v53, 0.0 }
 0x1ef   :  { %v2008_v12 = vsel %vm2006_vm11, %v2007_v15, %v2005_v57  ;;  %v2031_v5 = vmul.f32 %v2953_v24, %v4507_v33  ;;  %v2042_v30 = vand.u32 2147483648, %v4537_v53  ;;  %vm1803_vm7 = vcmp.eq.f32.partialorder %v4589_v58, inf }
 0x1f0   :  { %v2955_v0 = vpop.eup %2954  ;;  %v1776_v8 = vsel %vm1775_vm12, %v4481_v16, %v1774_v41  ;;  %vm1805_vm8 = vcmp.eq.f32.partialorder %v4589_v58, 0.0  ;;  %v1806_v56 = vand.u32 2147483648, %v4589_v58  ;;  %v2818_v59 = vadd.f32 -2.0, %v2008_v12 }
 0x1f1   :  { %v2957_v48 = vpop.eup %2956  ;;  %v4686_v15 = vsel %vm1777_vm14, %v1778_v23, %v1776_v8  ;;  %v2033_v45 = vsel %vm2032_vm15, %v4507_v33, %v2031_v5  ;;  %v2010_v29 = vmul.f32 %v2955_v0, %v4509_v9  ;;  %vm1796_vm9 = vcmp.eq.f32.partialorder %v4591_v28, inf  ;;  %v4700_v16 = vpop.xlane.xlu1 %1660 }
 0x1f2   :  { %v2959_v11 = vpop.eup %2958  ;;  %v4693_v24 = vadd.f32 0.5, %v2238_v26  ;;  %v2036_v41 = vsel %vm2034_vm0, %v2035_v17, %v2033_v45  ;;  %vm1798_vm10 = vcmp.eq.f32.partialorder %v4591_v28, 0.0  ;;  %v4702_v23 = vpop.xlane.xlu0 %1658  ;;  %v1781_v26 = vmul.f32 %v2957_v48, %v4535_v34 }
 0x1f3   :  { %v2822_v12 = vadd.f32 -2.0, %v2036_v41  ;;  %v2012_v5 = vsel %vm2011_vm1, %v4509_v9, %v2010_v29  ;;  %v2038_v0 = vmul.f32 %v2959_v11, %v4537_v53  ;;  %v1799_v17 = vand.u32 2147483648, %v4591_v28 }
 0x1f4   :  { %v2961_v8 = vpop.eup %2960  ;;  %v2015_v33 = vsel %vm2013_vm2, %v2014_v7, %v2012_v5  ;;  %vm2046_vm11 = vcmp.eq.f32.partialorder %v4620_v60, inf  ;;  %vm2048_vm12 = vcmp.eq.f32.partialorder %v4620_v60, 0.0  ;;  %v2563_v41 = vmax.f32 %v2818_v59, 0.0 }
 0x1f5   :  { %v2963_v45 = vpop.eup %2962  ;;  %v2819_v57 = vadd.f32 -2.0, %v2015_v33  ;;  %v1783_v29 = vsel %vm1782_vm3, %v4535_v34, %v1781_v26  ;;  %v2040_v48 = vsel %vm2039_vm5, %v4537_v53, %v2038_v0  ;;  %vm1569_vm14 = vcmp.eq.f32.partialorder %v4217_v6, 0.0  ;;  %v4730_v5 = vpop.xlane.xlu1 %1952 }
 0x1f6   :  { %v4721_v9 = vadd.f32 0.5, %v2237_v31  ;;  %v4725_v7 = vsel %vm1784_vm4, %v1785_v21, %v1783_v29  ;;  %v2043_v59 = vsel %vm2041_vm6, %v2042_v30, %v2040_v48  ;;  %v1802_v11 = vmul.f32 %v2961_v8, %v4589_v58  ;;  %v4732_v26 = vpop.xlane.xlu0 %1944 }
 0x1f7   :  { %v2965_v33 = vpop.eup %2964  ;;  %vm1583_vm15 = vcmp.eq.f32.partialorder %v4258_v14, 0.0  ;;  %v2567_v0 = vmax.f32 %v2822_v12, 0.0  ;;  %v2564_v4 = vmax.f32 %v2819_v57, 0.0  ;;  %v2240_v31 = vsub.f32 %v4725_v7, %v4223_v22 }
 0x1f8   :  { %v2823_v34 = vadd.f32 -2.0, %v2043_v59  ;;  %v1804_v53 = vsel %vm1803_vm7, %v4589_v58, %v1802_v11  ;;  %v1795_v21 = vmul.f32 %v2963_v45, %v4591_v28  ;;  %v2045_v30 = vmul.f32 %v2965_v33, %v4620_v60 }
 0x1f9   :  { %v2049_v8 = vand.u32 2147483648, %v4620_v60  ;;  %v2630_v29 = vrot.slane %v2563_v41, %v3965_v36  ;;  %v2634_v48 = vrot.slane %v2564_v4, %v3971_v39  ;;  %v4747_v57 = vsel %vm1805_vm8, %v1806_v56, %v1804_v53  ;;  %v4758_v4 = vpop.xlane.xlu1 %1962 }
 0x1fa   :  { %v2568_v12 = vmax.f32 %v2823_v34, 0.0  ;;  %v1797_v45 = vsel %vm1796_vm9, %v4591_v28, %v1795_v21  ;;  %vm5675_vm0 = vcmask 195712   ;;  %v2047_v7 = vsel %vm2046_vm11, %v4620_v60, %v2045_v30  ;;  %v4760_v41 = vpop.xlane.xlu0 %1958 }
 0x1fb   :  { %2966 = vrsqrt.f32 %v4622_v62  ;;  %v2649_v58 = vrot.slane %v2567_v0, %v3965_v36  ;;  %v4764_v56 = vsel %vm5674_vm13, %v2634_v48, %v2630_v29  ;;  %v4769_v11 = vsel %vm1798_vm10, %v1799_v17, %v1797_v45 }
 0x1fc   :  { %v2653_v59 = vrot.slane %v2568_v12, %v3971_v39  ;;  %v2292_v33 = vmax.f32 %v4587_v10, 0.0  ;;  %v2293_v34 = vmax.f32 %v4596_v35, 0.0  ;;  %v2050_v21 = vsel %vm2048_vm12, %v2049_v8, %v2047_v7 }
 0x1fd   :  { %v2296_v0 = vmax.f32 %v4601_v1, 0.0  ;;  %v2298_v30 = vmax.f32 %v4605_v52, 0.0  ;;  %v2824_v48 = vadd.f32 -2.0, %v2050_v21  ;;  %v2297_v28 = vmax.f32 %v4607_v43, 0.0  ;;  %v4784_v35 = vpop.xlane.xlu1 %1656 }
 0x1fe   :  { %v2654_v29 = vsel %vm5674_vm13, %v2653_v59, %v2649_v58  ;;  %v2300_v17 = vmax.f32 %v4611_v37, 0.0  ;;  %v2299_v10 = vmax.f32 %v4632_v27, 0.0  ;;  %2968 = vrsqrt.f32 %v4644_v55 }
 0x1ff   :  { %v5796_v60 = vand.u32 2147483648, %v4217_v6  ;;  %v2302_v52 = vmax.f32 %v4693_v24, 0.0  ;;  %v2301_v8 = vmax.f32 %v4721_v9, 0.0  ;;  %v2569_v43 = vmax.f32 %v2824_v48, 0.0  ;;  %v4811_v24 = vpop.xlane.xlu0 %1964 }
 0x200   :  { %v5797_v37 = vand.u32 2147483648, %v4258_v14  ;;  %v4803_v12 = vrot.slane %v2292_v33, %v3968_v40  ;;  %v5798_v6 = vsub.f32 %v4686_v15, %v4227_v38  ;;  %2970 = vrsqrt.f32 %v4646_v47 }
 0x201   :  { %v4791_v1 = vsel %vm1569_vm14, %v5796_v60, %v4577_v18  ;;  %v4814_v9 = vrot.slane %v2293_v34, %v3981_v49  ;;  %v4817_v45 = vrot.slane %v2296_v0, %v3968_v40  ;;  %v2658_v14 = vrot.slane %v2569_v43, %v3968_v40  ;;  %v4833_v58 = vpop.xlane.xlu1 %1666 }
 0x202   :  { %v4800_v27 = vsel %vm1583_vm15, %v5797_v37, %v4582_v13  ;;  %v4808_v18 = vadd.f32 0.5, %v5798_v6  ;;  %2972 = vrsqrt.f32 %v4669_v2  ;;  %v4822_v13 = vrot.slane %v2298_v30, %v3965_v36 }
 0x203   :  { %v4825_v38 = vrot.slane %v2297_v28, %v3981_v49  ;;  %v4828_v15 = vrot.slane %v2300_v17, %v3968_v40  ;;  %v4831_v7 = vrot.slane %v2299_v10, %v3971_v39  ;;  %v4836_v59 = vrot.slane %v2302_v52, %v3965_v36 }
 0x204   :  { %v4839_v33 = vrot.slane %v2301_v8, %v3981_v49  ;;  %v4842_v34 = vsel %vm5675_vm0, %v2658_v14, %v2654_v29  ;;  %2974 = vrsqrt.f32 %v4671_v20  ;;  %v4846_v30 = vadd.f32 0.5, %v2240_v31  ;;  %v4858_v31 = vpop.xlane.xlu0 %1662 }
 0x205   :  { %5799 = vst [vmem:[#allocation40_spill] sm:$0xff] %v4828_v15  ;;  %5800 = vst [vmem:[#allocation46_spill] sm:$0xff] %v4836_v59  ;;  %v2967_v21 = vpop.eup %2966  ;;  %vm2018_vm1 = vcmp.eq.f32.partialorder %v4622_v62, inf  ;;  %2976 = vrsqrt.f32 %v4700_v16  ;;  %vm2020_vm2 = vcmp.eq.f32.partialorder %v4622_v62, 0.0  ;;  %v2021_v28 = vand.u32 2147483648, %v4622_v62  ;;  %v4867_v8 = vpop.xlane.xlu1 %1960 }
 0x206   :  { %5801 = vst [vmem:[#allocation47_spill] sm:$0xff] %v4839_v33  ;;  %5802 = vst [vmem:[#allocation52_spill] sm:$0xff] %v4842_v34  ;;  %v2017_v48 = vmul.f32 %v2967_v21, %v4622_v62  ;;  %2978 = vrsqrt.f32 %v4702_v23  ;;  %vm2067_vm3 = vcmp.eq.f32.partialorder %v4644_v55, inf  ;;  %vm2069_vm4 = vcmp.eq.f32.partialorder %v4644_v55, 0.0 }
 0x207   :  { %v2070_v29 = vand.u32 2147483648, %v4644_v55  ;;  %2980 = vrsqrt.f32 %v4730_v5  ;;  %vm2060_vm5 = vcmp.eq.f32.partialorder %v4646_v47, inf  ;;  %vm2062_vm6 = vcmp.eq.f32.partialorder %v4646_v47, 0.0 }
 0x208   :  { %v2019_v17 = vsel %vm2018_vm1, %v4622_v62, %v2017_v48  ;;  %v2063_v10 = vand.u32 2147483648, %v4646_v47  ;;  %v2969_v60 = vpop.eup %2968  ;;  %vm1810_vm7 = vcmp.eq.f32.partialorder %v4669_v2, inf  ;;  %vm1812_vm8 = vcmp.eq.f32.partialorder %v4669_v2, 0.0  ;;  %v4886_v22 = vpop.xlane.xlu0 %1668 }
 0x209   :  { %v2022_v52 = vsel %vm2020_vm2, %v2021_v28, %v2019_v17  ;;  %2982 = vrsqrt.f32 %v4732_v26  ;;  %v2066_v37 = vmul.f32 %v2969_v60, %v4644_v55  ;;  %v1813_v62 = vand.u32 2147483648, %v4669_v2 }
 0x20a   :  { %v2820_v43 = vadd.f32 -2.0, %v2022_v52  ;;  %2984 = vrsqrt.f32 %v4758_v4  ;;  %v2971_v6 = vpop.eup %2970  ;;  %vm1789_vm9 = vcmp.eq.f32.partialorder %v4671_v20, inf  ;;  %vm1791_vm10 = vcmp.eq.f32.partialorder %v4671_v20, 0.0 }
 0x20b   :  { %v1792_v14 = vand.u32 2147483648, %v4671_v20  ;;  %2986 = vrsqrt.f32 %v4760_v41  ;;  %v2068_v28 = vsel %vm2067_vm3, %v4644_v55, %v2066_v37  ;;  %v2059_v17 = vmul.f32 %v2971_v6, %v4646_v47 }
 0x20c   :  { %v2973_v21 = vpop.eup %2972  ;;  %v2565_v48 = vmax.f32 %v2820_v43, 0.0  ;;  %vm1831_vm11 = vcmp.eq.f32.partialorder %v4700_v16, inf  ;;  %v2071_v60 = vsel %vm2069_vm4, %v2070_v29, %v2068_v28  ;;  %vm1833_vm12 = vcmp.eq.f32.partialorder %v4700_v16, 0.0 }
 0x20d   :  { %v1809_v52 = vmul.f32 %v2973_v21, %v4669_v2  ;;  %v1834_v53 = vand.u32 2147483648, %v4700_v16  ;;  %v2827_v34 = vadd.f32 -2.0, %v2071_v60  ;;  %v2061_v37 = vsel %vm2060_vm5, %v4646_v47, %v2059_v17 }
 0x20e   :  { %v2975_v43 = vpop.eup %2974  ;;  %v2639_v0 = vrot.slane %v2565_v48, %v3968_v40  ;;  %vm1824_vm14 = vcmp.eq.f32.partialorder %v4702_v23, inf  ;;  %v2064_v29 = vsel %vm2062_vm6, %v2063_v10, %v2061_v37  ;;  %2988 = vrsqrt.f32 %v4784_v35  ;;  %v4900_v48 = vpop.xlane.xlu1 %1970 }
 0x20f   :  { %v2977_v55 = vpop.eup %2976  ;;  %v1811_v6 = vsel %vm1810_vm7, %v4669_v2, %v1809_v52  ;;  %v1788_v21 = vmul.f32 %v2975_v43, %v4671_v20  ;;  %v2572_v60 = vmax.f32 %v2827_v34, 0.0  ;;  %v2826_v33 = vadd.f32 -2.0, %v2064_v29  ;;  %v4926_v29 = vpop.xlane.xlu0 %1966 }
 0x210   :  { %v2979_v28 = vpop.eup %2978  ;;  %v4904_v17 = vsel %vm5675_vm0, %v2639_v0, %v4764_v56  ;;  %v1814_v47 = vsel %vm1812_vm8, %v1813_v62, %v1811_v6  ;;  %v1830_v43 = vmul.f32 %v2977_v55, %v4700_v16  ;;  %v1827_v2 = vand.u32 2147483648, %v4702_v23 }
 0x211   :  { %5803 = vst [vmem:[#allocation51_spill] sm:$0xff] %v4904_v17  ;;  %v2981_v10 = vpop.eup %2980  ;;  %v2244_v37 = vsub.f32 %v1814_v47, %v4267_v44  ;;  %v1790_v52 = vsel %vm1789_vm9, %v4671_v20, %v1788_v21  ;;  %v1823_v59 = vmul.f32 %v2979_v28, %v4702_v23  ;;  %v2672_v15 = vrot.slane %v2572_v60, %v3971_v39 }
 0x212   :  { %v2571_v56 = vmax.f32 %v2826_v33, 0.0  ;;  %v1793_v34 = vsel %vm1791_vm10, %v1792_v14, %v1790_v52  ;;  %v1832_v44 = vsel %vm1831_vm11, %v4700_v16, %v1830_v43  ;;  %vm1826_vm15 = vcmp.eq.f32.partialorder %v4702_v23, 0.0  ;;  %v4940_v52 = vpop.xlane.xlu1 %1664 }
 0x213   :  { %v2983_v0 = vpop.eup %2982  ;;  %v2241_v62 = vsub.f32 %v1793_v34, %v4242_v63  ;;  %v1825_v55 = vsel %vm1824_vm14, %v4702_v23, %v1823_v59  ;;  %v1835_v14 = vsel %vm1833_vm12, %v1834_v53, %v1832_v44  ;;  %v2052_v63 = vmul.f32 %v2981_v10, %v4730_v5 }
 0x214   :  { %v2985_v33 = vpop.eup %2984  ;;  %v2668_v20 = vrot.slane %v2571_v56, %v3965_v36  ;;  %v1828_v6 = vsel %vm1826_vm15, %v1827_v2, %v1825_v55  ;;  %v5804_v28 = vmax.f32 %v4808_v18, 0.0  ;;  %v2304_v59 = vmax.f32 %v4846_v30, 0.0 }
 0x215   :  { %v2987_v21 = vpop.eup %2986  ;;  %v2247_v23 = vsub.f32 %v1835_v14, %v4336_v51  ;;  %v2246_v47 = vsub.f32 %v1828_v6, %v4299_v50  ;;  %v5805_v16 = vsub.f32 %v4747_v57, %v4274_v32  ;;  %v2024_v43 = vmul.f32 %v2983_v0, %v4732_v26 }
 0x216   :  { %v4935_v60 = vrot.slane %v5804_v28, %v3971_v39  ;;  %v4946_v10 = vsel %vm5674_vm13, %v2672_v15, %v2668_v20  ;;  %v2087_v18 = vmul.f32 %v2985_v33, %v4758_v4  ;;  %v5807_v30 = vsub.f32 %v4769_v11, %v4234_v54  ;;  %v4964_v11 = vpop.xlane.xlu0 %1972  ;;  %v4975_v33 = vpop.xlane.xlu1 %1674 }
 0x217   :  { %v2275_v53 = vadd.f32 0.5, %v5805_v16  ;;  %5806 = vst [vmem:[#allocation55_spill] sm:$0xff] %v4946_v10  ;;  %vm2053_vm1 = vcmp.eq.f32.partialorder %v4730_v5, inf  ;;  %vm2055_vm2 = vcmp.eq.f32.partialorder %v4730_v5, 0.0  ;;  %v2056_v50 = vand.u32 2147483648, %v4730_v5 }
 0x218   :  { %v2274_v56 = vadd.f32 0.5, %v5807_v30  ;;  %v2054_v32 = vsel %vm2053_vm1, %v4730_v5, %v2052_v63  ;;  %vm2025_vm3 = vcmp.eq.f32.partialorder %v4732_v26, inf  ;;  %vm2088_vm4 = vcmp.eq.f32.partialorder %v4758_v4, inf  ;;  %v2989_v57 = vpop.eup %2988 }
 0x219   :  { %v2073_v51 = vmul.f32 %v2987_v21, %v4760_v41  ;;  %v2026_v15 = vsel %vm2025_vm3, %v4732_v26, %v2024_v43  ;;  %vm2027_vm5 = vcmp.eq.f32.partialorder %v4732_v26, 0.0  ;;  %v2089_v54 = vsel %vm2088_vm4, %v4758_v4, %v2087_v18 }
 0x21a   :  { %vm2074_vm6 = vcmp.eq.f32.partialorder %v4760_v41, inf  ;;  %v2028_v34 = vand.u32 2147483648, %v4732_v26  ;;  %vm2090_vm7 = vcmp.eq.f32.partialorder %v4758_v4, 0.0  ;;  %v2091_v2 = vand.u32 2147483648, %v4758_v4 }
 0x21b   :  { %v2075_v0 = vsel %vm2074_vm6, %v4760_v41, %v2073_v51  ;;  %v2057_v44 = vsel %vm2055_vm2, %v2056_v50, %v2054_v32  ;;  %vm2076_vm8 = vcmp.eq.f32.partialorder %v4760_v41, 0.0  ;;  %v2077_v55 = vand.u32 2147483648, %v4760_v41 }
 0x21c   :  { %vm1817_vm9 = vcmp.eq.f32.partialorder %v4784_v35, inf  ;;  %v2276_v20 = vadd.f32 0.5, %v2244_v37  ;;  %v2029_v14 = vsel %vm2027_vm5, %v2028_v34, %v2026_v15  ;;  %v2092_v26 = vsel %vm2090_vm7, %v2091_v2, %v2089_v54  ;;  %v4982_v37 = vpop.xlane.xlu0 %1670 }
 0x21d   :  { %v1816_v6 = vmul.f32 %v2989_v57, %v4784_v35  ;;  %v2273_v63 = vadd.f32 0.5, %v2241_v62  ;;  %v2279_v4 = vadd.f32 0.5, %v2247_v23  ;;  %v2078_v21 = vsel %vm2076_vm8, %v2077_v55, %v2075_v0 }
 0x21e   :  { %2990 = vrsqrt.f32 %v4811_v24  ;;  %v2307_v5 = vmax.f32 %v2275_v53, 0.0  ;;  %v2278_v28 = vadd.f32 0.5, %v2246_v47  ;;  %v2825_v16 = vadd.f32 -2.0, %v2057_v44  ;;  %v4986_v47 = vpop.xlane.xlu1 %1968 }
 0x21f   :  { %v1818_v43 = vsel %vm1817_vm9, %v4784_v35, %v1816_v6  ;;  %v2821_v41 = vadd.f32 -2.0, %v2029_v14  ;;  %v2830_v18 = vadd.f32 -2.0, %v2092_v26  ;;  %v1820_v30 = vand.u32 2147483648, %v4784_v35 }
 0x220   :  { %2992 = vrsqrt.f32 %v4833_v58  ;;  %v2306_v50 = vmax.f32 %v2274_v56, 0.0  ;;  %v2308_v32 = vmax.f32 %v2276_v20, 0.0  ;;  %v2828_v62 = vadd.f32 -2.0, %v2078_v21  ;;  %v5011_v14 = vpop.xlane.xlu0 %1676 }
 0x221   :  { %vm1819_vm10 = vcmp.eq.f32.partialorder %v4784_v35, 0.0  ;;  %v2305_v23 = vmax.f32 %v2273_v63, 0.0  ;;  %v2311_v51 = vmax.f32 %v2279_v4, 0.0  ;;  %2994 = vrsqrt.f32 %v4858_v31 }
 0x222   :  { %v1821_v53 = vsel %vm1819_vm10, %v1820_v30, %v1818_v43  ;;  %v4989_v57 = vrot.slane %v2304_v59, %v3968_v40  ;;  %v2310_v15 = vmax.f32 %v2278_v28, 0.0  ;;  %v2570_v54 = vmax.f32 %v2825_v16, 0.0  ;;  %v5029_v21 = vpop.xlane.xlu1 %1978 }
 0x223   :  { %2996 = vrsqrt.f32 %v4867_v8  ;;  %v4993_v56 = vrot.slane %v2307_v5, %v3971_v39  ;;  %v2566_v34 = vmax.f32 %v2821_v41, 0.0  ;;  %v2575_v2 = vmax.f32 %v2830_v18, 0.0 }
 0x224   :  { %2998 = vrsqrt.f32 %v4886_v22  ;;  %v4997_v35 = vrot.slane %v2306_v50, %v3965_v36  ;;  %v2573_v0 = vmax.f32 %v2828_v62, 0.0  ;;  %v2245_v44 = vsub.f32 %v1821_v53, %v4306_v61 }
 0x225   :  { %3000 = vrsqrt.f32 %v4900_v48  ;;  %v5002_v59 = vrot.slane %v2308_v32, %v3968_v40  ;;  %v5005_v55 = vrot.slane %v2305_v23, %v3981_v49  ;;  %v5008_v20 = vrot.slane %v2311_v51, %v3971_v39  ;;  %v5050_v23 = vpop.xlane.xlu0 %1974 }
 0x226   :  { %3002 = vrsqrt.f32 %v4926_v29  ;;  %v5014_v26 = vrot.slane %v2310_v15, %v3965_v36  ;;  %v5017_v61 = vrot.slane %v2570_v54, %v3981_v49  ;;  %vm2095_vm11 = vcmp.eq.f32.partialorder %v4811_v24, inf }
 0x227   :  { %5808 = vst [vmem:[#allocation54_spill] sm:$0xff] %v5005_v55  ;;  %5809 = vst [vmem:[#allocation18_spill] sm:$0xff] %v5008_v20  ;;  %3004 = vrsqrt.f32 %v4940_v52  ;;  %v5022_v63 = vrot.slane %v2566_v34, %v3981_v49  ;;  %v5025_v4 = vrot.slane %v2575_v2, %v3965_v36  ;;  %vm2097_vm12 = vcmp.eq.f32.partialorder %v4811_v24, 0.0 }
 0x228   :  { %5810 = vst [vmem:[#allocation20_spill] sm:$0xff] %v5014_v26  ;;  %5811 = vst [vmem:[#allocation57_spill] sm:$0xff] %v5017_v61  ;;  %v2991_v6 = vpop.eup %2990  ;;  %3006 = vrsqrt.f32 %v4964_v11  ;;  %v5032_v5 = vrot.slane %v2573_v0, %v3968_v40  ;;  %v5034_v28 = vadd.f32 0.5, %v2245_v44  ;;  %v2098_v16 = vand.u32 2147483648, %v4811_v24  ;;  %v5063_v44 = vpop.xlane.xlu1 %1672 }
 0x229   :  { %5812 = vst [vmem:[#allocation56_spill] sm:$0xff] %v5022_v63  ;;  %5813 = vst [vmem:[#allocation19_spill] sm:$0xff] %v5025_v4  ;;  %vm1852_vm14 = vcmp.eq.f32.partialorder %v4833_v58, inf  ;;  %v2094_v41 = vmul.f32 %v2991_v6, %v4811_v24  ;;  %vm1854_vm15 = vcmp.eq.f32.partialorder %v4833_v58, 0.0  ;;  %v1855_v18 = vand.u32 2147483648, %v4833_v58  ;;  %v5091_v26 = vpop.xlane.xlu0 %1980 }
 0x22a   :  { %5814 = vst [vmem:[#allocation48_spill] sm:$0xff] %v5032_v5  ;;  %5815 = vst [vmem:[#allocation22_spill] sm:$0xff] %v5034_v28  ;;  %v2993_v43 = vpop.eup %2992  ;;  %3008 = vrsqrt.f32 %v4975_v33  ;;  %vm1838_vm1 = vcmp.eq.f32.partialorder %v4858_v31, inf  ;;  %vm1840_vm2 = vcmp.eq.f32.partialorder %v4858_v31, 0.0  ;;  %v1841_v30 = vand.u32 2147483648, %v4858_v31 }
 0x22b   :  { %3010 = vrsqrt.f32 %v4982_v37  ;;  %v2995_v50 = vpop.eup %2994  ;;  %v1851_v32 = vmul.f32 %v2993_v43, %v4833_v58  ;;  %vm2081_vm3 = vcmp.eq.f32.partialorder %v4867_v8, inf  ;;  %v2084_v62 = vand.u32 2147483648, %v4867_v8 }
 0x22c   :  { %vm1859_vm4 = vcmp.eq.f32.partialorder %v4886_v22, inf  ;;  %v1837_v15 = vmul.f32 %v2995_v50, %v4858_v31  ;;  %vm2083_vm5 = vcmp.eq.f32.partialorder %v4867_v8, 0.0  ;;  %v1862_v54 = vand.u32 2147483648, %v4886_v22 }
 0x22d   :  { %v2997_v51 = vpop.eup %2996  ;;  %vm2116_vm6 = vcmp.eq.f32.partialorder %v4900_v48, inf  ;;  %v2096_v2 = vsel %vm2095_vm11, %v4811_v24, %v2094_v41  ;;  %v2119_v0 = vand.u32 2147483648, %v4900_v48  ;;  %vm2102_vm7 = vcmp.eq.f32.partialorder %v4926_v29, inf }
 0x22e   :  { %v2999_v34 = vpop.eup %2998  ;;  %3012 = vrsqrt.f32 %v4986_v47  ;;  %v2080_v43 = vmul.f32 %v2997_v51, %v4867_v8  ;;  %vm1861_vm8 = vcmp.eq.f32.partialorder %v4886_v22, 0.0  ;;  %vm2118_vm9 = vcmp.eq.f32.partialorder %v4900_v48, 0.0 }
 0x22f   :  { %v3001_v6 = vpop.eup %3000  ;;  %v2105_v50 = vand.u32 2147483648, %v4926_v29  ;;  %vm1845_vm10 = vcmp.eq.f32.partialorder %v4940_v52, inf  ;;  %v1848_v41 = vand.u32 2147483648, %v4940_v52  ;;  %v1853_v4 = vsel %vm1852_vm14, %v4833_v58, %v1851_v32  ;;  %v5106_v58 = vpop.xlane.xlu1 %1976 }
 0x230   :  { %v3003_v53 = vpop.eup %3002  ;;  %v1839_v5 = vsel %vm1838_vm1, %v4858_v31, %v1837_v15  ;;  %vm2104_vm11 = vcmp.eq.f32.partialorder %v4926_v29, 0.0  ;;  %vm2123_vm0 = vcmp.eq.f32.partialorder %v4964_v11, inf  ;;  %3014 = vrsqrt.f32 %v5011_v14 }
 0x231   :  { %v3005_v51 = vpop.eup %3004  ;;  %v2099_v10 = vsel %vm2097_vm12, %v2098_v16, %v2096_v2  ;;  %v1858_v61 = vmul.f32 %v2999_v34, %v4886_v22  ;;  %v2115_v32 = vmul.f32 %v3001_v6, %v4900_v48  ;;  %v2126_v15 = vand.u32 2147483648, %v4964_v11 }
 0x232   :  { %v3007_v63 = vpop.eup %3006  ;;  %v2101_v17 = vmul.f32 %v3003_v53, %v4926_v29  ;;  %vm1880_vm1 = vcmp.eq.f32.partialorder %v4975_v33, inf  ;;  %v1883_v20 = vand.u32 2147483648, %v4975_v33  ;;  %v1856_v24 = vsel %vm1854_vm15, %v1855_v18, %v1853_v4 }
 0x233   :  { %v1842_v16 = vsel %vm1840_vm2, %v1841_v30, %v1839_v5  ;;  %v2082_v34 = vsel %vm2081_vm3, %v4867_v8, %v2080_v43  ;;  %vm1866_vm12 = vcmp.eq.f32.partialorder %v4982_v37, inf  ;;  %v5101_v2 = vadd.f32 -2.0, %v2099_v10  ;;  %v5816_v43 = vld [vmem:[#allocation33_spill] sm:$0xff] }
 0x234   :  { %v3009_v53 = vpop.eup %3008  ;;  %vm1868_vm13 = vcmp.eq.f32.partialorder %v4982_v37, 0.0  ;;  %v1869_v6 = vand.u32 2147483648, %v4982_v37  ;;  %vm2109_vm14 = vcmp.eq.f32.partialorder %v4986_v47, inf  ;;  %v1860_v31 = vsel %vm1859_vm4, %v4886_v22, %v1858_v61 }
 0x235   :  { %v3011_v4 = vpop.eup %3010  ;;  %v2117_v5 = vsel %vm2116_vm6, %v4900_v48, %v2115_v32  ;;  %v1844_v10 = vmul.f32 %v3005_v51, %v4940_v52  ;;  %v2122_v18 = vmul.f32 %v3007_v63, %v4964_v11  ;;  %vm2111_vm15 = vcmp.eq.f32.partialorder %v4986_v47, 0.0 }
 0x236   :  { %v2250_v30 = vsub.f32 %v1856_v24, %v4340_v42  ;;  %v2248_v28 = vsub.f32 %v1842_v16, %v5816_v43  ;;  %v2085_v55 = vsel %vm2083_vm5, %v2084_v62, %v2082_v34  ;;  %v2103_v61 = vsel %vm2102_vm7, %v4926_v29, %v2101_v17  ;;  %v5138_v34 = vpop.xlane.xlu0 %1678 }
 0x237   :  { %v1846_v32 = vsel %vm1845_vm10, %v4940_v52, %v1844_v10  ;;  %v2124_v63 = vsel %vm2123_vm0, %v4964_v11, %v2122_v18  ;;  %v1879_v51 = vmul.f32 %v3009_v53, %v4975_v33  ;;  %v1865_v42 = vmul.f32 %v3011_v4, %v4982_v37 }
 0x238   :  { %v3013_v24 = vpop.eup %3012  ;;  %v2576_v8 = vmax.f32 %v5101_v2, 0.0  ;;  %v1863_v62 = vsel %vm1861_vm8, %v1862_v54, %v1860_v31  ;;  %v2120_v17 = vsel %vm2118_vm9, %v2119_v0, %v2117_v5  ;;  %v2112_v16 = vand.u32 2147483648, %v4986_v47 }
 0x239   :  { %v2106_v10 = vsel %vm2104_vm11, %v2105_v50, %v2103_v61  ;;  %vm5817_vm0 = vcmp.eq.f32.partialorder %v4940_v52, 0.0  ;;  %v1881_v2 = vsel %vm1880_vm1, %v4975_v33, %v1879_v51  ;;  %v1867_v22 = vsel %vm1866_vm12, %v4982_v37, %v1865_v42  ;;  %v5156_v52 = vpop.xlane.xlu1 %1986 }
 0x23a   :  { %v1849_v53 = vsel %vm5817_vm0, %v1848_v41, %v1846_v32  ;;  %v3015_v48 = vpop.eup %3014  ;;  %v5150_v54 = vadd.f32 0.5, %v2250_v30  ;;  %v2829_v0 = vadd.f32 -2.0, %v2085_v55  ;;  %vm5818_vm2 = vcmp.eq.f32.partialorder %v4964_v11, 0.0  ;;  %v5820_v55 = vld [vmem:[#allocation35_spill] sm:$0xff]  ;;  %v5176_v32 = vpop.xlane.xlu0 %1982 }
 0x23b   :  { %v2127_v4 = vsel %vm5818_vm2, %v2126_v15, %v2124_v63  ;;  %vm5819_vm3 = vcmp.eq.f32.partialorder %v4975_v33, 0.0  ;;  %v5158_v50 = vadd.f32 0.5, %v2248_v28  ;;  %v2251_v41 = vsub.f32 %v1863_v62, %v4544_v19  ;;  %v5821_v19 = vld [vmem:[#allocation53_spill] sm:$0xff] }
 0x23c   :  { %v1884_v29 = vsel %vm5819_vm3, %v1883_v20, %v1881_v2  ;;  %v1870_v31 = vsel %vm1868_vm13, %v1869_v6, %v1867_v22  ;;  %v2108_v5 = vmul.f32 %v3013_v24, %v4986_v47  ;;  %v2834_v18 = vadd.f32 -2.0, %v2120_v17 }
 0x23d   :  { %v2832_v30 = vadd.f32 -2.0, %v2106_v10  ;;  %v2249_v43 = vsub.f32 %v1849_v53, %v5820_v55  ;;  %v1886_v11 = vmul.f32 %v3015_v48, %v5011_v14  ;;  %v2835_v15 = vadd.f32 -2.0, %v2127_v4  ;;  %v5182_v17 = vpop.xlane.xlu1 %1680 }
 0x23e   :  { %v2254_v33 = vsub.f32 %v1884_v29, %v4555_v3  ;;  %v2110_v20 = vsel %vm2109_vm14, %v4986_v47, %v2108_v5  ;;  %vm1887_vm4 = vcmp.eq.f32.partialorder %v5011_v14, inf  ;;  %v2252_v37 = vsub.f32 %v1870_v31, %v5821_v19 }
 0x23f   :  { %v2113_v28 = vsel %vm2111_vm15, %v2112_v16, %v2110_v20  ;;  %v1888_v6 = vsel %vm1887_vm4, %v5011_v14, %v1886_v11  ;;  %v1890_v61 = vand.u32 2147483648, %v5011_v14  ;;  %v2574_v63 = vmax.f32 %v2829_v0, 0.0 }
 0x240   :  { %v5178_v51 = vadd.f32 0.5, %v2251_v41  ;;  %vm1889_vm13 = vcmp.eq.f32.partialorder %v5011_v14, 0.0  ;;  %3016 = vrsqrt.f32 %v5029_v21  ;;  %v2579_v3 = vmax.f32 %v2834_v18, 0.0 }
 0x241   :  { %v2577_v42 = vmax.f32 %v2832_v30, 0.0  ;;  %v2833_v24 = vadd.f32 -2.0, %v2113_v28  ;;  %v1891_v62 = vsel %vm1889_vm13, %v1890_v61, %v1888_v6  ;;  %v5184_v47 = vadd.f32 0.5, %v2249_v43  ;;  %v5222_v43 = vpop.xlane.xlu1 %1990 }
 0x242   :  { %v2580_v16 = vmax.f32 %v2835_v15, 0.0  ;;  %v5186_v10 = vadd.f32 0.5, %v2254_v33  ;;  %3018 = vrsqrt.f32 %v5050_v23  ;;  %v5190_v53 = vrot.slane %v2576_v8, %v3971_v39 }
 0x243   :  { %v5192_v2 = vadd.f32 0.5, %v2252_v37  ;;  %v2255_v14 = vsub.f32 %v1891_v62, %v4791_v1  ;;  %3020 = vrsqrt.f32 %v5063_v44  ;;  %v5199_v0 = vrot.slane %v2574_v63, %v3981_v49  ;;  %v5209_v1 = vpop.xlane.xlu0 %1988 }
 0x244   :  { %v5203_v29 = vrot.slane %v2579_v3, %v3965_v36  ;;  %v5206_v8 = vrot.slane %v2577_v42, %v3968_v40  ;;  %v2578_v41 = vmax.f32 %v2833_v24, 0.0  ;;  %3022 = vrsqrt.f32 %v5091_v26 }
 0x245   :  { %v5213_v5 = vrot.slane %v2580_v16, %v3971_v39  ;;  %3024 = vrsqrt.f32 %v5106_v58  ;;  %v5218_v55 = vadd.f32 0.5, %v2255_v14  ;;  %vm2144_vm5 = vcmp.eq.f32.partialorder %v5029_v21, inf  ;;  %v5257_v14 = vpop.xlane.xlu1 %1996 }
 0x246   :  { %3026 = vrsqrt.f32 %v5138_v34  ;;  %vm2146_vm6 = vcmp.eq.f32.partialorder %v5029_v21, 0.0  ;;  %v2147_v11 = vand.u32 2147483648, %v5029_v21  ;;  %vm2130_vm7 = vcmp.eq.f32.partialorder %v5050_v23, inf }
 0x247   :  { %3028 = vrsqrt.f32 %v5156_v52  ;;  %v5229_v15 = vrot.slane %v2578_v41, %v3981_v49  ;;  %vm2132_vm8 = vcmp.eq.f32.partialorder %v5050_v23, 0.0  ;;  %v2133_v33 = vand.u32 2147483648, %v5050_v23  ;;  %v5243_v61 = vpop.xlane.xlu0 %1984 }
 0x248   :  { %vm1873_vm9 = vcmp.eq.f32.partialorder %v5063_v44, inf  ;;  %3030 = vrsqrt.f32 %v5176_v32  ;;  %v1876_v19 = vand.u32 2147483648, %v5063_v44  ;;  %vm2151_vm10 = vcmp.eq.f32.partialorder %v5091_v26, inf }
 0x249   :  { %5822 = vst [vmem:[#allocation49_spill] sm:$0xff] %v5229_v15  ;;  %vm2153_vm11 = vcmp.eq.f32.partialorder %v5091_v26, 0.0  ;;  %3032 = vrsqrt.f32 %v5182_v17  ;;  %v2154_v6 = vand.u32 2147483648, %v5091_v26  ;;  %vm1875_vm14 = vcmp.eq.f32.partialorder %v5063_v44, 0.0 }
 0x24a   :  { %v3017_v20 = vpop.eup %3016  ;;  %3034 = vrsqrt.f32 %v5209_v1  ;;  %vm2137_vm1 = vcmp.eq.f32.partialorder %v5106_v58, inf  ;;  %vm2139_vm12 = vcmp.eq.f32.partialorder %v5106_v58, 0.0  ;;  %v2140_v3 = vand.u32 2147483648, %v5106_v58 }
 0x24b   :  { %v2143_v28 = vmul.f32 %v3017_v20, %v5029_v21  ;;  %vm1894_vm15 = vcmp.eq.f32.partialorder %v5138_v34, inf  ;;  %vm2172_vm0 = vcmp.eq.f32.partialorder %v5156_v52, inf  ;;  %3036 = vrsqrt.f32 %v5222_v43 }
 0x24c   :  { %v3019_v63 = vpop.eup %3018  ;;  %vm2174_vm2 = vcmp.eq.f32.partialorder %v5156_v52, 0.0  ;;  %v2175_v37 = vand.u32 2147483648, %v5156_v52  ;;  %3038 = vrsqrt.f32 %v5243_v61  ;;  %vm2158_vm3 = vcmp.eq.f32.partialorder %v5176_v32, inf }
 0x24d   :  { %v3021_v24 = vpop.eup %3020  ;;  %v2145_v62 = vsel %vm2144_vm5, %v5029_v21, %v2143_v28  ;;  %v2129_v16 = vmul.f32 %v3019_v63, %v5050_v23  ;;  %vm2160_vm4 = vcmp.eq.f32.partialorder %v5176_v32, 0.0  ;;  %v2161_v21 = vand.u32 2147483648, %v5176_v32 }
 0x24e   :  { %v2148_v41 = vsel %vm2146_vm6, %v2147_v11, %v2145_v62  ;;  %v1872_v20 = vmul.f32 %v3021_v24, %v5063_v44  ;;  %v3023_v28 = vpop.eup %3022  ;;  %vm1896_vm13 = vcmp.eq.f32.partialorder %v5138_v34, 0.0  ;;  %vm2179_vm5 = vcmp.eq.f32.partialorder %v5209_v1, inf }
 0x24f   :  { %v2131_v63 = vsel %vm2130_vm7, %v5050_v23, %v2129_v16  ;;  %v3025_v11 = vpop.eup %3024  ;;  %v2150_v24 = vmul.f32 %v3023_v28, %v5091_v26  ;;  %3040 = vrsqrt.f32 %v5257_v14  ;;  %v5276_v30 = vadd.f32 -2.0, %v2148_v41 }
 0x250   :  { %v3027_v18 = vpop.eup %3026  ;;  %v2136_v16 = vmul.f32 %v3025_v11, %v5106_v58  ;;  %vm2181_vm6 = vcmp.eq.f32.partialorder %v5209_v1, 0.0  ;;  %v2182_v4 = vand.u32 2147483648, %v5209_v1  ;;  %v2134_v28 = vsel %vm2132_vm8, %v2133_v33, %v2131_v63 }
 0x251   :  { %v3029_v22 = vpop.eup %3028  ;;  %v1874_v31 = vsel %vm1873_vm9, %v5063_v44, %v1872_v20  ;;  %v2152_v48 = vsel %vm2151_vm10, %v5091_v26, %v2150_v24  ;;  %v1893_v41 = vmul.f32 %v3027_v18, %v5138_v34  ;;  %vm1901_vm7 = vcmp.eq.f32.partialorder %v5182_v17, inf }
 0x252   :  { %v3031_v11 = vpop.eup %3030  ;;  %v2155_v62 = vsel %vm2153_vm11, %v2154_v6, %v2152_v48  ;;  %v2138_v23 = vsel %vm2137_vm1, %v5106_v58, %v2136_v16  ;;  %vm2186_vm8 = vcmp.eq.f32.partialorder %v5222_v43, inf  ;;  %v2189_v33 = vand.u32 2147483648, %v5222_v43  ;;  %v5305_v48 = vpop.xlane.xlu0 %1994 }
 0x253   :  { %vm2165_vm9 = vcmp.eq.f32.partialorder %v5243_v61, inf  ;;  %v3033_v20 = vpop.eup %3032  ;;  %v2141_v18 = vsel %vm2139_vm12, %v2140_v3, %v2138_v23  ;;  %v2171_v63 = vmul.f32 %v3029_v22, %v5156_v52  ;;  %vm2188_vm10 = vcmp.eq.f32.partialorder %v5222_v43, 0.0 }
 0x254   :  { %vm2167_vm11 = vcmp.eq.f32.partialorder %v5243_v61, 0.0  ;;  %v2168_v26 = vand.u32 2147483648, %v5243_v61  ;;  %v3035_v6 = vpop.eup %3034  ;;  %v2583_v24 = vmax.f32 %v5276_v30, 0.0  ;;  %v2836_v16 = vadd.f32 -2.0, %v2134_v28 }
 0x255   :  { %v5312_v58 = vsel %vm1875_vm14, %v1876_v19, %v1874_v31  ;;  %v2157_v22 = vmul.f32 %v3031_v11, %v5176_v32  ;;  %v2839_v3 = vadd.f32 -2.0, %v2155_v62  ;;  %v2837_v23 = vadd.f32 -2.0, %v2141_v18  ;;  %v3037_v30 = vpop.eup %3036 }
 0x256   :  { %v1895_v42 = vsel %vm1894_vm15, %v5138_v34, %v1893_v41  ;;  %v2173_v15 = vsel %vm2172_vm0, %v5156_v52, %v2171_v63  ;;  %v1900_v31 = vmul.f32 %v3033_v20, %v5182_v17  ;;  %vm1903_vm14 = vcmp.eq.f32.partialorder %v5182_v17, 0.0  ;;  %v3039_v62 = vpop.eup %3038 }
 0x257   :  { %v2176_v28 = vsel %vm2174_vm2, %v2175_v37, %v2173_v15  ;;  %v2159_v44 = vsel %vm2158_vm3, %v5176_v32, %v2157_v22  ;;  %v2178_v19 = vmul.f32 %v3035_v6, %v5209_v1  ;;  %v2253_v41 = vsub.f32 %v5312_v58, %v4561_v46 }
 0x258   :  { %v2842_v11 = vadd.f32 -2.0, %v2176_v28  ;;  %v2162_v18 = vsel %vm2160_vm4, %v2161_v21, %v2159_v44  ;;  %vm2207_vm1 = vcmp.eq.f32.partialorder %v5257_v14, inf  ;;  %v2581_v52 = vmax.f32 %v2836_v16, 0.0  ;;  %v5345_v16 = vpop.xlane.xlu0 %1992 }
 0x259   :  { %v5823_v15 = vand.u32 2147483648, %v5138_v34  ;;  %v2840_v20 = vadd.f32 -2.0, %v2162_v18  ;;  %v2180_v63 = vsel %vm2179_vm5, %v5209_v1, %v2178_v19  ;;  %v3041_v6 = vpop.eup %3040  ;;  %v2584_v22 = vmax.f32 %v2839_v3, 0.0 }
 0x25a   :  { %v2183_v46 = vsel %vm2181_vm6, %v2182_v4, %v2180_v63  ;;  %v2185_v32 = vmul.f32 %v3037_v30, %v5222_v43  ;;  %v2164_v21 = vmul.f32 %v3039_v62, %v5243_v61  ;;  %v2582_v58 = vmax.f32 %v2837_v23, 0.0 }
 0x25b   :  { %v1898_v37 = vsel %vm1896_vm13, %v5823_v15, %v1895_v42  ;;  %v1902_v34 = vsel %vm1901_vm7, %v5182_v17, %v1900_v31  ;;  %v2843_v42 = vadd.f32 -2.0, %v2183_v46  ;;  %v2206_v28 = vmul.f32 %v3041_v6, %v5257_v14  ;;  %v5370_v15 = vpop.xlane.xlu1 %1998 }
 0x25c   :  { %v2587_v44 = vmax.f32 %v2842_v11, 0.0  ;;  %v2585_v19 = vmax.f32 %v2840_v20, 0.0  ;;  %v2187_v4 = vsel %vm2186_vm8, %v5222_v43, %v2185_v32  ;;  %v2166_v1 = vsel %vm2165_vm9, %v5243_v61, %v2164_v21  ;;  %v5390_v46 = vpop.xlane.xlu0 %2000 }
 0x25d   :  { %v2588_v3 = vmax.f32 %v2843_v42, 0.0  ;;  %v2190_v23 = vsel %vm2188_vm10, %v2189_v33, %v2187_v4  ;;  %v2169_v30 = vsel %vm2167_vm11, %v2168_v26, %v2166_v1  ;;  %v2210_v31 = vand.u32 2147483648, %v5257_v14  ;;  %v5827_v4 = vld [vmem:[#allocation39_spill] sm:$0xff] }
 0x25e   :  { %v5362_v62 = vadd.f32 -2.0, %v2190_v23  ;;  %v5364_v11 = vadd.f32 -2.0, %v2169_v30  ;;  %v2208_v18 = vsel %vm2207_vm1, %v5257_v14, %v2206_v28  ;;  %3042 = vrsqrt.f32 %v5305_v48  ;;  %v5830_v30 = vld [vmem:[#allocation40_spill] sm:$0xff] }
 0x25f   :  { %v5373_v43 = vrot.slane %v2583_v24, %v3965_v36  ;;  %v5376_v61 = vrot.slane %v2581_v52, %v3968_v40  ;;  %v2256_v33 = vsub.f32 %v1898_v37, %v4569_v25  ;;  %vm2209_vm12 = vcmp.eq.f32.partialorder %v5257_v14, 0.0 }
 0x260   :  { %v5381_v26 = vrot.slane %v2584_v22, %v3971_v39  ;;  %v5384_v20 = vrot.slane %v2582_v58, %v3981_v49  ;;  %v5824_v63 = vand.u32 2147483648, %v5182_v17  ;;  %v2211_v24 = vsel %vm2209_vm12, %v2210_v31, %v2208_v18 }
 0x261   :  { %v5393_v52 = vrot.slane %v2587_v44, %v3965_v36  ;;  %v5396_v25 = vrot.slane %v2585_v19, %v3968_v40  ;;  %v5399_v14 = vrot.slane %v2588_v3, %v3971_v39  ;;  %3044 = vrsqrt.f32 %v5370_v15  ;;  %v5825_v44 = vld [vmem:[#allocation36_spill] sm:$0xff] }
 0x262   :  { %v1905_v6 = vsel %vm1903_vm14, %v5824_v63, %v1902_v34  ;;  %v2589_v37 = vmax.f32 %v5362_v62, 0.0  ;;  %v2586_v22 = vmax.f32 %v5364_v11, 0.0  ;;  %vm2200_vm15 = vcmp.eq.f32.partialorder %v5305_v48, inf  ;;  %v5835_v63 = vld [vmem:[#allocation47_spill] sm:$0xff] }
 0x263   :  { %3046 = vrsqrt.f32 %v5345_v16  ;;  %v5406_v17 = vadd.f32 -2.0, %v2211_v24  ;;  %vm2202_vm0 = vcmp.eq.f32.partialorder %v5305_v48, 0.0  ;;  %v2203_v32 = vand.u32 2147483648, %v5305_v48 }
 0x264   :  { %v2217_v21 = vand.u32 2147483648, %v5370_v15  ;;  %3048 = vrsqrt.f32 %v5390_v46  ;;  %v2196_v58 = vand.u32 2147483648, %v5345_v16  ;;  %v2257_v34 = vsub.f32 %v1905_v6, %v4800_v27 }
 0x265   :  { %v2285_v42 = vadd.f32 0.5, %v2253_v41  ;;  %v2288_v28 = vadd.f32 0.5, %v2256_v33  ;;  %vm2214_vm2 = vcmp.eq.f32.partialorder %v5370_v15, inf  ;;  %vm5826_vm3 = vcmask 195712  }
 0x266   :  { %v2373_v19 = vsel %vm5826_vm3, %v4803_v12, %v5825_v44  ;;  %vm2379_vm4 = vcmask 261312   ;;  %vm5828_vm13 = vmmov %vm5826_vm3  ;;  %vm5829_vm5 = vcmask 130112   ;;  %vm2216_vm6 = vcmp.eq.f32.partialorder %v5370_v15, 0.0 }
 0x267   :  { %v2394_v1 = vsel %vm5828_vm13, %v4817_v45, %v5827_v4  ;;  %v2408_v3 = vsel %vm5829_vm5, %v4831_v7, %v4822_v13  ;;  %vm2193_vm7 = vcmp.eq.f32.partialorder %v5345_v16, inf  ;;  %v2224_v27 = vand.u32 2147483648, %v5390_v46  ;;  %vm5831_vm10 = vmmov %vm5826_vm3  ;;  %v5832_v7 = vld [vmem:[#allocation46_spill] sm:$0xff] }
 0x268   :  { %v2289_v41 = vadd.f32 0.5, %v2257_v34  ;;  %v2317_v23 = vmax.f32 %v2285_v42, 0.0  ;;  %v2380_v12 = vsel %vm2379_vm4, %v4814_v9, %v2373_v19  ;;  %vm2195_vm8 = vcmp.eq.f32.partialorder %v5345_v16, 0.0  ;;  %vm5833_vm11 = vmmov %vm5829_vm5  ;;  %v3043_v33 = vpop.eup %3042  ;;  %v5840_v19 = vld [vmem:[#allocation20_spill] sm:$0xff] }
 0x269   :  { %vm2221_vm9 = vcmp.eq.f32.partialorder %v5390_v46, inf  ;;  %v2399_v45 = vsel %vm2379_vm4, %v4825_v38, %v2394_v1  ;;  %v2413_v13 = vsel %vm5831_vm10, %v5830_v30, %v2408_v3  ;;  %v2427_v31 = vsel %vm5833_vm11, %v4935_v60, %v5832_v7  ;;  %vm5834_vm14 = vmmov %vm5829_vm5  ;;  %v5837_v60 = vld [vmem:[#allocation54_spill] sm:$0xff] }
 0x26a   :  { %v2446_v18 = vsel %vm5834_vm14, %v4993_v56, %v4997_v35  ;;  %vm2223_vm1 = vcmp.eq.f32.partialorder %v5390_v46, 0.0  ;;  %v2320_v9 = vmax.f32 %v2288_v28, 0.0  ;;  %v2418_v6 = vsel %vm2379_vm4, %v5835_v63, %v2413_v13  ;;  %vm5836_vm12 = vmmov %vm5826_vm3  ;;  %v5838_v56 = vld [vmem:[#allocation22_spill] sm:$0xff] }
 0x26b   :  { %v2432_v38 = vsel %vm5836_vm12, %v4989_v57, %v2427_v31  ;;  %v2451_v24 = vsel %vm5826_vm3, %v5002_v59, %v2446_v18  ;;  %v2199_v34 = vmul.f32 %v3043_v33, %v5305_v48  ;;  %v5839_v35 = vmax.f32 %v5838_v56, 0.0  ;;  %v5841_v28 = vld [vmem:[#allocation18_spill] sm:$0xff]  ;;  %vm5842_vm13 = vmmov %vm5829_vm5  ;;  %v3045_v18 = vpop.eup %3044 }
 0x26c   :  { %v2437_v42 = vsel %vm2379_vm4, %v5837_v60, %v2432_v38  ;;  %v2465_v4 = vsel %vm5842_vm13, %v5841_v28, %v5840_v19  ;;  %v5843_v1 = vmax.f32 %v5158_v50, 0.0  ;;  %v5844_v59 = vmax.f32 %v5184_v47, 0.0  ;;  %vm5848_vm5 = vmmov %vm5826_vm3 }
 0x26d   :  { %v2455_v44 = vrot.slane %v5839_v35, %v3981_v49  ;;  %v5845_v30 = vmax.f32 %v5150_v54, 0.0  ;;  %v5846_v7 = vmax.f32 %v5178_v51, 0.0  ;;  %v2201_v33 = vsel %vm2200_vm15, %v5305_v48, %v2199_v34  ;;  %v3047_v60 = vpop.eup %3046  ;;  %vm5849_vm10 = vmmov %vm5833_vm11 }
 0x26e   :  { %v2469_v57 = vrot.slane %v5843_v1, %v3968_v40  ;;  %v2474_v3 = vrot.slane %v5844_v59, %v3981_v49  ;;  %v5847_v63 = vmax.f32 %v5192_v2, 0.0  ;;  %v2493_v38 = vrot.slane %v2317_v23, %v3981_v49  ;;  %v3049_v19 = vpop.eup %3048  ;;  %vm5850_vm15 = vmmov %vm5826_vm3 }
 0x26f   :  { %v2479_v13 = vrot.slane %v5845_v30, %v3965_v36  ;;  %v2483_v31 = vrot.slane %v5846_v7, %v3971_v39  ;;  %v2456_v50 = vsel %vm2379_vm4, %v2455_v44, %v2451_v24  ;;  %v2204_v54 = vsel %vm2202_vm0, %v2203_v32, %v2201_v33  ;;  %vm5853_vm0 = vmmov %vm5849_vm10 }
 0x270   :  { %v2488_v47 = vrot.slane %v5847_v63, %v3968_v40  ;;  %v2213_v51 = vmul.f32 %v3045_v18, %v5370_v15  ;;  %v2470_v56 = vsel %vm5848_vm5, %v2469_v57, %v2465_v4  ;;  %v2192_v34 = vmul.f32 %v3047_v60, %v5345_v16  ;;  %v5855_v60 = vld [vmem:[#allocation51_spill] sm:$0xff]  ;;  %vm5863_vm13 = vmmov %vm5853_vm0 }
 0x271   :  { %v2484_v35 = vsel %vm5849_vm10, %v2483_v31, %v2479_v13  ;;  %v2321_v24 = vmax.f32 %v2289_v41, 0.0  ;;  %v2475_v44 = vsel %vm2379_vm4, %v2474_v3, %v2470_v56  ;;  %v5485_v28 = vadd.f32 -2.0, %v2204_v54  ;;  %v5856_v54 = vld [vmem:[#allocation56_spill] sm:$0xff]  ;;  %vm5865_vm10 = vmmov %vm5853_vm0 }
 0x272   :  { %v2489_v2 = vsel %vm5850_vm15, %v2488_v47, %v2484_v35  ;;  %v2215_v48 = vsel %vm2214_vm2, %v5370_v15, %v2213_v51  ;;  %v2220_v32 = vmul.f32 %v3049_v19, %v5390_v46  ;;  %v2194_v41 = vsel %vm2193_vm7, %v5345_v16, %v2192_v34  ;;  %vm5854_vm2 = vmmov %vm5826_vm3  ;;  %v5858_v51 = vld [vmem:[#allocation57_spill] sm:$0xff]  ;;  %v5859_v35 = vld [vmem:[#allocation55_spill] sm:$0xff] }
 0x273   :  { %v2494_v23 = vsel %vm2379_vm4, %v2493_v38, %v2489_v2  ;;  %v2218_v4 = vsel %vm2216_vm6, %v2217_v21, %v2215_v48  ;;  %v5851_v1 = vmax.f32 %v5186_v10, 0.0  ;;  %v5852_v59 = vmax.f32 %v5218_v55, 0.0  ;;  %vm5861_vm3 = vmmov %vm5854_vm2  ;;  %v5862_v34 = vld [vmem:[#allocation19_spill] sm:$0xff] }
 0x274   :  { %v5503_v30 = vadd.f32 -2.0, %v2218_v4  ;;  %v2197_v13 = vsel %vm2195_vm8, %v2196_v58, %v2194_v41  ;;  %v2222_v15 = vsel %vm2221_vm9, %v5390_v46, %v2220_v32  ;;  %v2507_v21 = vrot.slane %v2320_v9, %v3968_v40  ;;  %vm5864_vm5 = vmmov %vm5854_vm2  ;;  %v5866_v4 = vld [vmem:[#allocation49_spill] sm:$0xff] }
 0x275   :  { %v2498_v57 = vrot.slane %v5851_v1, %v3965_v36  ;;  %v2502_v3 = vrot.slane %v5852_v59, %v3971_v39  ;;  %v2845_v7 = vadd.f32 -2.0, %v2197_v13  ;;  %v2225_v10 = vsel %vm2223_vm1, %v2224_v27, %v2222_v15  ;;  %vm5867_vm15 = vmmov %vm5854_vm2 }
 0x276   :  { %v2512_v55 = vrot.slane %v2321_v24, %v3981_v49  ;;  %v2592_v18 = vmax.f32 %v5406_v17, 0.0  ;;  %v2591_v33 = vmax.f32 %v5485_v28, 0.0  ;;  %vm2514_vm6 = vcmask 1041409  }
 0x277   :  { %v2503_v31 = vsel %vm5853_vm0, %v2502_v3, %v2498_v57  ;;  %v2593_v58 = vmax.f32 %v5503_v30, 0.0  ;;  %v2515_v9 = vsel %vm2514_vm6, %v2399_v45, %v2380_v12  ;;  %vm2516_vm7 = vcmask 1042434   ;;  %v5857_v45 = vld [vmem:[#allocation52_spill] sm:$0xff] }
 0x278   :  { %v2508_v16 = vsel %vm5854_vm2, %v2507_v21, %v2503_v31  ;;  %v2849_v46 = vadd.f32 -2.0, %v2225_v10  ;;  %v2517_v27 = vsel %vm2516_vm7, %v2418_v6, %v2515_v9  ;;  %vm2518_vm8 = vcmask 1043459  }
 0x279   :  { %v2513_v63 = vsel %vm2379_vm4, %v2512_v55, %v2508_v16  ;;  %vm2520_vm9 = vcmask 1044484   ;;  %v2590_v47 = vmax.f32 %v2845_v7, 0.0  ;;  %v2519_v17 = vsel %vm2518_vm8, %v2437_v42, %v2517_v27  ;;  %v5860_v42 = vld [vmem:[#allocation48_spill] sm:$0xff] }
 0x27a   :  { %vm2522_vm11 = vcmask 1045509   ;;  %vm2524_vm14 = vcmask 1046534   ;;  %v2521_v38 = vsel %vm2520_vm9, %v2456_v50, %v2519_v17  ;;  %vm2526_vm1 = vcmask 1047559  }
 0x27b   :  { %v2645_v12 = vsel %vm2379_vm4, %v5856_v54, %v5855_v60  ;;  %v2664_v6 = vsel %vm2379_vm4, %v5858_v51, %v5857_v45  ;;  %v2523_v56 = vsel %vm2522_vm11, %v2475_v44, %v2521_v38  ;;  %vm2529_vm12 = vcmask 261120  }
 0x27c   :  { %v2678_v19 = vsel %vm5861_vm3, %v5860_v42, %v5859_v35  ;;  %v2692_v50 = vsel %vm5863_vm13, %v5190_v53, %v5862_v34  ;;  %v2594_v24 = vmax.f32 %v2849_v46, 0.0  ;;  %v2525_v2 = vsel %vm2524_vm14, %v2494_v23, %v2523_v56 }
 0x27d   :  { %v2697_v28 = vsel %vm5864_vm5, %v5206_v8, %v2692_v50  ;;  %v2711_v44 = vsel %vm5865_vm10, %v5213_v5, %v5203_v29  ;;  %v2527_v48 = vsel %vm2526_vm1, %v2513_v63, %v2525_v2  ;;  %v2683_v32 = vsel %vm2379_vm4, %v5199_v0, %v2678_v19 }
 0x27e   :  { %v2702_v41 = vsel %vm2379_vm4, %v5866_v4, %v2697_v28  ;;  %v2716_v53 = vsel %vm5867_vm15, %v5376_v61, %v2711_v44  ;;  %2530 = vst.msk [vmem:[#allocation10] sm:$0xff] %vm2529_vm12, %v2527_v48  ;;  %v2730_v29 = vsel %vm5853_vm0, %v5381_v26, %v5373_v43  ;;  %v2739_v5 = vrot.slane %v2586_v22, %v3981_v49 }
 0x27f   :  { %v2721_v8 = vsel %vm2379_vm4, %v5384_v20, %v2716_v53  ;;  %v2753_v0 = vrot.slane %v2589_v37, %v3968_v40 }
 0x280   :  { %3109 = shalt.err (!%p3106_p6)
}
 0x281   :  { %s3110_s16 = scalar_lea.hbm %s5612_s2, 128 }
 0x282   :  { %p3111_p7 = scmp.ne.s32.totalorder %s5612_s2, %s3110_s16  ;;  %p3114_p8 = scmp.lt.u32.totalorder %s3110_s16, %s5612_s2 }
 0x284   :  { %p3116_p9 = pnand %p3114_p8, %p3111_p7 }
 0x286   :  { %3119 = shalt.err (!%p3116_p9)
}
 0x287   :  { %2797 = dma.vmem_to_hbm [thread:$0]  %s2795_s12, 128, %s5612_s2, [#allocation7]   ;;  %v2758_v62 = vrot.slane %v2590_v47, %v3981_v49  ;;  %v2763_v11 = vrot.slane %v2591_v33, %v3965_v36  ;;  %v2767_v43 = vrot.slane %v2592_v18, %v3971_v39  ;;  %v2772_v61 = vrot.slane %v2593_v58, %v3968_v40  ;;  %vm5868_vm3 = vmmov %vm5853_vm0 }
 0x288   :  { %v2735_v26 = vsel %vm5854_vm2, %v5396_v25, %v2730_v29  ;;  %v2749_v20 = vsel %vm5868_vm3, %v5399_v14, %v5393_v52  ;;  %v2777_v37 = vrot.slane %v2594_v24, %v3981_v49  ;;  %v2779_v22 = vsel %vm2514_vm6, %v2664_v6, %v2645_v12  ;;  %vm5869_vm13 = vmmov %vm5854_vm2  ;;  %s3157_s2 = smov [#allocation11]  }
 0x289   :  { %v2740_v23 = vsel %vm2379_vm4, %v2739_v5, %v2735_v26  ;;  %v2754_v1 = vsel %vm5869_vm13, %v2753_v0, %v2749_v20  ;;  %vm5870_vm5 = vmmov %vm5853_vm0  ;;  %v2780_v39 = vsel %vm2516_vm7, %v2683_v32, %v2779_v22  ;;  %s2804_s23 = sshll.u32 %s3157_s2, 4  ;;  %s2805_s23 = int_to_ptr.vmem [resolvable:$true] %s2804_s23 }
 0x28a   :  { %v2768_v36 = vsel %vm5870_vm5, %v2767_v43, %v2763_v11  ;;  %v2759_v40 = vsel %vm2379_vm4, %v2758_v62, %v2754_v1  ;;  %vm5871_vm10 = vmmov %vm5854_vm2  ;;  %v2781_v57 = vsel %vm2518_vm8, %v2702_v41, %v2780_v39  ;;  %s3120_s24 = scalar_lea.vmem %s2805_s23, 128  ;;  %p3125_p11 = scmp.lt.s32.totalorder %s2805_s23, %s2805_s23 }
 0x28b   :  { %v2773_v25 = vsel %vm5871_vm10, %v2772_v61, %v2768_v36  ;;  %v2782_v52 = vsel %vm2520_vm9, %v2721_v8, %v2781_v57  ;;  %p3121_p10 = scmp.ne.s32.totalorder %s2805_s23, %s3120_s24  ;;  %p3126_p12 = scmp.lt.s32.totalorder %s3120_s24, %s3120_s24 }
 0x28c   :  { %v2778_v49 = vsel %vm2379_vm4, %v2777_v37, %v2773_v25  ;;  %v2783_v14 = vsel %vm2522_vm11, %v2740_v23, %v2782_v52 }
 0x28d   :  { %v2784_v59 = vsel %vm2524_vm14, %v2759_v40, %v2783_v14  ;;  %p3127_p13 = por %p3126_p12, %p3125_p11 }
 0x28e   :  { %v2785_v3 = vsel %vm2526_vm1, %v2778_v49, %v2784_v59 }
 0x28f   :  { %2787 = vst.msk [vmem:[#allocation11] sm:$0xff] %vm2529_vm12, %v2785_v3  ;;  %p3128_p0 = pnand %p3127_p13, %p3121_p10 }
 0x291   :  { %3131 = shalt.err (!%p3128_p0)
}
 0x292   :  { %s3132_s27 = scalar_lea.hbm %s5613_s3, 128 }
 0x293   :  { %p3133_p1 = scmp.ne.s32.totalorder %s5613_s3, %s3132_s27  ;;  %p3136_p2 = scmp.lt.u32.totalorder %s3132_s27, %s5613_s3 }
 0x295   :  { %p3138_p3 = pnand %p3136_p2, %p3133_p1 }
 0x297   :  { %3141 = shalt.err (!%p3138_p3)
}
 0x298   :  { %2807 = dma.vmem_to_hbm [thread:$0]  %s2805_s23, 128, %s5613_s3, [#allocation12]  }
 0x299   :  { %3146 = dma.done.wait [#allocation7], 128  }
 0x29a   :  { %3147 = vsyncadd [#allocation7], 4294967168 }
 0x29b   :  { %3148 = dma.done.wait [#allocation12], 128  }
 0x29c   :  { %3149 = vsyncadd [#allocation12], 4294967168 }
 0x29d   :  { %2814 = vsyncpa [#allocation6], 1 }
 0x29e   :  { %2815 = vsyncpa [#allocation9], 1 }
 0x29f   :  { %2816 = vsyncpa [#allocation7], 1 }
 0x2a0   :  { %2817 = vsyncpa [#allocation12], 1 }

</bundles_post_ra>
